<compile_context>
chip_gen: v5e
topology: v5e:2x2
jax: 0.10.0
libtpu: 0.0.40
codegen_flags: <defaults>
</compile_context>

<pallas_src>
import jax
import jax.numpy as jnp
from jax.experimental import pallas as pl
from jax.experimental.pallas import tpu as pltpu


def _round_up(x, m):
    return ((x + m - 1) // m) * m


# ---------------------------------------------------------------------------
# Hardware-aware tiling helpers
# ---------------------------------------------------------------------------
def _num_tensorcores():
    """v7x packs 2 TensorCores behind one jax device; v5e/v6e have 1.
    Only used to shape the grid (>= 4 steps per core on dual-core parts)."""
    try:
        kind = jax.devices()[0].device_kind.lower()
        if "v7" in kind or "7x" in kind:
            return 2
    except Exception:
        pass
    return 1


def _choose_tile_s(S, n_sample, c_max, n_cores, batch):
    """Centroid tile along the lane axis.

    Constraints / goals:
      * tile_s must be a multiple of 128 (lane-dense DMA, unmasked vst on the
        output block) or equal S (full-dim exemption from the (8,128) rule).
      * cap the per-step working set (bf16 double-buffered input + ~3 live f32
        intermediates) at ~8 MiB so v7x's 64 MiB VMEM is never stressed.
      * dual-TC parts (v7x): keep >= 4 grid steps per core when S allows.
      * single-TC parts (v5e/v6e): prefer the largest tile (fewest grid steps).
    """
    if S % 128 != 0:
        return S
    cands = [d for d in range(128, S + 1, 128) if S % d == 0]
    per_pt = 2 * 2 * 8 + 3 * 4 * c_max          # bytes live per gathered point
    budget = 8 * 1024 * 1024
    tile = cands[0]
    for d in cands:
        if d * n_sample * per_pt <= budget:
            tile = d
    if n_cores > 1:
        while batch * (S // tile) < 4 * n_cores:
            smaller = [d for d in cands if d < tile]
            if not smaller:
                break
            tile = smaller[-1]
    return tile


# ---------------------------------------------------------------------------
# Pallas kernel: channels-first fused (matmul+bias+relu) x L, max over samples
# ---------------------------------------------------------------------------
def _make_branch_kernel(num_layers, tile_s, n_sample):
    def kernel(*refs):
        x_ref = refs[0]                       # [C_in_pad, tile_s*ns]  bf16
        out_ref = refs[-1]                    # [C_out_pad, tile_s]    f32
        params = refs[1:-1]                   # w0, b0, w1, b1, ...
        h = x_ref[...]                        # bf16 MXU operand, points on lanes
        for l in range(num_layers):
            w = params[2 * l][...]            # bf16 [C_out_l, C_in_l]
            b = params[2 * l + 1][...]        # f32  [C_out_l, 1]
            # MXU matmul with f32 accumulation; bias + ReLU stay f32 (v5e-safe).
            acc = jnp.dot(w, h, preferred_element_type=jnp.float32) + b
            acc = jnp.maximum(acc, 0.0)
            # Next layer's MXU operand in bf16; keep f32 for the final max.
            h = acc.astype(jnp.bfloat16) if l < num_layers - 1 else acc
        c_out = h.shape[0]
        # max over the n_sample consecutive lanes belonging to each centroid
        out_ref[...] = jnp.max(h.reshape(c_out, tile_s, n_sample), axis=-1)
    return kernel


def branch_mlp_max(slab, weights, biases, *, n_sample):
    """slab: [B, C_in_pad, S*ns] bf16 (channels-first, sample-fastest lanes).
    weights[l]: bf16 [C_out_l, C_in_l]; biases[l]: f32 [C_out_l, 1].
    Returns [B, C_out_pad, S] f32 (max over samples of the MLP output)."""
    B, c_in_pad, L = slab.shape
    assert L % n_sample == 0
    S = L // n_sample
    num_layers = len(weights)
    c_out_pad = weights[-1].shape[0]
    c_max = max(w.shape[0] for w in weights)

    n_cores = _num_tensorcores()
    tile_s = _choose_tile_s(S, n_sample, c_max, n_cores, B)
    tile_pts = tile_s * n_sample

    in_specs = [pl.BlockSpec((None, c_in_pad, tile_pts), lambda b, s: (b, 0, s))]
    params = []
    for w, bb in zip(weights, biases):
        in_specs.append(pl.BlockSpec(w.shape, lambda b, s: (0, 0)))
        in_specs.append(pl.BlockSpec(bb.shape, lambda b, s: (0, 0)))
        params.extend([w, bb])

    # VMEM need: double-buffered IO tiles + weights + ~live f32 intermediates
    need = (2 * c_in_pad * tile_pts * 2
            + 2 * c_out_pad * tile_s * 4
            + 2 * sum(int(w.size) * 2 + int(bb.size) * 4
                      for w, bb in zip(weights, biases))
            + 4 * c_max * tile_pts * 4)
    vmem_limit = int(min(max(2 * need, 16 * 2 ** 20), 56 * 2 ** 20))

    return pl.pallas_call(
        _make_branch_kernel(num_layers, tile_s, n_sample),
        out_shape=jax.ShapeDtypeStruct((B, c_out_pad, S), jnp.float32),
        grid=(B, S // tile_s),
        in_specs=in_specs,
        out_specs=pl.BlockSpec((None, c_out_pad, tile_s), lambda b, s: (b, 0, s)),
        compiler_params=pltpu.CompilerParams(
            dimension_semantics=("parallel", "parallel"),
            vmem_limit_bytes=vmem_limit),
    )(slab, *params)


def _reference_branch_mlp_max(slab, weights, biases, *, n_sample):
    """Pure-JAX reference of the fused kernel (same bf16 rounding points)."""
    B, _, L = slab.shape
    S = L // n_sample
    h = slab.astype(jnp.float32)
    for l, (w, bb) in enumerate(zip(weights, biases)):
        h = jnp.einsum("oc,bcp->bop", w.astype(jnp.float32), h) \
            + bb.astype(jnp.float32)[None]
        h = jnp.maximum(h, 0.0)
        if l < len(weights) - 1:
            h = h.astype(jnp.bfloat16).astype(jnp.float32)
    c_out = h.shape[1]
    return jnp.max(h.reshape(B, c_out, S, n_sample), axis=-1)


# ---------------------------------------------------------------------------
# Plain-JAX glue: farthest point sampling, ball query, gather (PointNet++ std)
# ---------------------------------------------------------------------------
def farthest_point_sample(xyz, n_points):
    """xyz: [B, N, 3] -> indices [B, n_points] (deterministic, start at idx 0)."""
    B, N, _ = xyz.shape

    def body(carry, _):
        distance, farthest = carry
        centroid = jnp.take_along_axis(xyz, farthest[:, None, None], axis=1)
        dist = jnp.sum((xyz - centroid) ** 2, axis=-1)
        distance = jnp.minimum(distance, dist)
        new_far = jnp.argmax(distance, axis=-1).astype(jnp.int32)
        return (distance, new_far), farthest

    init = (jnp.full((B, N), 1e10, dtype=jnp.float32),
            jnp.zeros((B,), dtype=jnp.int32))
    (_, _), centroids = jax.lax.scan(body, init, None, length=n_points)
    return centroids.T                                               # [B, n_points]


def group_points(points, idx):
    """points: [B, N, C]; idx: [B, S] or [B, S, ns] -> gathered points."""
    return jax.vmap(lambda p, i: p[i])(points, idx)


def query_ball_point(qb_radius, n_sample, x_y_z_1, x_y_z_2):
    """x_y_z_1: all points [B,N,3]; x_y_z_2: query centers [B,S,3] -> idx [B,S,ns].

    Sort-free prefix selection of the n_sample smallest in-radius indices,
    matching the reference 'set OOB to N, sort ascending, take first n_sample,
    replace N with the first entry' semantics."""
    B, N, _ = x_y_z_1.shape
    sqrdists = jnp.sum(
        (x_y_z_2[:, :, None, :] - x_y_z_1[:, None, :, :]) ** 2, axis=-1)   # [B,S,N]
    in_ball = sqrdists <= qb_radius ** 2
    cs = jnp.cumsum(in_ball.astype(jnp.int32), axis=-1)                    # prefix counts
    thresh = jnp.arange(n_sample, dtype=jnp.int32)                         # [ns]
    # index of the (j+1)-th in-radius point == #positions whose prefix count <= j
    # (== N when fewer than j+1 in-radius points exist).
    group_idx = jnp.sum((cs[..., None] <= thresh).astype(jnp.int32), axis=2)
    group_first = group_idx[:, :, 0:1]
    group_idx = jnp.where(group_idx == N, group_first, group_idx)
    return group_idx


# ---------------------------------------------------------------------------
# Module: parameter init (deterministic) + forward
# ---------------------------------------------------------------------------
class PointNetSAMsg:
    def __init__(self, n_points, qb_radius_list, n_sample_list, n_input_ch,
                 mlp_list, *, seed=0):
        self._n_points = n_points
        self._qb_radius_list = list(qb_radius_list)
        self._n_sample_list = list(n_sample_list)
        self._mlp_list = [list(m) for m in mlp_list]
        self._n_input_ch = n_input_ch
        self._c_in_pad = _round_up(n_input_ch, 8)      # channels live on sublanes

        key = jax.random.PRNGKey(seed)
        eps = 1e-5
        # Per branch, per layer: fold Conv2d(1x1) + BatchNorm2d(eval) into (W, b)
        # in [C_out, C_in] (channels-first) layout; pad every layer width to a
        # multiple of 8 (sublane alignment only -- no 128-lane padding needed in
        # the channels-first layout); weights stored bf16 for the MXU.
        self._folded = []
        for branch in self._mlp_list:
            ws, bs = [], []
            b_ch, b_ch_pad = n_input_ch, self._c_in_pad
            for n_out in branch:
                key, kw, kb, kg, kbe, km, kv = jax.random.split(key, 7)
                bound = 1.0 / float(b_ch) ** 0.5
                W = jax.random.uniform(kw, (n_out, b_ch), jnp.float32, -bound, bound)
                bc = jax.random.uniform(kb, (n_out,), jnp.float32, -bound, bound)
                gamma = jax.random.uniform(kg, (n_out,), jnp.float32, 0.5, 1.5)
                beta = jax.random.uniform(kbe, (n_out,), jnp.float32, -0.1, 0.1)
                rmean = jax.random.uniform(km, (n_out,), jnp.float32, -0.1, 0.1)
                rvar = jax.random.uniform(kv, (n_out,), jnp.float32, 0.5, 1.5)
                s = gamma / jnp.sqrt(rvar + eps)
                W_fold = W * s[:, None]
                b_fold = (bc - rmean) * s + beta
                n_out_pad = _round_up(n_out, 8)
                W_fold = jnp.pad(W_fold, ((0, n_out_pad - n_out), (0, b_ch_pad - b_ch)))
                b_fold = jnp.pad(b_fold, (0, n_out_pad - n_out))
                ws.append(W_fold.astype(jnp.bfloat16))
                bs.append(b_fold.reshape(-1, 1).astype(jnp.float32))
                b_ch, b_ch_pad = n_out, n_out_pad
            self._folded.append((ws, bs))

    def __call__(self, x_y_z, points):
        return self._forward(x_y_z, points, use_pallas=True)

    def _forward(self, x_y_z, points, use_pallas=True):
        # x_y_z: [B, 3, N]; points: [B, D, N] or None (PyTorch convention)
        B, _, N = x_y_z.shape
        S = self._n_points

        xyz_nl = jnp.transpose(x_y_z, (0, 2, 1))                 # [B, N, 3]
        fps_idx = farthest_point_sample(xyz_nl, S)               # [B, S]
        new_xyz_nl = group_points(xyz_nl, fps_idx)               # [B, S, 3]
        new_xyz_cf = jnp.transpose(new_xyz_nl, (0, 2, 1))        # [B, 3, S]

        # channels-first source (module's native layout -> no slab transpose)
        if points is not None:
            d_feat = points.shape[1]
            src = jnp.concatenate([points, x_y_z], axis=1)       # [B, D+3, N]
        else:
            d_feat = 0
            src = x_y_z
        c_in = d_feat + 3
        c_in_pad = self._c_in_pad
        if c_in_pad != c_in:
            src = jnp.pad(src, ((0, 0), (0, c_in_pad - c_in), (0, 0)))

        # per-centroid offset: zeros for feature/pad channels, centroid coords
        # for the xyz channels -> the subtraction is one broadcast elementwise
        # op that XLA fuses into the gather producer below.
        center_full = jnp.concatenate(
            [jnp.zeros((B, d_feat, S), src.dtype), new_xyz_cf,
             jnp.zeros((B, c_in_pad - c_in, S), src.dtype)], axis=1)   # [B, Cp, S]

        new_points_list = []
        for i, (radius, ns) in enumerate(zip(self._qb_radius_list,
                                             self._n_sample_list)):
            group_idx = query_ball_point(radius, ns, xyz_nl, new_xyz_nl)   # [B,S,ns]
            idx_flat = group_idx.reshape(B, S * ns)
            # gather + centroid-subtract (f32) + bf16 cast, fused by XLA into a
            # single producer of the channels-first slab (one HBM write, bf16).
            gathered = jax.vmap(lambda p, ii: p[:, ii])(src, idx_flat)     # [B,Cp,S*ns]
            gathered = gathered.reshape(B, c_in_pad, S, ns) - center_full[..., None]
            slab = gathered.reshape(B, c_in_pad, S * ns).astype(jnp.bfloat16)

            ws, bs = self._folded[i]
            if use_pallas:
                out = branch_mlp_max(slab, ws, bs, n_sample=ns)            # [B,Cop,S]
            else:
                out = _reference_branch_mlp_max(slab, ws, bs, n_sample=ns)
            c_out = self._mlp_list[i][-1]
            new_points_list.append(out[:, :c_out, :])   # already [B, C_out, S]

        new_points_con = jnp.concatenate(new_points_list, axis=1)          # [B,ΣC,S]
        return new_xyz_cf, new_points_con


# ---------------------------------------------------------------------------
if __name__ == "__main__":
    # Small deterministic example shapes.
    B, N, D = 2, 64, 4
    n_points = 16
    qb_radius_list = [0.4, 0.8]
    n_sample_list = [8, 16]
    n_input_ch = D + 3
    mlp_list = [[16, 32], [16, 48]]

    key = jax.random.PRNGKey(0)
    k1, k2 = jax.random.split(key)
    x_y_z = jax.random.uniform(k1, (B, 3, N), jnp.float32)          # [B, 3, N]
    points = jax.random.uniform(k2, (B, D, N), jnp.float32)         # [B, D, N]

    module = PointNetSAMsg(n_points, qb_radius_list, n_sample_list,
                           n_input_ch, mlp_list, seed=0)

    new_x_y_z, new_points_con = jax.jit(module.__call__)(x_y_z, points)
    jax.block_until_ready((new_x_y_z, new_points_con))

    ref_x_y_z, ref_points_con = jax.jit(
        lambda a, b: module._forward(a, b, use_pallas=False))(x_y_z, points)
    jax.block_until_ready((ref_x_y_z, ref_points_con))

    assert new_x_y_z.shape == (B, 3, n_points)
    assert new_points_con.shape == (B, mlp_list[0][-1] + mlp_list[1][-1], n_points)
    assert jnp.all(jnp.isfinite(new_x_y_z)) and jnp.all(jnp.isfinite(new_points_con))
    assert jnp.allclose(new_x_y_z, ref_x_y_z)
    assert jnp.allclose(new_points_con, ref_points_con, rtol=2e-2, atol=2e-2)
    print("KERNEL_OK")
</pallas_src>

<mosaic_0001>
module attributes {stable_mosaic.version = 11 : i64} {
  func.func @kernel(%arg0: i32, %arg1: i32, %arg2: memref<1x8x128xbf16, #tpu.memory_space<vmem>>, %arg3: memref<16x8xbf16, #tpu.memory_space<vmem>>, %arg4: memref<16x1xf32, #tpu.memory_space<vmem>>, %arg5: memref<32x16xbf16, #tpu.memory_space<vmem>>, %arg6: memref<32x1xf32, #tpu.memory_space<vmem>>, %arg7: memref<1x32x16xf32, #tpu.memory_space<vmem>>) attributes {dimension_semantics = [#tpu.dimension_semantics<parallel>, #tpu.dimension_semantics<parallel>], iteration_bounds = array<i64: 2, 1>, scalar_prefetch = 0 : i64, scratch_operands = 0 : i64, tpu.core_type = #tpu.core_type<tc>, window_params = [{transform_indices = @transform_0, window_bounds = array<i64: 1, 8, 128>}, {pipeline_mode = #tpu.pipeline_mode<synchronous>, transform_indices = @transform_1, window_bounds = array<i64: 16, 8>}, {pipeline_mode = #tpu.pipeline_mode<synchronous>, transform_indices = @transform_2, window_bounds = array<i64: 16, 1>}, {pipeline_mode = #tpu.pipeline_mode<synchronous>, transform_indices = @transform_3, window_bounds = array<i64: 32, 16>}, {pipeline_mode = #tpu.pipeline_mode<synchronous>, transform_indices = @transform_4, window_bounds = array<i64: 32, 1>}, {transform_indices = @transform_5, window_bounds = array<i64: 1, 32, 16>}]} {
    %c0 = arith.constant 0 : index
    %c0_0 = arith.constant 0 : index
    %c0_1 = arith.constant 0 : index
    %0 = vector.load %arg2[%c0, %c0_0, %c0_1] : memref<1x8x128xbf16, #tpu.memory_space<vmem>>, vector<1x8x128xbf16>
    %1 = vector.shape_cast %0 : vector<1x8x128xbf16> to vector<8x128xbf16>
    %c0_2 = arith.constant 0 : index
    %c0_3 = arith.constant 0 : index
    %2 = vector.load %arg3[%c0_2, %c0_3] : memref<16x8xbf16, #tpu.memory_space<vmem>>, vector<16x8xbf16>
    %c0_4 = arith.constant 0 : index
    %c0_5 = arith.constant 0 : index
    %3 = vector.load %arg4[%c0_4, %c0_5] : memref<16x1xf32, #tpu.memory_space<vmem>>, vector<16x1xf32>
    %cst = arith.constant dense<0.000000e+00> : vector<16x128xf32>
    %4 = tpu.matmul %2, %1, %cst {dimension_numbers = #tpu.dot_dimension_numbers<[1], [0], [0], [1], [0, 0, 1, 1], [], []>} : vector<16x8xbf16>, vector<8x128xbf16>, vector<16x128xf32> -> vector<16x128xf32>
    %5 = vector.broadcast %3 : vector<16x1xf32> to vector<16x128xf32>
    %6 = arith.addf %4, %5 : vector<16x128xf32>
    %cst_6 = arith.constant 0.000000e+00 : f32
    %7 = vector.broadcast %cst_6 : f32 to vector<16x128xf32>
    %8 = arith.maximumf %6, %7 : vector<16x128xf32>
    %9 = arith.truncf %8 : vector<16x128xf32> to vector<16x128xbf16>
    %c0_7 = arith.constant 0 : index
    %c0_8 = arith.constant 0 : index
    %10 = vector.load %arg5[%c0_7, %c0_8] : memref<32x16xbf16, #tpu.memory_space<vmem>>, vector<32x16xbf16>
    %c0_9 = arith.constant 0 : index
    %c0_10 = arith.constant 0 : index
    %11 = vector.load %arg6[%c0_9, %c0_10] : memref<32x1xf32, #tpu.memory_space<vmem>>, vector<32x1xf32>
    %cst_11 = arith.constant dense<0.000000e+00> : vector<32x128xf32>
    %12 = tpu.matmul %10, %9, %cst_11 {dimension_numbers = #tpu.dot_dimension_numbers<[1], [0], [0], [1], [0, 0, 1, 1], [], []>} : vector<32x16xbf16>, vector<16x128xbf16>, vector<32x128xf32> -> vector<32x128xf32>
    %13 = vector.broadcast %11 : vector<32x1xf32> to vector<32x128xf32>
    %14 = arith.addf %12, %13 : vector<32x128xf32>
    %cst_12 = arith.constant 0.000000e+00 : f32
    %15 = vector.broadcast %cst_12 : f32 to vector<32x128xf32>
    %16 = arith.maximumf %14, %15 : vector<32x128xf32>
    %17 = vector.shape_cast %16 : vector<32x128xf32> to vector<32x16x8xf32>
    %cst_13 = arith.constant dense<0xFF800000> : vector<32x16xf32>
    %18 = vector.multi_reduction <maximumf>, %17, %cst_13 [2] : vector<32x16x8xf32> to vector<32x16xf32>
    %c0_14 = arith.constant 0 : index
    %c0_15 = arith.constant 0 : index
    %c0_16 = arith.constant 0 : index
    %19 = vector.load %arg7[%c0_14, %c0_15, %c0_16] : memref<1x32x16xf32, #tpu.memory_space<vmem>>, vector<1x32x16xf32>
    %20 = vector.shape_cast %19 : vector<1x32x16xf32> to vector<32x16xf32>
    %21 = vector.shape_cast %18 : vector<32x16xf32> to vector<1x32x16xf32>
    tpu.vector_store %arg7[%c0_14, %c0_15, %c0_16], %21 {strides = array<i32>} : memref<1x32x16xf32, #tpu.memory_space<vmem>>, vector<1x32x16xf32>,
    return
  }
  func.func @transform_0(%arg0: i32, %arg1: i32) -> (i32, i32, i32) {
    %c0_i32 = arith.constant 0 : i32
    %c0_i32_0 = arith.constant 0 : i32
    return %arg0, %c0_i32, %arg1 : i32, i32, i32
  }
  func.func @transform_1(%arg0: i32, %arg1: i32) -> (i32, i32) {
    %c0_i32 = arith.constant 0 : i32
    %c0_i32_0 = arith.constant 0 : i32
    %c0_i32_1 = arith.constant 0 : i32
    return %c0_i32, %c0_i32_0 : i32, i32
  }
  func.func @transform_2(%arg0: i32, %arg1: i32) -> (i32, i32) {
    %c0_i32 = arith.constant 0 : i32
    %c0_i32_0 = arith.constant 0 : i32
    %c0_i32_1 = arith.constant 0 : i32
    return %c0_i32, %c0_i32_0 : i32, i32
  }
  func.func @transform_3(%arg0: i32, %arg1: i32) -> (i32, i32) {
    %c0_i32 = arith.constant 0 : i32
    %c0_i32_0 = arith.constant 0 : i32
    %c0_i32_1 = arith.constant 0 : i32
    return %c0_i32, %c0_i32_0 : i32, i32
  }
  func.func @transform_4(%arg0: i32, %arg1: i32) -> (i32, i32) {
    %c0_i32 = arith.constant 0 : i32
    %c0_i32_0 = arith.constant 0 : i32
    %c0_i32_1 = arith.constant 0 : i32
    return %c0_i32, %c0_i32_0 : i32, i32
  }
  func.func @transform_5(%arg0: i32, %arg1: i32) -> (i32, i32, i32) {
    %c0_i32 = arith.constant 0 : i32
    %c0_i32_0 = arith.constant 0 : i32
    return %arg0, %c0_i32, %arg1 : i32, i32, i32
  }
}

module attributes {stable_mosaic.version = 11 : i64} {
  func.func @kernel(%arg0: i32, %arg1: i32, %arg2: memref<1x8x256xbf16, #tpu.memory_space<vmem>>, %arg3: memref<16x8xbf16, #tpu.memory_space<vmem>>, %arg4: memref<16x1xf32, #tpu.memory_space<vmem>>, %arg5: memref<48x16xbf16, #tpu.memory_space<vmem>>, %arg6: memref<48x1xf32, #tpu.memory_space<vmem>>, %arg7: memref<1x48x16xf32, #tpu.memory_space<vmem>>) attributes {dimension_semantics = [#tpu.dimension_semantics<parallel>, #tpu.dimension_semantics<parallel>], iteration_bounds = array<i64: 2, 1>, scalar_prefetch = 0 : i64, scratch_operands = 0 : i64, tpu.core_type = #tpu.core_type<tc>, window_params = [{transform_indices = @transform_0, window_bounds = array<i64: 1, 8, 256>}, {pipeline_mode = #tpu.pipeline_mode<synchronous>, transform_indices = @transform_1, window_bounds = array<i64: 16, 8>}, {pipeline_mode = #tpu.pipeline_mode<synchronous>, transform_indices = @transform_2, window_bounds = array<i64: 16, 1>}, {pipeline_mode = #tpu.pipeline_mode<synchronous>, transform_indices = @transform_3, window_bounds = array<i64: 48, 16>}, {pipeline_mode = #tpu.pipeline_mode<synchronous>, transform_indices = @transform_4, window_bounds = array<i64: 48, 1>}, {transform_indices = @transform_5, window_bounds = array<i64: 1, 48, 16>}]} {
    %c0 = arith.constant 0 : index
    %c0_0 = arith.constant 0 : index
    %c0_1 = arith.constant 0 : index
    %0 = vector.load %arg2[%c0, %c0_0, %c0_1] : memref<1x8x256xbf16, #tpu.memory_space<vmem>>, vector<1x8x256xbf16>
    %1 = vector.shape_cast %0 : vector<1x8x256xbf16> to vector<8x256xbf16>
    %c0_2 = arith.constant 0 : index
    %c0_3 = arith.constant 0 : index
    %2 = vector.load %arg3[%c0_2, %c0_3] : memref<16x8xbf16, #tpu.memory_space<vmem>>, vector<16x8xbf16>
    %c0_4 = arith.constant 0 : index
    %c0_5 = arith.constant 0 : index
    %3 = vector.load %arg4[%c0_4, %c0_5] : memref<16x1xf32, #tpu.memory_space<vmem>>, vector<16x1xf32>
    %cst = arith.constant dense<0.000000e+00> : vector<16x256xf32>
    %4 = tpu.matmul %2, %1, %cst {dimension_numbers = #tpu.dot_dimension_numbers<[1], [0], [0], [1], [0, 0, 1, 1], [], []>} : vector<16x8xbf16>, vector<8x256xbf16>, vector<16x256xf32> -> vector<16x256xf32>
    %5 = vector.broadcast %3 : vector<16x1xf32> to vector<16x256xf32>
    %6 = arith.addf %4, %5 : vector<16x256xf32>
    %cst_6 = arith.constant 0.000000e+00 : f32
    %7 = vector.broadcast %cst_6 : f32 to vector<16x256xf32>
    %8 = arith.maximumf %6, %7 : vector<16x256xf32>
    %9 = arith.truncf %8 : vector<16x256xf32> to vector<16x256xbf16>
    %c0_7 = arith.constant 0 : index
    %c0_8 = arith.constant 0 : index
    %10 = vector.load %arg5[%c0_7, %c0_8] : memref<48x16xbf16, #tpu.memory_space<vmem>>, vector<48x16xbf16>
    %c0_9 = arith.constant 0 : index
    %c0_10 = arith.constant 0 : index
    %11 = vector.load %arg6[%c0_9, %c0_10] : memref<48x1xf32, #tpu.memory_space<vmem>>, vector<48x1xf32>
    %cst_11 = arith.constant dense<0.000000e+00> : vector<48x256xf32>
    %12 = tpu.matmul %10, %9, %cst_11 {dimension_numbers = #tpu.dot_dimension_numbers<[1], [0], [0], [1], [0, 0, 1, 1], [], []>} : vector<48x16xbf16>, vector<16x256xbf16>, vector<48x256xf32> -> vector<48x256xf32>
    %13 = vector.broadcast %11 : vector<48x1xf32> to vector<48x256xf32>
    %14 = arith.addf %12, %13 : vector<48x256xf32>
    %cst_12 = arith.constant 0.000000e+00 : f32
    %15 = vector.broadcast %cst_12 : f32 to vector<48x256xf32>
    %16 = arith.maximumf %14, %15 : vector<48x256xf32>
    %17 = vector.shape_cast %16 : vector<48x256xf32> to vector<48x16x16xf32>
    %cst_13 = arith.constant dense<0xFF800000> : vector<48x16xf32>
    %18 = vector.multi_reduction <maximumf>, %17, %cst_13 [2] : vector<48x16x16xf32> to vector<48x16xf32>
    %c0_14 = arith.constant 0 : index
    %c0_15 = arith.constant 0 : index
    %c0_16 = arith.constant 0 : index
    %19 = vector.load %arg7[%c0_14, %c0_15, %c0_16] : memref<1x48x16xf32, #tpu.memory_space<vmem>>, vector<1x48x16xf32>
    %20 = vector.shape_cast %19 : vector<1x48x16xf32> to vector<48x16xf32>
    %21 = vector.shape_cast %18 : vector<48x16xf32> to vector<1x48x16xf32>
    tpu.vector_store %arg7[%c0_14, %c0_15, %c0_16], %21 {strides = array<i32>} : memref<1x48x16xf32, #tpu.memory_space<vmem>>, vector<1x48x16xf32>,
    return
  }
  func.func @transform_0(%arg0: i32, %arg1: i32) -> (i32, i32, i32) {
    %c0_i32 = arith.constant 0 : i32
    %c0_i32_0 = arith.constant 0 : i32
    return %arg0, %c0_i32, %arg1 : i32, i32, i32
  }
  func.func @transform_1(%arg0: i32, %arg1: i32) -> (i32, i32) {
    %c0_i32 = arith.constant 0 : i32
    %c0_i32_0 = arith.constant 0 : i32
    %c0_i32_1 = arith.constant 0 : i32
    return %c0_i32, %c0_i32_0 : i32, i32
  }
  func.func @transform_2(%arg0: i32, %arg1: i32) -> (i32, i32) {
    %c0_i32 = arith.constant 0 : i32
    %c0_i32_0 = arith.constant 0 : i32
    %c0_i32_1 = arith.constant 0 : i32
    return %c0_i32, %c0_i32_0 : i32, i32
  }
  func.func @transform_3(%arg0: i32, %arg1: i32) -> (i32, i32) {
    %c0_i32 = arith.constant 0 : i32
    %c0_i32_0 = arith.constant 0 : i32
    %c0_i32_1 = arith.constant 0 : i32
    return %c0_i32, %c0_i32_0 : i32, i32
  }
  func.func @transform_4(%arg0: i32, %arg1: i32) -> (i32, i32) {
    %c0_i32 = arith.constant 0 : i32
    %c0_i32_0 = arith.constant 0 : i32
    %c0_i32_1 = arith.constant 0 : i32
    return %c0_i32, %c0_i32_0 : i32, i32
  }
  func.func @transform_5(%arg0: i32, %arg1: i32) -> (i32, i32, i32) {
    %c0_i32 = arith.constant 0 : i32
    %c0_i32_0 = arith.constant 0 : i32
    return %arg0, %c0_i32, %arg1 : i32, i32, i32
  }
}

</mosaic_0001>

<bundles_post_ra>
// kernel: custom-call.10
= control target key start
LH: loop header
LB: loop body
LE: loop exit
PB: predicated region body
PF: predicated region fallthrough
CT: control target
= control target key end

     0   :  { %s6_s0 = inlined_call_operand.vmem [shape: s32[16,2], index: 0, kind: output, shape index: {}]  }

// kernel: custom-call.8
= control target key start
LH: loop header
LB: loop body
LE: loop exit
PB: predicated region body
PF: predicated region fallthrough
CT: control target
= control target key end

     0   :  { %s6_s0 = inlined_call_operand.vmem [shape: f32[2,64], index: 0, kind: output, shape index: {}]  }

// kernel: a_call__.2
= control target key start
LH: loop header
LB: loop body
LE: loop exit
PB: predicated region body
PF: predicated region fallthrough
CT: control target
= control target key end

     0   :  { %s2074_s18 = smov 0   ;;  %s2076_s19 = smov 0   ;;  %s3311_s0 = inlined_call_operand.vmem [shape: bf16[2,8,128], index: 0, kind: input, shape index: {}]   ;;  %s3312_s1 = inlined_call_operand.vmem [shape: bf16[16,8], index: 1, kind: input, shape index: {}]   ;;  %s3313_s2 = inlined_call_operand.vmem [shape: f32[16,1], index: 2, kind: input, shape index: {}]   ;;  %s3314_s3 = inlined_call_operand.vmem [shape: bf16[32,16], index: 3, kind: input, shape index: {}]   ;;  %s3315_s4 = inlined_call_operand.vmem [shape: f32[32,1], index: 4, kind: input, shape index: {}]   ;;  %s3316_s5 = inlined_call_operand.vmem [shape: f32[2,32,16], index: 5, kind: output, shape index: {}]  }
   0x1   :  { %s2078_s20 = smov 0  }
   0x2 LB: > { %s27_s21 = sadd.s32 1, %s2020_s19  ;;  %p1931_p0 = scmp.ge.s32.totalorder %s2024_s20, 1  ;;  %s2024_s20 = sphi %s2078_s20, %s15_s20   ;;  %s2020_s19 = sphi %s2076_s19, %s3318_s19   ;;  %s2016_s18 = sphi %s2074_s18, %s3317_s18  }
   0x3   : > { %p29_p1 = scmp.ge.s32.totalorder %s27_s21, 2  ;;  %p205_p2 = scmp.lt.s32.totalorder %s2024_s20, 3 }
   0x5   : > { %s3320_s21 = smov (%p29_p1, %s27_s21), 0  ;;  %p206_p3 = pnand %p1931_p0, %p205_p2 }
   0x6   : > { %p238_p4 = scmp.lt.s32.totalorder (!%p206_p3), %s2016_s18, 1  ;;  %s2027_s23 = smov (!%p206_p3), 104  }
   0x7   : > { %209 = sbr.rel (%p206_p3) target bundleno = 775 (0x307), region = 40  ;;  %s2029_s25 = smov (!%p206_p3), 120  }
   0x8   : > { %s2030_s26 = smov (!%p206_p3), 80   ;;  %s2032_s28 = smov (!%p206_p3), 96  }
   0x9   : > { %s2033_s29 = smov (!%p206_p3), 56   ;;  %s2034_s30 = smov (!%p206_p3), 64  }
   0xa   : > { %s2035_s6 = smov (!%p206_p3), 72   ;;  %s2036_s7 = smov (!%p206_p3), 32  }
   0xb   : > { %s2037_s8 = smov (!%p206_p3), 40   ;;  %s2038_s9 = smov (!%p206_p3), 48  }
   0xc   : > { %v257_v0 = vld [vmem:[%s3313_s2] sm:$0xff]  ;;  %v2026_v1 = vmov 0   ;;  %s3322_s18 = smov (!%p238_p4, %s2016_s18), 1  ;;  %vm278_vm0 = vcmask 1043456   ;;  %v258_v5 = vld [vmem:[%s3313_s2 + $0x8] sm:$0xff]  ;;  %vm274_vm1 = vcmask 64512  }
   0xd   : > { %1999 = vset.pattern.permute.xlu0 %v2026_v1  ;;  %2000 = vset.pattern.permute.xlu1 %v2026_v1  ;;  %s1932_s24 = sshll.u32 %s3322_s18, 2  ;;  %v1953_v4 = vld [vmem:[%s3312_s1] sm:$0xff]  ;;  %v305_v7 = vld [vmem:[%s3315_s4 + $0x10] sm:$0xff]  ;;  %v304_v8 = vld [vmem:[%s3315_s4 + $0x8] sm:$0xff]  ;;  %vm337_vm2 = vcmask 130048   ;;  %s2039_s10 = smov 8  }
   0xe   : > { %261 = vperm.xlu0 %1999, %v257_v0   ;;  %2001 = vset.pattern.permute.xlu2 %v2026_v1  ;;  %s244_s27 = scalar_lea.vmem %s3311_s0, %s1932_s24  ;;  %v303_v6 = vld [vmem:[%s3315_s4] sm:$0xff]  ;;  %v306_v9 = vld [vmem:[%s3315_s4 + $0x18] sm:$0xff]  ;;  %v1955_v20 = vld [vmem:[%s3314_s3 + $0x8] sm:$0xff]  ;;  %s2028_s24 = smov 112   ;;  %v2042_v57 = vmov 1983009808  }
   0xf   : > { %v254_v2 = vld [vmem:[%s244_s27] sm:$0xf]  ;;  %309 = vperm.xlu1 %2000, %v303_v6   ;;  %319 = vperm.xlu2 %2001, %v305_v7   ;;  %s2031_s27 = smov 88   ;;  %s2040_s11 = smov 16   ;;  %v557_v58 = vunpack.c.l.s4 %v2042_v57  ;;  %vm552_vm3 = vcmask 1047556   ;;  %vm1709_vm4 = vcmask 130112  }
  0x10   : > { %v280_v3 = vsel %vm278_vm0, %v254_v2, 0  ;;  %v1954_v19 = vld [vmem:[%s3314_s3] sm:$0xff]  ;;  %s2041_s12 = smov 24   ;;  %vm1804_vm5 = vcmask 1041409   ;;  %vm1806_vm6 = vcmask 1042434   ;;  %vm1808_vm7 = vcmask 1043459  }
  0x11   : > { %289 = vmatpush.bf16.msra.mxu0 %v280_v3  ;;  %v2291_v63 = vunpack.c.0.s8 %v557_v58  ;;  %vm1810_vm8 = vcmask 1044484   ;;  %vm1812_vm9 = vcmask 1045509   ;;  %s1952_s13 = sshll.u32 %s3322_s18, 5  ;;  %vm1814_vm10 = vcmask 1046534  }
  0x12   : > { %vm1816_vm11 = vcmask 1047559   ;;  %s3182_s15 = scalar_lea.vmem %s3316_s5, %s1952_s13 }
  0x14   : > { %1939 = vmatmul.msk.bf16.vlgmr.msra.gmra.mxu0 %vm274_vm1, %v1953_v4 }
  0x16   : > { %266 = vperm.xlu0 %1999, %v258_v5  }
  0x17   : > { %314 = vperm.xlu1 %2000, %v304_v8   ;;  %324 = vperm.xlu2 %2001, %v306_v9  }
  0x69   : > { %v320_v25 = vpop.permute.xlu2 %319 }
  0x71   : > { %v325_v33 = vpop.permute.xlu2 %324 }
  0x80   : > { %v262_v10 = vpop.permute.xlu0 %261 }
  0x81   : > { %v310_v21 = vpop.permute.xlu1 %309 }
  0x88   : > { %v267_v13 = vpop.permute.xlu0 %266 }
  0x89   : > { %v315_v30 = vpop.permute.xlu1 %314 }
  0x91   : > { %v291_v11 = vpop.f32.mrf.mxu0 }
  0x92   : > { %v292_v12 = vadd.f32 %v291_v11, %v262_v10 }
  0x94   : > { %v296_v16 = vmax.f32 %v292_v12, 0.0 }
  0x99   : > { %v293_v14 = vpop.f32.mrf.mxu0 }
  0x9a   : > { %v294_v15 = vadd.f32 %v293_v14, %v267_v13 }
  0x9c   : > { %v297_v17 = vmax.f32 %v294_v15, 0.0 }
  0x9e   : > { %v298_v18 = vpack.c.bf16 %v297_v17, %v296_v16 }
  0xa0   : > { %351 = vmatpush.bf16.msra.mxu1 %v298_v18  ;;  %1956 = vmatpush.bf16.msra.mxu2 %v298_v18 }
  0xa3   : > { %1948 = vmatmul.msk.bf16.vlgmr.msra.gmra.mxu1 %vm337_vm2, %v1954_v19  ;;  %1949 = vmatmul.msk.bf16.vlgmr.msra.gmra.mxu2 %vm337_vm2, %v1955_v20  ;;  %v2043_v19 = vmov 1934713408  }
  0xa4   : > { %v605_v20 = vunpack.c.l.s4 %v2043_v19 }
 0x120   : > { %v353_v22 = vpop.f32.mrf.mxu1 }
 0x121   : > { %v354_v23 = vadd.f32 %v353_v22, %v310_v21 }
 0x123   : > { %v2128_v24 = vmax.f32 %v354_v23, 0.0 }
 0x125   : > { %395 = vrot.lane.b32.xlu2 %v2128_v24, %s2027_s23  ;;  %383 = vrot.lane.b32.xlu1 %v2128_v24, %s2028_s24  ;;  %v554_v1 = vrot.slane %v2128_v24, 4 }
 0x126   : > { %371 = vrot.lane.b32.xlu0 %v2128_v24, %s2029_s25  ;;  %v358_v26 = vpop.f32.mrf.mxu2 }
 0x127   : > { %v359_v27 = vadd.f32 %v358_v26, %v320_v25 }
 0x128   : > { %v355_v29 = vpop.f32.mrf.mxu1 }
 0x129   : > { %v2160_v28 = vmax.f32 %v359_v27, 0.0  ;;  %v356_v31 = vadd.f32 %v355_v29, %v315_v30 }
 0x12b   : > { %v2192_v32 = vmax.f32 %v356_v31, 0.0 }
 0x12d   : > { %431 = vrot.lane.b32.xlu2 %v2128_v24, %s2030_s26  ;;  %419 = vrot.lane.b32.xlu1 %v2128_v24, %s2031_s27 }
 0x12e   : > { %407 = vrot.lane.b32.xlu0 %v2128_v24, %s2032_s28  ;;  %v360_v36 = vpop.f32.mrf.mxu2 }
 0x12f   : > { %v361_v37 = vadd.f32 %v360_v36, %v325_v33 }
 0x131   : > { %v2230_v41 = vmax.f32 %v361_v37, 0.0 }
 0x135   : > { %467 = vrot.lane.b32.xlu2 %v2128_v24, %s2033_s29  ;;  %455 = vrot.lane.b32.xlu1 %v2128_v24, %s2034_s30 }
 0x136   : > { %443 = vrot.lane.b32.xlu0 %v2128_v24, %s2035_s6 }
 0x13d   : > { %503 = vrot.lane.b32.xlu2 %v2128_v24, %s2036_s7  ;;  %491 = vrot.lane.b32.xlu1 %v2128_v24, %s2037_s8 }
 0x13e   : > { %479 = vrot.lane.b32.xlu0 %v2128_v24, %s2038_s9 }
 0x145   : > { %539 = vrot.lane.b32.xlu2 %v2128_v24, %s2039_s10  ;;  %527 = vrot.lane.b32.xlu1 %v2128_v24, %s2040_s11 }
 0x146   : > { %515 = vrot.lane.b32.xlu0 %v2128_v24, %s2041_s12 }
 0x14d   : > { %375 = vrot.lane.b32.xlu2 %v2160_v28, %s2029_s25  ;;  %399 = vrot.lane.b32.xlu1 %v2160_v28, %s2027_s23 }
 0x14e   : > { %387 = vrot.lane.b32.xlu0 %v2160_v28, %s2028_s24 }
 0x155   : > { %411 = vrot.lane.b32.xlu2 %v2160_v28, %s2032_s28  ;;  %435 = vrot.lane.b32.xlu1 %v2160_v28, %s2030_s26 }
 0x156   : > { %423 = vrot.lane.b32.xlu0 %v2160_v28, %s2031_s27 }
 0x15d   : > { %447 = vrot.lane.b32.xlu2 %v2160_v28, %s2035_s6  ;;  %471 = vrot.lane.b32.xlu1 %v2160_v28, %s2033_s29 }
 0x15e   : > { %459 = vrot.lane.b32.xlu0 %v2160_v28, %s2034_s30 }
 0x165   : > { %483 = vrot.lane.b32.xlu2 %v2160_v28, %s2038_s9  ;;  %507 = vrot.lane.b32.xlu1 %v2160_v28, %s2036_s7 }
 0x166   : > { %495 = vrot.lane.b32.xlu0 %v2160_v28, %s2037_s8 }
 0x16d   : > { %519 = vrot.lane.b32.xlu2 %v2160_v28, %s2041_s12  ;;  %543 = vrot.lane.b32.xlu1 %v2160_v28, %s2039_s10 }
 0x16e   : > { %531 = vrot.lane.b32.xlu0 %v2160_v28, %s2040_s11 }
 0x175   : > { %385 = vrot.lane.b32.xlu2 %v2192_v32, %s2028_s24  ;;  %373 = vrot.lane.b32.xlu1 %v2192_v32, %s2029_s25 }
 0x176   : > { %397 = vrot.lane.b32.xlu0 %v2192_v32, %s2027_s23 }
 0x17d   : > { %421 = vrot.lane.b32.xlu2 %v2192_v32, %s2031_s27  ;;  %409 = vrot.lane.b32.xlu1 %v2192_v32, %s2032_s28 }
 0x17e   : > { %433 = vrot.lane.b32.xlu0 %v2192_v32, %s2030_s26 }
 0x17f   : > { %v2206_v34 = vpop.permute.xlu2 %395 }
 0x180   : > { %v564_v61 = vrot.slane %v2206_v34, 4 }
 0x185   : > { %457 = vrot.lane.b32.xlu2 %v2192_v32, %s2034_s30  ;;  %445 = vrot.lane.b32.xlu1 %v2192_v32, %s2035_s6 }
 0x186   : > { %469 = vrot.lane.b32.xlu0 %v2192_v32, %s2033_s29 }
 0x187   : > { %v2220_v35 = vpop.permute.xlu2 %431 }
 0x188   : > { %v576_v10 = vrot.slane %v2220_v35, 4 }
 0x18d   : > { %493 = vrot.lane.b32.xlu2 %v2192_v32, %s2037_s8  ;;  %481 = vrot.lane.b32.xlu1 %v2192_v32, %s2038_s9 }
 0x18e   : > { %505 = vrot.lane.b32.xlu0 %v2192_v32, %s2036_s7 }
 0x18f   : > { %v2228_v40 = vpop.permute.xlu2 %467 }
 0x195   : > { %529 = vrot.lane.b32.xlu2 %v2192_v32, %s2040_s11  ;;  %517 = vrot.lane.b32.xlu1 %v2192_v32, %s2041_s12 }
 0x196   : > { %541 = vrot.lane.b32.xlu0 %v2192_v32, %s2039_s10 }
 0x197   : > { %v384_v38 = vpop.permute.xlu1 %383  ;;  %v2238_v44 = vpop.permute.xlu2 %503 }
 0x198   : > { %v372_v39 = vpop.permute.xlu0 %371  ;;  %v551_v0 = vrot.slane %v384_v38, 4  ;;  %v555_v5 = vsel %vm552_vm3, %v384_v38, %v554_v1  ;;  %v2336_v38 = vunpack.c.0.s8 %v605_v20 }
 0x199   : > { %v565_v2 = vsel %vm552_vm3, %v564_v61, %v372_v39  ;;  %v566_v6 = vrot.slane %v372_v39, 4  ;;  %v2307_v13 = vperm.slane %v555_v5, %v2291_v63 }
 0x19a   : > { %v571_v8 = vperm.slane %v565_v2, %v2291_v63  ;;  %v553_v11 = vsel %vm552_vm3, %v551_v0, %v2128_v24 }
 0x19b   : > { %v567_v17 = vsel %vm552_vm3, %v2206_v34, %v566_v6  ;;  %v559_v21 = vperm.slane %v553_v11, %v2291_v63  ;;  %v614_v31 = vrot.slane %v2307_v13, 4 }
 0x19c   : > { %v600_v22 = vrot.slane %v571_v8, 4  ;;  %v575_v33 = vperm.slane %v567_v17, %v2291_v63 }
 0x19d   : > { %401 = vrot.lane.b32.xlu2 %v2230_v41, %s2027_s23  ;;  %389 = vrot.lane.b32.xlu1 %v2230_v41, %s2028_s24  ;;  %v602_v1 = vrot.slane %v559_v21, 4 }
 0x19e   : > { %377 = vrot.lane.b32.xlu0 %v2230_v41, %s2029_s25  ;;  %v615_v0 = vsel %vm552_vm3, %v575_v33, %v614_v31  ;;  %v778_v31 = vrot.slane %v2192_v32, 4 }
 0x19f   : > { %v420_v42 = vpop.permute.xlu1 %419  ;;  %v2248_v47 = vpop.permute.xlu2 %539 }
 0x1a0   : > { %v408_v43 = vpop.permute.xlu0 %407  ;;  %v590_v14 = vrot.slane %v420_v42, 4  ;;  %v700_v18 = vrot.slane %v2248_v47, 4 }
 0x1a1   : > { %v578_v3 = vrot.slane %v408_v43, 4  ;;  %v577_v23 = vsel %vm552_vm3, %v576_v10, %v408_v43 }
 0x1a3   : > { %v579_v15 = vsel %vm552_vm3, %v2220_v35, %v578_v3  ;;  %v583_v35 = vperm.slane %v577_v23, %v2291_v63  ;;  %v603_v23 = vsel %vm552_vm3, %v571_v8, %v602_v1 }
 0x1a4   : > { %v2319_v25 = vperm.slane %v579_v15, %v2291_v63  ;;  %v678_v15 = vrot.slane %v2228_v40, 4 }
 0x1a5   : > { %437 = vrot.lane.b32.xlu2 %v2230_v41, %s2030_s26  ;;  %425 = vrot.lane.b32.xlu1 %v2230_v41, %s2031_s27  ;;  %v626_v17 = vrot.slane %v583_v35, 4 }
 0x1a6   : > { %413 = vrot.lane.b32.xlu0 %v2230_v41, %s2032_s28  ;;  %v638_v57 = vrot.slane %v2319_v25, 4 }
 0x1a7   : > { %v2246_v45 = vpop.permute.xlu1 %455  ;;  %v2266_v50 = vpop.permute.xlu2 %375 }
 0x1a8   : > { %v444_v46 = vpop.permute.xlu0 %443 }
 0x1a9   : > { %v588_v60 = vrot.slane %v444_v46, 4  ;;  %v591_v24 = vsel %vm552_vm3, %v444_v46, %v590_v14  ;;  %v601_v46 = vsel %vm552_vm3, %v600_v22, %v559_v21  ;;  %v2363_v14 = vperm.slane %v615_v0, %v2336_v38 }
 0x1aa   : > { %v2332_v36 = vperm.slane %v591_v24, %v2291_v63  ;;  %v607_v2 = vperm.slane %v601_v46, %v2336_v38  ;;  %v1002_v46 = vrot.slane %v2160_v28, 4 }
 0x1ab   : > { %v589_v4 = vsel %vm552_vm3, %v588_v60, %v420_v42 }
 0x1ac   : > { %v595_v12 = vperm.slane %v589_v4, %v2291_v63  ;;  %v639_v3 = vsel %vm552_vm3, %v2332_v36, %v638_v57  ;;  %v650_v21 = vrot.slane %v607_v2, 4 }
 0x1ad   : > { %473 = vrot.lane.b32.xlu2 %v2230_v41, %s2033_s29  ;;  %461 = vrot.lane.b32.xlu1 %v2230_v41, %s2034_s30  ;;  %v2372_v22 = vperm.slane %v639_v3, %v2336_v38  ;;  %v636_v3 = vrot.slane %v2332_v36, 4 }
 0x1ae   : > { %449 = vrot.lane.b32.xlu0 %v2230_v41, %s2035_s6  ;;  %v624_v26 = vrot.slane %v595_v12, 4 }
 0x1af   : > { %v2256_v48 = vpop.permute.xlu1 %491  ;;  %v2282_v55 = vpop.permute.xlu2 %411 }
 0x1b0   : > { %v2258_v49 = vpop.permute.xlu0 %479  ;;  %v676_v16 = vrot.slane %v2256_v48, 4  ;;  %v625_v61 = vsel %vm552_vm3, %v624_v26, %v583_v35  ;;  %v679_v35 = vsel %vm552_vm3, %v2256_v48, %v678_v15 }
 0x1b1   : > { %v664_v39 = vrot.slane %v2258_v49, 4  ;;  %v631_v10 = vperm.slane %v625_v61, %v2336_v38 }
 0x1b2   : > { %v677_v34 = vsel %vm552_vm3, %v676_v16, %v2228_v40  ;;  %v612_v16 = vrot.slane %v575_v33, 4  ;;  %v662_v33 = vrot.slane %v2363_v14, 4 }
 0x1b3   : > { %v2347_v58 = vperm.slane %v677_v34, %v2291_v63  ;;  %v665_v4 = vsel %vm552_vm3, %v664_v39, %v2246_v45  ;;  %v651_v8 = vsel %vm552_vm3, %v631_v10, %v650_v21 }
 0x1b4   : > { %v613_v39 = vsel %vm552_vm3, %v612_v16, %v2307_v13  ;;  %v2400_v13 = vperm.slane %v679_v35, %v2291_v63 }
 0x1b5   : > { %509 = vrot.lane.b32.xlu2 %v2230_v41, %s2036_s7  ;;  %497 = vrot.lane.b32.xlu1 %v2230_v41, %s2037_s8  ;;  %v712_v11 = vrot.slane %v2347_v58, 4 }
 0x1b6   : > { %485 = vrot.lane.b32.xlu0 %v2230_v41, %s2038_s9 }
 0x1b7   : > { %v2268_v51 = vpop.permute.xlu1 %527  ;;  %v2289_v62 = vpop.permute.xlu2 %447 }
 0x1b8   : > { %v2270_v52 = vpop.permute.xlu0 %515  ;;  %v688_v27 = vrot.slane %v2268_v51, 4 }
 0x1b9   : > { %v701_v29 = vsel %vm552_vm3, %v700_v18, %v2270_v52  ;;  %v671_v18 = vperm.slane %v665_v4, %v2291_v63  ;;  %v702_v24 = vrot.slane %v2270_v52, 4  ;;  %v611_v52 = vperm.slane %v603_v23, %v2336_v38 }
 0x1ba   : > { %v2340_v42 = vperm.slane %v701_v29, %v2291_v63  ;;  %v689_v60 = vsel %vm552_vm3, %v688_v27, %v2238_v44  ;;  %v648_v27 = vrot.slane %v631_v10, 4  ;;  %v627_v29 = vsel %vm552_vm3, %v595_v12, %v626_v17 }
 0x1bb   : > { %v695_v5 = vperm.slane %v689_v60, %v2291_v63  ;;  %v713_v34 = vsel %vm552_vm3, %v712_v11, %v671_v18  ;;  %v663_v12 = vsel %vm552_vm3, %v2372_v22, %v662_v33  ;;  %v635_v60 = vperm.slane %v627_v29, %v2336_v38 }
 0x1bc   : > { %v736_v6 = vrot.slane %v2340_v42, 4  ;;  %v703_v48 = vsel %vm552_vm3, %v2248_v47, %v702_v24  ;;  %v649_v0 = vsel %vm552_vm3, %v648_v27, %v607_v2  ;;  %v719_v1 = vperm.slane %v713_v34, %v2336_v38 }
 0x1bd   : > { %545 = vrot.lane.b32.xlu2 %v2230_v41, %s2039_s10  ;;  %533 = vrot.lane.b32.xlu1 %v2230_v41, %s2040_s11  ;;  %v738_v61 = vrot.slane %v695_v5, 4  ;;  %v1454_v4 = vsel %vm274_vm1, %v651_v8, -inf  ;;  %v690_v10 = vrot.slane %v2238_v44, 4  ;;  %v1490_v47 = vsel %vm274_vm1, %v663_v12, -inf }
 0x1be   : > { %521 = vrot.lane.b32.xlu0 %v2230_v41, %s2041_s12  ;;  %v737_v40 = vsel %vm552_vm3, %v736_v6, %v695_v5  ;;  %v2404_v6 = vperm.slane %v613_v39, %v2336_v38  ;;  %v714_v5 = vrot.slane %v671_v18, 4  ;;  %v654_v11 = vrot.slane %v611_v52, 4 }
 0x1bf   : > { %v2278_v53 = vpop.permute.xlu1 %399  ;;  %v2324_v30 = vpop.permute.xlu2 %483  ;;  %v743_v57 = vperm.slane %v737_v40, %v2336_v38  ;;  %v666_v2 = vrot.slane %v2246_v45, 4  ;;  %v2410_v15 = vperm.slane %v703_v48, %v2291_v63  ;;  %v1448_v16 = vsel %vm274_vm1, %v649_v0, -inf }
 0x1c0   : > { %v2280_v54 = vpop.permute.xlu0 %387  ;;  %v762_v18 = vrot.slane %v719_v1, 4  ;;  %v652_v23 = vrot.slane %v635_v60, 4  ;;  %v739_v24 = vsel %vm552_vm3, %v2340_v42, %v738_v61  ;;  %v724_v45 = vrot.slane %v2400_v13, 4 }
 0x1c1   : > { %v760_v17 = vrot.slane %v743_v57, 4  ;;  %v667_v27 = vsel %vm552_vm3, %v2258_v49, %v666_v2  ;;  %v637_v29 = vsel %vm552_vm3, %v636_v3, %v2319_v25  ;;  %v658_v33 = vrot.slane %v2404_v6, 4 }
 0x1c2   : > { %v691_v34 = vsel %vm552_vm3, %v2268_v51, %v690_v10  ;;  %v763_v42 = vsel %vm552_vm3, %v743_v57, %v762_v18  ;;  %v715_v8 = vsel %vm552_vm3, %v2347_v58, %v714_v5  ;;  %v748_v49 = vrot.slane %v2410_v15, 4 }
 0x1c3   : > { %v761_v25 = vsel %vm552_vm3, %v760_v17, %v719_v1  ;;  %v747_v12 = vperm.slane %v739_v24, %v2336_v38  ;;  %v1014_v61 = vrot.slane %v2266_v50, 4  ;;  %v675_v51 = vperm.slane %v667_v27, %v2291_v63 }
 0x1c4   : > { %v653_v48 = vsel %vm552_vm3, %v652_v23, %v611_v52  ;;  %v643_v57 = vperm.slane %v637_v29, %v2336_v38  ;;  %v2446_v0 = vperm.slane %v691_v34, %v2291_v63  ;;  %v1457_v3 = vsel %vm274_vm1, %v763_v42, -inf }
 0x1c5   : > { %v655_v1 = vsel %vm552_vm3, %v635_v60, %v654_v11  ;;  %v1451_v10 = vsel %vm274_vm1, %v761_v25, -inf  ;;  %v723_v5 = vperm.slane %v715_v8, %v2336_v38  ;;  %v725_v52 = vsel %vm552_vm3, %v724_v45, %v675_v51 }
 0x1c6   : > { %v1460_v2 = vsel %vm274_vm1, %v653_v48, -inf  ;;  %v660_v60 = vrot.slane %v2372_v22, 4  ;;  %v726_v11 = vrot.slane %v675_v51, 4  ;;  %v659_v18 = vsel %vm552_vm3, %v643_v57, %v658_v33 }
 0x1c7   : > { %v2284_v56 = vpop.permute.xlu1 %435  ;;  %v2367_v19 = vpop.permute.xlu2 %519  ;;  %v1026_v23 = vrot.slane %v2282_v55, 4  ;;  %v1036_v24 = vrot.slane %v2289_v62, 4  ;;  %v1466_v45 = vsel %vm274_vm1, %v655_v1, -inf  ;;  %v2471_v27 = vperm.slane %v725_v52, %v2336_v38 }
 0x1c8   : > { %v2286_v59 = vpop.permute.xlu0 %423  ;;  %v750_v22 = vrot.slane %v2446_v0, 4  ;;  %v766_v34 = vrot.slane %v723_v5, 4  ;;  %v1478_v25 = vsel %vm274_vm1, %v659_v18, -inf  ;;  %v656_v51 = vrot.slane %v643_v57, 4 }
 0x1c9   : > { %v1012_v48 = vrot.slane %v2278_v53, 4  ;;  %v1003_v1 = vsel %vm552_vm3, %v2280_v54, %v1002_v46  ;;  %v1037_v57 = vsel %vm552_vm3, %v1036_v24, %v2286_v59  ;;  %v1000_v52 = vrot.slane %v2280_v54, 4 }
 0x1ca   : > { %v2526_v18 = vperm.slane %v1003_v1, %v2291_v63 }
 0x1cf   : > { %v2297_v7 = vpop.permute.xlu1 %471  ;;  %v2423_v40 = vpop.permute.xlu2 %385 }
 0x1d0   : > { %v2300_v9 = vpop.permute.xlu0 %459  ;;  %v779_v58 = vsel %vm552_vm3, %v2423_v40, %v778_v31  ;;  %v749_v31 = vsel %vm552_vm3, %v748_v49, %v2446_v0  ;;  %v767_v0 = vsel %vm552_vm3, %v747_v12, %v766_v34 }
 0x1d1   : > { %v2463_v17 = vperm.slane %v779_v58, %v2291_v63  ;;  %v661_v58 = vsel %vm552_vm3, %v660_v60, %v2363_v14  ;;  %v1469_v46 = vsel %vm274_vm1, %v767_v0, -inf  ;;  %v1013_v60 = vsel %vm552_vm3, %v1012_v48, %v2266_v50 }
 0x1d2   : > { %v751_v50 = vsel %vm552_vm3, %v2410_v15, %v750_v22 }
 0x1d7   : > { %v2334_v37 = vpop.permute.xlu1 %507  ;;  %v2483_v42 = vpop.permute.xlu2 %421 }
 0x1d8   : > { %v2342_v43 = vpop.permute.xlu0 %495 }
 0x1df   : > { %v2369_v20 = vpop.permute.xlu1 %543 }
 0x1e0   : > { %v2376_v26 = vpop.permute.xlu0 %531  ;;  %v1148_v22 = vrot.slane %v2369_v20, 4 }
 0x1e6   : > { %1455 = vmax.xlane.f32.xlu2 %v1454_v4 }
 0x1e7   : > { %v2412_v36 = vpop.permute.xlu1 %373  ;;  %1491 = vmax.xlane.f32.xlu1 %v1490_v47 }
 0x1e8   : > { %v790_v21 = vrot.slane %v2412_v36, 4  ;;  %1449 = vmax.xlane.f32.xlu0 %v1448_v16  ;;  %v2416_v44 = vpop.permute.xlu0 %397  ;;  %v764_v16 = vrot.slane %v747_v12, 4  ;;  %v814_v12 = vrot.slane %v2483_v42, 4 }
 0x1ea   : > { %v791_v35 = vsel %vm552_vm3, %v2416_v44, %v790_v21  ;;  %v765_v49 = vsel %vm552_vm3, %v764_v16, %v723_v5  ;;  %v657_v16 = vsel %vm552_vm3, %v656_v51, %v2404_v6 }
 0x1eb   : > { %v2437_v39 = vperm.slane %v791_v35, %v2291_v63  ;;  %v2477_v35 = vperm.slane %v749_v31, %v2336_v38  ;;  %v1463_v14 = vsel %vm274_vm1, %v765_v49, -inf  ;;  %v2514_v31 = vsel %vm274_vm1, %v661_v58, -inf }
 0x1ec   : > { %v1124_v49 = vrot.slane %v2342_v43, 4 }
 0x1ed   : > { %v836_v4 = vrot.slane %v2437_v39, 4 }
 0x1ee   : > { %1458 = vmax.xlane.f32.xlu2 %v1457_v3  ;;  %v727_v3 = vsel %vm552_vm3, %v2400_v13, %v726_v11  ;;  %v768_v13 = vrot.slane %v2477_v35, 4  ;;  %v1015_v11 = vsel %vm552_vm3, %v2278_v53, %v1014_v61  ;;  %v1027_v53 = vsel %vm552_vm3, %v2284_v56, %v1026_v23 }
 0x1ef   : > { %v2456_v47 = vpop.permute.xlu1 %409  ;;  %1452 = vmax.xlane.f32.xlu1 %v1451_v10  ;;  %v2481_v33 = vsel %vm552_vm3, %v836_v4, %v2463_v17  ;;  %v1024_v4 = vrot.slane %v2284_v56, 4  ;;  %v770_v10 = vrot.slane %v2471_v27, 4  ;;  %v1038_v61 = vrot.slane %v2286_v59, 4 }
 0x1f0   : > { %v802_v21 = vrot.slane %v2456_v47, 4  ;;  %1461 = vmax.xlane.f32.xlu0 %v1460_v2  ;;  %v2474_v29 = vpop.permute.xlu0 %433  ;;  %v769_v34 = vsel %vm552_vm3, %v768_v13, %v2471_v27  ;;  %v759_v59 = vperm.slane %v751_v50, %v2336_v38  ;;  %v2551_v27 = vperm.slane %v1027_v53, %v2291_v63  ;;  %v2592_v50 = vpop.permute.xlu2 %457 }
 0x1f1   : > { %v1025_v6 = vsel %vm552_vm3, %v1024_v4, %v2282_v55  ;;  %v1001_v55 = vsel %vm552_vm3, %v1000_v52, %v2160_v28  ;;  %v1475_v48 = vsel %vm274_vm1, %v769_v34, -inf  ;;  %v1472_v28 = vsel %vm274_vm1, %v657_v16, -inf }
 0x1f2   : > { %v803_v8 = vsel %vm552_vm3, %v2474_v29, %v802_v21  ;;  %v2521_v21 = vperm.slane %v1037_v57, %v2291_v63  ;;  %v2545_v15 = vperm.slane %v1025_v6, %v2291_v63  ;;  %v2557_v0 = vperm.slane %v1015_v11, %v2291_v63 }
 0x1f3   : > { %v811_v5 = vperm.slane %v803_v8, %v2291_v63  ;;  %v2539_v8 = vperm.slane %v1013_v60, %v2291_v63  ;;  %v2560_v58 = vperm.slane %v1001_v55, %v2291_v63  ;;  %v1039_v1 = vsel %vm552_vm3, %v2289_v62, %v1038_v61 }
 0x1f4   : > { %v1072_v56 = vrot.slane %v2521_v21, 4  ;;  %v735_v4 = vperm.slane %v727_v3, %v2336_v38  ;;  %v1062_v57 = vrot.slane %v2526_v18, 4  ;;  %v772_v62 = vrot.slane %v759_v59, 4 }
 0x1f5   : > { %v1048_v52 = vrot.slane %v2539_v8, 4  ;;  %v1086_v16 = vrot.slane %v2551_v27, 4  ;;  %v2578_v60 = vperm.slane %v1039_v1, %v2291_v63  ;;  %v1149_v11 = vsel %vm552_vm3, %v1148_v22, %v2367_v19 }
 0x1f6   : > { %1467 = vmax.xlane.f32.xlu2 %v1466_v45  ;;  %v862_v45 = vrot.slane %v811_v5, 4  ;;  %v1073_v3 = vsel %vm552_vm3, %v1072_v56, %v2545_v15  ;;  %v1063_v53 = vsel %vm552_vm3, %v2557_v0, %v1062_v57  ;;  %v843_v34 = vperm.slane %v2481_v33, %v2336_v38 }
 0x1f7   : > { %v2508_v2 = vpop.permute.xlu1 %445  ;;  %1464 = vmax.xlane.f32.xlu1 %v1463_v14  ;;  %v2597_v61 = vperm.slane %v1073_v3, %v2336_v38  ;;  %v1087_v56 = vsel %vm552_vm3, %v2578_v60, %v1086_v16  ;;  %v2619_v33 = vperm.slane %v1063_v53, %v2336_v38  ;;  %v774_v57 = vrot.slane %v735_v4, 4 }
 0x1f8   : > { %v815_v54 = vsel %vm552_vm3, %v2508_v2, %v814_v12  ;;  %1470 = vmax.xlane.f32.xlu0 %v1469_v46  ;;  %v1125_v12 = vsel %vm552_vm3, %v1124_v49, %v2297_v7  ;;  %v838_v46 = vrot.slane %v2463_v17, 4  ;;  %v1136_v17 = vrot.slane %v2376_v26, 4  ;;  %v2608_v49 = vpop.permute.xlu0 %469 }
 0x1f9   : > { %v823_v24 = vperm.slane %v815_v54, %v2291_v63  ;;  %v2585_v54 = vperm.slane %v1125_v12, %v2291_v63  ;;  %v1096_v12 = vrot.slane %v2597_v61, 4 }
 0x1fb   : > { %v860_v51 = vrot.slane %v823_v24, 4  ;;  %v863_v23 = vsel %vm552_vm3, %v823_v24, %v862_v45  ;;  %v1112_v24 = vrot.slane %v2324_v30, 4  ;;  %v773_v45 = vsel %vm552_vm3, %v772_v62, %v735_v4 }
 0x1fc   : > { %v2569_v14 = vperm.slane %v863_v23, %v2336_v38  ;;  %v1160_v22 = vrot.slane %v2585_v54, 4  ;;  %v1487_v1 = vsel %vm274_vm1, %v773_v45, -inf  ;;  %v2628_v62 = vperm.slane %v1087_v56, %v2336_v38 }
 0x1fd   : > { %v861_v13 = vsel %vm552_vm3, %v860_v51, %v811_v5  ;;  %v771_v5 = vsel %vm552_vm3, %v2477_v35, %v770_v10  ;;  %v1155_v10 = vperm.slane %v1149_v11, %v2291_v63  ;;  %v1113_v55 = vsel %vm552_vm3, %v1112_v24, %v2300_v9 }
 0x1fe   : > { %1476 = vmax.xlane.f32.xlu2 %v1475_v48  ;;  %v867_v6 = vperm.slane %v861_v13, %v2336_v38  ;;  %v884_v35 = vrot.slane %v2569_v14, 4  ;;  %v1481_v51 = vsel %vm274_vm1, %v771_v5, -inf  ;;  %v1137_v48 = vsel %vm552_vm3, %v1136_v17, %v2334_v37 }
 0x1ff   : > { %1473 = vmax.xlane.f32.xlu1 %v1472_v28  ;;  %v1143_v3 = vperm.slane %v1137_v48, %v2291_v63  ;;  %v775_v4 = vsel %vm552_vm3, %v759_v59, %v774_v57  ;;  %v1110_v5 = vrot.slane %v2619_v33, 4  ;;  %v1150_v24 = vrot.slane %v2367_v19, 4  ;;  %v2654_v56 = vpop.permute.xlu1 %481 }
 0x200   : > { %1479 = vmax.xlane.f32.xlu0 %v1478_v25  ;;  %v839_v25 = vsel %vm552_vm3, %v2437_v39, %v838_v46  ;;  %v1049_v39 = vsel %vm552_vm3, %v1048_v52, %v2560_v58  ;;  %v880_v28 = vrot.slane %v867_v6, 4  ;;  %v1119_v52 = vperm.slane %v1113_v55, %v2291_v63 }
 0x201   : > { %v847_v23 = vperm.slane %v839_v25, %v2336_v38  ;;  %v1184_v46 = vrot.slane %v1155_v10, 4  ;;  %v1055_v16 = vperm.slane %v1049_v39, %v2336_v38  ;;  %v1151_v39 = vsel %vm552_vm3, %v2369_v20, %v1150_v24 }
 0x202   : > { %v2633_v11 = vsel %vm552_vm3, %v880_v28, %v843_v34  ;;  %v1161_v17 = vsel %vm552_vm3, %v1160_v22, %v1119_v52  ;;  %v1186_v59 = vrot.slane %v1143_v3, 4  ;;  %v1493_v55 = vsel %vm274_vm1, %v775_v4, -inf  ;;  %v2656_v22 = vpop.permute.xlu0 %505 }
 0x203   : > { %v2624_v13 = vsel %vm552_vm3, %v884_v35, %v847_v23  ;;  %v1097_v53 = vsel %vm552_vm3, %v1096_v12, %v1055_v16  ;;  %v1111_v35 = vsel %vm552_vm3, %v2628_v62, %v1110_v5  ;;  %v1185_v45 = vsel %vm552_vm3, %v1184_v46, %v1143_v3 }
 0x204   : > { %v1544_v19 = vsel %vm274_vm1, %v1097_v53, -inf  ;;  %v1586_v48 = vsel %vm274_vm1, %v1111_v35, -inf  ;;  %v1191_v20 = vperm.slane %v1185_v45, %v2336_v38  ;;  %v1074_v28 = vrot.slane %v2545_v15, 4 }
 0x205   : > { %v886_v57 = vrot.slane %v847_v23, 4  ;;  %v1138_v12 = vrot.slane %v2334_v37, 4  ;;  %v1098_v4 = vrot.slane %v1055_v16, 4  ;;  %v1084_v15 = vrot.slane %v2578_v60, 4 }
 0x206   : > { %1485 = vmax.xlane.f32.xlu2 %v2514_v31  ;;  %v882_v31 = vrot.slane %v843_v34, 4  ;;  %v2648_v34 = vpop.permute.xlu2 %493  ;;  %v1114_v60 = vrot.slane %v2300_v9, 4  ;;  %v1162_v16 = vrot.slane %v1119_v52, 4  ;;  %v1208_v35 = vrot.slane %v1191_v20, 4 }
 0x207   : > { %1482 = vmax.xlane.f32.xlu1 %v1481_v51  ;;  %v1050_v51 = vrot.slane %v2560_v58, 4  ;;  %v1126_v58 = vrot.slane %v2297_v7, 4  ;;  %v887_v3 = vsel %vm552_vm3, %v2569_v14, %v886_v57  ;;  %v1139_v7 = vsel %vm552_vm3, %v2376_v26, %v1138_v12 }
 0x208   : > { %1488 = vmax.xlane.f32.xlu0 %v1487_v1  ;;  %v2639_v25 = vsel %vm552_vm3, %v867_v6, %v882_v31  ;;  %v1167_v6 = vperm.slane %v1161_v17, %v2336_v38  ;;  %v2662_v1 = vperm.slane %v1151_v39, %v2291_v63  ;;  %v1187_v31 = vsel %vm552_vm3, %v1155_v10, %v1186_v59 }
 0x209   : > { %v1051_v5 = vsel %vm552_vm3, %v2539_v8, %v1050_v51  ;;  %v1127_v17 = vsel %vm552_vm3, %v2342_v43, %v1126_v58  ;;  %v1099_v10 = vsel %vm552_vm3, %v2597_v61, %v1098_v4  ;;  %v2681_v14 = vperm.slane %v1187_v31, %v2336_v38  ;;  %v2706_v51 = vpop.permute.xlu1 %517 }
 0x20a   : > { %v1210_v46 = vrot.slane %v1167_v6, 4  ;;  %v1196_v23 = vrot.slane %v2662_v1, 4  ;;  %v1075_v8 = vsel %vm552_vm3, %v2521_v21, %v1074_v28  ;;  %v1538_v43 = vsel %vm274_vm1, %v887_v3, -inf }
 0x20b   : > { %v1059_v26 = vperm.slane %v1051_v5, %v2336_v38  ;;  %v2689_v24 = vperm.slane %v1127_v17, %v2291_v63  ;;  %v2692_v53 = vperm.slane %v1139_v7, %v2291_v63  ;;  %v1550_v21 = vsel %vm274_vm1, %v1099_v10, -inf }
 0x20c   : > { %v1211_v37 = vsel %vm552_vm3, %v1191_v20, %v1210_v46  ;;  %v1163_v9 = vsel %vm552_vm3, %v2585_v54, %v1162_v16  ;;  %v1083_v52 = vperm.slane %v1075_v8, %v2336_v38  ;;  %v1212_v59 = vrot.slane %v2681_v14, 4 }
 0x20d   : > { %v1553_v61 = vsel %vm274_vm1, %v1211_v37, -inf  ;;  %v1197_v39 = vsel %vm552_vm3, %v1196_v23, %v2692_v53  ;;  %v1085_v20 = vsel %vm552_vm3, %v1084_v15, %v2551_v27  ;;  %v1172_v54 = vrot.slane %v2689_v24, 4 }
 0x20e   : > { %1494 = vmax.xlane.f32.xlu2 %v1493_v55  ;;  %v2695_v45 = vpop.permute.xlu2 %529  ;;  %v1115_v55 = vsel %vm552_vm3, %v2324_v30, %v1114_v60  ;;  %v812_v28 = vrot.slane %v2508_v2, 4  ;;  %v1209_v57 = vsel %vm552_vm3, %v1208_v35, %v1167_v6  ;;  %v1171_v58 = vperm.slane %v1163_v9, %v2336_v38 }
 0x20f   : > { %1545 = vmax.xlane.f32.xlu1 %v1544_v19  ;;  %v2708_v19 = vpop.permute.xlu0 %541  ;;  %v1060_v12 = vrot.slane %v2557_v0, 4  ;;  %v2719_v46 = vperm.slane %v1197_v39, %v2336_v38  ;;  %v1123_v31 = vperm.slane %v1115_v55, %v2291_v63  ;;  %v2724_v27 = vperm.slane %v1085_v20, %v2336_v38 }
 0x210   : > { %1587 = vmax.xlane.f32.xlu0 %v1586_v48  ;;  %v1102_v48 = vrot.slane %v1059_v26, 4  ;;  %v1213_v3 = vsel %vm552_vm3, %v1212_v59, %v1171_v58  ;;  %v1547_v2 = vsel %vm274_vm1, %v1209_v57, -inf  ;;  %v813_v6 = vsel %vm552_vm3, %v812_v28, %v2483_v42 }
 0x211   : > { %v1100_v4 = vrot.slane %v1083_v52, 4  ;;  %v1173_v5 = vsel %vm552_vm3, %v1172_v54, %v1123_v31  ;;  %v1559_v15 = vsel %vm274_vm1, %v1213_v3, -inf  ;;  %v1061_v17 = vsel %vm552_vm3, %v1060_v12, %v2526_v18 }
 0x212   : > { %v1103_v30 = vsel %vm552_vm3, %v1083_v52, %v1102_v48  ;;  %v1216_v7 = vrot.slane %v2719_v46, 4  ;;  %v788_v37 = vrot.slane %v2416_v44, 4  ;;  %v800_v23 = vrot.slane %v2474_v29, 4  ;;  %v2749_v44 = vpop.permute.xlu1 %389 }
 0x213   : > { %v1562_v0 = vsel %vm274_vm1, %v1103_v30, -inf  ;;  %v1104_v42 = vrot.slane %v2724_v27, 4  ;;  %v2741_v8 = vperm.slane %v813_v6, %v2291_v63  ;;  %v924_v60 = vrot.slane %v2708_v19, 4 }
 0x214   : > { %v1179_v16 = vperm.slane %v1173_v5, %v2336_v38  ;;  %v1101_v18 = vsel %vm552_vm3, %v1100_v4, %v1059_v26  ;;  %v789_v35 = vsel %vm552_vm3, %v788_v37, %v2412_v36  ;;  %v776_v26 = vrot.slane %v2423_v40, 4 }
 0x215   : > { %v848_v52 = vrot.slane %v2741_v8, 4  ;;  %v925_v39 = vsel %vm552_vm3, %v924_v60, %v2706_v51  ;;  %v1556_v59 = vsel %vm274_vm1, %v1101_v18, -inf  ;;  %v1174_v55 = vrot.slane %v1123_v31, 4 }
 0x216   : > { %1539 = vmax.xlane.f32.xlu2 %v1538_v43  ;;  %v2738_v10 = vpop.permute.xlu2 %401  ;;  %v2747_v43 = vperm.slane %v1061_v17, %v2336_v38  ;;  %v1108_v36 = vrot.slane %v2628_v62, 4  ;;  %v2769_v20 = vperm.slane %v789_v35, %v2291_v63  ;;  %v900_v28 = vrot.slane %v2648_v34, 4 }
 0x217   : > { %1554 = vmax.xlane.f32.xlu1 %v1553_v61  ;;  %v2751_v29 = vpop.permute.xlu0 %377  ;;  %v1217_v61 = vsel %vm552_vm3, %v1216_v7, %v1179_v16  ;;  %v888_v57 = vrot.slane %v2654_v56, 4  ;;  %v2778_v12 = vperm.slane %v925_v39, %v2291_v63  ;;  %v1214_v62 = vrot.slane %v1171_v58, 4 }
 0x218   : > { %1551 = vmax.xlane.f32.xlu0 %v1550_v21  ;;  %v801_v21 = vsel %vm552_vm3, %v800_v23, %v2456_v47  ;;  %v1105_v9 = vsel %vm552_vm3, %v1104_v42, %v2747_v43  ;;  %v1571_v48 = vsel %vm274_vm1, %v1217_v61, -inf  ;;  %v1198_v47 = vrot.slane %v2692_v53, 4 }
 0x219   : > { %v2772_v40 = vperm.slane %v801_v21, %v2291_v63  ;;  %v1568_v54 = vsel %vm274_vm1, %v1105_v9, -inf  ;;  %v777_v53 = vsel %vm552_vm3, %v776_v26, %v2192_v32  ;;  %v912_v30 = vrot.slane %v2695_v45, 4 }
 0x21a   : > { %v1175_v3 = vsel %vm552_vm3, %v2689_v24, %v1174_v55  ;;  %v1215_v6 = vsel %vm552_vm3, %v2681_v14, %v1214_v62  ;;  %v824_v58 = vrot.slane %v2769_v20, 4  ;;  %v1109_v5 = vsel %vm552_vm3, %v1108_v36, %v2619_v33  ;;  %v2812_v33 = vpop.permute.xlu1 %425 }
 0x21b   : > { %v849_v31 = vsel %vm552_vm3, %v848_v52, %v2772_v40  ;;  %v913_v32 = vsel %vm552_vm3, %v912_v30, %v2656_v22  ;;  %v1199_v24 = vsel %vm552_vm3, %v2662_v1, %v1198_v47  ;;  %v960_v17 = vrot.slane %v2778_v12, 4 }
 0x21c   : > { %v2806_v7 = vperm.slane %v849_v31, %v2336_v38  ;;  %v783_v37 = vperm.slane %v777_v53, %v2291_v63  ;;  %v1565_v1 = vsel %vm274_vm1, %v1215_v6, -inf  ;;  %v1183_v60 = vperm.slane %v1175_v3, %v2336_v38 }
 0x21d   : > { %v1207_v21 = vperm.slane %v1199_v24, %v2336_v38  ;;  %v1106_v9 = vrot.slane %v2747_v43, 4  ;;  %v926_v55 = vrot.slane %v2706_v51, 4  ;;  %v850_v51 = vrot.slane %v2772_v40, 4 }
 0x21e   : > { %1548 = vmax.xlane.f32.xlu2 %v1547_v2  ;;  %v901_v2 = vsel %vm552_vm3, %v900_v28, %v2608_v49  ;;  %v2792_v4 = vpop.permute.xlu2 %437  ;;  %v825_v35 = vsel %vm552_vm3, %v824_v58, %v783_v37  ;;  %v872_v26 = vrot.slane %v2806_v7, 4  ;;  %v914_v58 = vrot.slane %v2656_v22, 4 }
 0x21f   : > { %1563 = vmax.xlane.f32.xlu1 %v1562_v0  ;;  %v1218_v0 = vrot.slane %v1179_v16, 4  ;;  %v2810_v23 = vperm.slane %v901_v2, %v2291_v63  ;;  %v2814_v42 = vpop.permute.xlu0 %413  ;;  %v2819_v16 = vperm.slane %v913_v32, %v2291_v63  ;;  %v831_v36 = vperm.slane %v825_v35, %v2336_v38 }
 0x220   : > { %1560 = vmax.xlane.f32.xlu0 %v1559_v15  ;;  %v889_v15 = vsel %vm552_vm3, %v888_v57, %v2592_v50  ;;  %v1220_v53 = vrot.slane %v1207_v21, 4  ;;  %v851_v40 = vsel %vm552_vm3, %v2741_v8, %v850_v51 }
 0x221   : > { %v1219_v14 = vsel %vm552_vm3, %v2719_v46, %v1218_v0  ;;  %v1580_v46 = vsel %vm274_vm1, %v1109_v5, -inf  ;;  %v2823_v18 = vperm.slane %v889_v15, %v2291_v63  ;;  %v961_v52 = vsel %vm552_vm3, %v960_v17, %v2819_v16 }
 0x222   : > { %v1577_v61 = vsel %vm274_vm1, %v1219_v14, -inf  ;;  %v936_v39 = vrot.slane %v2810_v23, 4  ;;  %v873_v28 = vsel %vm552_vm3, %v872_v26, %v831_v36  ;;  %v2850_v3 = vpop.permute.xlu1 %461  ;;  %v902_v5 = vrot.slane %v2608_v49, 4 }
 0x223   : > { %v1496_v6 = vsel %vm274_vm1, %v873_v28, -inf  ;;  %v1221_v24 = vsel %vm552_vm3, %v1220_v53, %v1183_v60  ;;  %v859_v22 = vperm.slane %v851_v40, %v2336_v38 }
 0x224   : > { %v937_v43 = vsel %vm552_vm3, %v936_v39, %v2823_v18 }
 0x225   : > { %v943_v31 = vperm.slane %v937_v43, %v2336_v38 }
 0x226   : > { %1557 = vmax.xlane.f32.xlu2 %v1556_v59  ;;  %v1222_v59 = vrot.slane %v1183_v60, 4  ;;  %v2842_v57 = vpop.permute.xlu2 %473  ;;  %v1583_v60 = vsel %vm274_vm1, %v1221_v24, -inf }
 0x227   : > { %1572 = vmax.xlane.f32.xlu1 %v1571_v48  ;;  %v1107_v48 = vsel %vm552_vm3, %v2724_v27, %v1106_v9  ;;  %v927_v27 = vsel %vm552_vm3, %v2708_v19, %v926_v55  ;;  %v2852_v2 = vpop.permute.xlu0 %449  ;;  %v826_v19 = vrot.slane %v783_v37, 4  ;;  %v986_v15 = vrot.slane %v943_v31, 4 }
 0x228   : > { %1569 = vmax.xlane.f32.xlu0 %v1568_v54  ;;  %v1223_v47 = vsel %vm552_vm3, %v1207_v21, %v1222_v59  ;;  %v967_v54 = vperm.slane %v961_v52, %v2336_v38  ;;  %v1574_v62 = vsel %vm274_vm1, %v1107_v48, -inf  ;;  %v2859_v32 = vperm.slane %v927_v27, %v2291_v63 }
 0x229   : > { %v1589_v30 = vsel %vm274_vm1, %v1223_v47, -inf  ;;  %v827_v14 = vsel %vm552_vm3, %v2769_v20, %v826_v19  ;;  %v890_v37 = vrot.slane %v2592_v50, 4  ;;  %v938_v20 = vrot.slane %v2823_v18, 4 }
 0x22a   : > { %v984_v0 = vrot.slane %v967_v54, 4  ;;  %v987_v8 = vsel %vm552_vm3, %v967_v54, %v986_v15  ;;  %v972_v49 = vrot.slane %v2859_v32, 4  ;;  %v874_v18 = vrot.slane %v831_v36, 4  ;;  %v2888_v39 = vpop.permute.xlu1 %497 }
 0x22b   : > { %v1505_v50 = vsel %vm274_vm1, %v987_v8, -inf }
 0x22c   : > { %v985_v17 = vsel %vm552_vm3, %v984_v0, %v943_v31  ;;  %v875_v48 = vsel %vm552_vm3, %v2806_v7, %v874_v18  ;;  %v1260_v31 = vrot.slane %v2852_v2, 4 }
 0x22d   : > { %v1499_v35 = vsel %vm274_vm1, %v985_v17, -inf  ;;  %v1502_v53 = vsel %vm274_vm1, %v875_v48, -inf }
 0x22e   : > { %1566 = vmax.xlane.f32.xlu2 %v1565_v1  ;;  %v915_v1 = vsel %vm552_vm3, %v2695_v45, %v914_v58  ;;  %v835_v45 = vperm.slane %v827_v14, %v2336_v38  ;;  %v2880_v9 = vpop.permute.xlu2 %509  ;;  %v1261_v14 = vsel %vm552_vm3, %v1260_v31, %v2812_v33 }
 0x22f   : > { %1581 = vmax.xlane.f32.xlu1 %v1580_v46  ;;  %v962_v46 = vrot.slane %v2819_v16, 4  ;;  %v923_v21 = vperm.slane %v915_v1, %v2291_v63  ;;  %v876_v16 = vrot.slane %v859_v22, 4  ;;  %v2890_v59 = vpop.permute.xlu0 %485  ;;  %v1236_v1 = vrot.slane %v2738_v10, 4 }
 0x230   : > { %1578 = vmax.xlane.f32.xlu0 %v1577_v61  ;;  %v903_v61 = vsel %vm552_vm3, %v2648_v34, %v902_v5  ;;  %v891_v34 = vsel %vm552_vm3, %v2654_v56, %v890_v37  ;;  %v878_v47 = vrot.slane %v835_v45, 4 }
 0x231   : > { %v963_v26 = vsel %vm552_vm3, %v2778_v12, %v962_v46  ;;  %v911_v52 = vperm.slane %v903_v61, %v2291_v63  ;;  %v973_v55 = vsel %vm552_vm3, %v972_v49, %v923_v21  ;;  %v939_v12 = vsel %vm552_vm3, %v2810_v23, %v938_v20 }
 0x232   : > { %v971_v43 = vperm.slane %v963_v26, %v2336_v38  ;;  %v899_v56 = vperm.slane %v891_v34, %v2291_v63  ;;  %v877_v36 = vsel %vm552_vm3, %v876_v16, %v835_v45  ;;  %v879_v54 = vsel %vm552_vm3, %v859_v22, %v878_v47  ;;  %v2915_v5 = vpop.permute.xlu1 %533 }
 0x233   : > { %v2902_v28 = vperm.slane %v973_v55, %v2336_v38  ;;  %v947_v7 = vperm.slane %v939_v12, %v2336_v38  ;;  %v1508_v51 = vsel %vm274_vm1, %v877_v36, -inf  ;;  %v1514_v27 = vsel %vm274_vm1, %v879_v54, -inf }
 0x234   : > { %v988_v23 = vrot.slane %v971_v43, 4  ;;  %v950_v8 = vrot.slane %v899_v56, 4  ;;  %v974_v46 = vrot.slane %v923_v21, 4  ;;  %v1360_v49 = vrot.slane %v2915_v5, 4 }
 0x235   : > { %v990_v58 = vrot.slane %v947_v7, 4  ;;  %v1224_v20 = vrot.slane %v2749_v44, 4  ;;  %v2934_v45 = vperm.slane %v1261_v14, %v2291_v63  ;;  %v1248_v21 = vrot.slane %v2792_v4, 4 }
 0x236   : > { %1575 = vmax.xlane.f32.xlu2 %v1574_v62  ;;  %v948_v62 = vrot.slane %v911_v52, 4  ;;  %v2911_v0 = vpop.permute.xlu2 %545  ;;  %v989_v40 = vsel %vm552_vm3, %v988_v23, %v947_v7  ;;  %v1348_v16 = vrot.slane %v2888_v39, 4  ;;  %v975_v26 = vsel %vm552_vm3, %v2859_v32, %v974_v46 }
 0x237   : > { %1590 = vmax.xlane.f32.xlu1 %v1589_v30  ;;  %v2917_v24 = vpop.permute.xlu0 %521  ;;  %v991_v15 = vsel %vm552_vm3, %v971_v43, %v990_v58  ;;  %v1372_v17 = vrot.slane %v2911_v0, 4  ;;  %v1511_v37 = vsel %vm274_vm1, %v989_v40, -inf  ;;  %v1249_v55 = vsel %vm552_vm3, %v1248_v21, %v2814_v42 }
 0x238   : > { %1497 = vmax.xlane.f32.xlu0 %v1496_v6  ;;  %v949_v30 = vsel %vm552_vm3, %v948_v62, %v899_v56  ;;  %v992_v6 = vrot.slane %v2902_v28, 4  ;;  %v1517_v61 = vsel %vm274_vm1, %v991_v15, -inf  ;;  %v1361_v48 = vsel %vm552_vm3, %v1360_v49, %v2880_v9 }
 0x239   : > { %v955_v19 = vperm.slane %v949_v30, %v2336_v38  ;;  %v951_v47 = vsel %vm552_vm3, %v911_v52, %v950_v8  ;;  %v1225_v12 = vsel %vm552_vm3, %v1224_v20, %v2230_v41  ;;  %v1296_v43 = vrot.slane %v2934_v45, 4 }
 0x23a   : > { %v983_v32 = vperm.slane %v975_v26, %v2336_v38  ;;  %v1349_v56 = vsel %vm552_vm3, %v1348_v16, %v2842_v57  ;;  %v1520_v36 = vsel %vm274_vm1, %v2633_v11, -inf  ;;  %v1532_v54 = vsel %vm274_vm1, %v2624_v13, -inf }
 0x23b   : > { %v993_v22 = vsel %vm552_vm3, %v992_v6, %v955_v19  ;;  %v1255_v62 = vperm.slane %v1249_v55, %v2291_v63  ;;  %v1367_v52 = vperm.slane %v1361_v48, %v2291_v63  ;;  %v959_v7 = vperm.slane %v951_v47, %v2336_v38 }
 0x23c   : > { %v1526_v11 = vsel %vm274_vm1, %v2639_v25, -inf  ;;  %v1238_v13 = vrot.slane %v2751_v29, 4  ;;  %v2975_v30 = vperm.slane %v1349_v56, %v2291_v63  ;;  %v996_v31 = vrot.slane %v983_v32, 4 }
 0x23d   : > { %v1297_v6 = vsel %vm552_vm3, %v1296_v43, %v1255_v62  ;;  %v994_v58 = vrot.slane %v955_v19, 4  ;;  %v1226_v40 = vrot.slane %v2230_v41, 4  ;;  %v1262_v15 = vrot.slane %v2812_v33, 4 }
 0x23e   : > { %1584 = vmax.xlane.f32.xlu2 %v1583_v60  ;;  %v1373_v60 = vsel %vm552_vm3, %v1372_v17, %v2917_v24  ;;  %v998_v14 = vrot.slane %v959_v7, 4  ;;  %v1303_v41 = vperm.slane %v1297_v6, %v2336_v38  ;;  %v1239_v33 = vsel %vm552_vm3, %v2738_v10, %v1238_v13 }
 0x23f   : > { %1500 = vmax.xlane.f32.xlu1 %v1499_v35  ;;  %v1237_v35 = vsel %vm552_vm3, %v1236_v1, %v2751_v29  ;;  %v2942_v34 = vperm.slane %v1373_v60, %v2291_v63  ;;  %v995_v1 = vsel %vm552_vm3, %v2902_v28, %v994_v58  ;;  %v1263_v8 = vsel %vm552_vm3, %v2852_v2, %v1262_v15 }
 0x240   : > { %1506 = vmax.xlane.f32.xlu0 %v1505_v50  ;;  %v1523_v50 = vsel %vm274_vm1, %v993_v22, -inf  ;;  %v2945_v18 = vperm.slane %v1237_v35, %v2291_v63  ;;  %v997_v49 = vsel %vm552_vm3, %v996_v31, %v959_v7  ;;  %v1250_v60 = vrot.slane %v2814_v42, 4 }
 0x241   : > { %v1410_v28 = vrot.slane %v1367_v52, 4  ;;  %v1374_v10 = vrot.slane %v2917_v24, 4  ;;  %v1529_v2 = vsel %vm274_vm1, %v995_v1, -inf  ;;  %v1350_v21 = vrot.slane %v2842_v57, 4 }
 0x242   : > { %v1272_v23 = vrot.slane %v2945_v18, 4  ;;  %v3011_v16 = vperm.slane %v1263_v8, %v2291_v63  ;;  %v1535_v42 = vsel %vm274_vm1, %v997_v49, -inf  ;;  %v1320_v26 = vrot.slane %v1303_v41, 4 }
 0x243   : > { %v1227_v55 = vsel %vm552_vm3, %v2749_v44, %v1226_v40  ;;  %v1298_v48 = vrot.slane %v1255_v62, 4  ;;  %v1251_v57 = vsel %vm552_vm3, %v2792_v4, %v1250_v60  ;;  %v1411_v43 = vsel %vm552_vm3, %v2942_v34, %v1410_v28 }
 0x244   : > { %v1375_v56 = vsel %vm552_vm3, %v2911_v0, %v1374_v10  ;;  %v1362_v6 = vrot.slane %v2880_v9, 4  ;;  %v1235_v58 = vperm.slane %v1227_v55, %v2291_v63 }
 0x245   : > { %v1299_v62 = vsel %vm552_vm3, %v2934_v45, %v1298_v48  ;;  %v1351_v45 = vsel %vm552_vm3, %v2888_v39, %v1350_v21 }
 0x246   : > { %1503 = vmax.xlane.f32.xlu2 %v1502_v53  ;;  %v1408_v53 = vrot.slane %v2942_v34, 4  ;;  %v1307_v31 = vperm.slane %v1299_v62, %v2336_v38  ;;  %v3063_v1 = vperm.slane %v1351_v45, %v2291_v63  ;;  %v1363_v9 = vsel %vm552_vm3, %v2915_v5, %v1362_v6 }
 0x247   : > { %1509 = vmax.xlane.f32.xlu1 %v1508_v51  ;;  %v2967_v51 = vperm.slane %v1225_v12, %v2291_v63  ;;  %v3019_v12 = vperm.slane %v1239_v33, %v2291_v63  ;;  %v1338_v33 = vrot.slane %v2850_v3, 4 }
 0x248   : > { %1515 = vmax.xlane.f32.xlu0 %v1514_v27  ;;  %v1336_v27 = vrot.slane %v2890_v59, 4  ;;  %v1409_v25 = vsel %vm552_vm3, %v1408_v53, %v1367_v52  ;;  %v1308_v52 = vrot.slane %v3011_v16, 4 }
 0x249   : > { %v1273_v19 = vsel %vm552_vm3, %v1272_v23, %v2967_v51  ;;  %v3003_v20 = vperm.slane %v1409_v25, %v2336_v38  ;;  %v1274_v44 = vrot.slane %v2967_v51, 4  ;;  %v1259_v51 = vperm.slane %v1251_v57, %v2291_v63 }
 0x24a   : > { %v1337_v29 = vsel %vm552_vm3, %v1336_v27, %v2850_v3  ;;  %v3043_v27 = vperm.slane %v1411_v43, %v2336_v38  ;;  %v1284_v40 = vrot.slane %v3019_v12, 4  ;;  %v1371_v3 = vperm.slane %v1363_v9, %v2291_v63 }
 0x24b   : > { %v1343_v35 = vperm.slane %v1337_v29, %v2291_v63  ;;  %v1275_v39 = vsel %vm552_vm3, %v2945_v18, %v1274_v44  ;;  %v1309_v29 = vsel %vm552_vm3, %v1308_v52, %v1259_v51  ;;  %v1310_v44 = vrot.slane %v1259_v51, 4 }
 0x24c   : > { %v1283_v49 = vperm.slane %v1275_v39, %v2336_v38  ;;  %v1285_v5 = vsel %vm552_vm3, %v1284_v40, %v1235_v58  ;;  %v3077_v28 = vperm.slane %v1309_v29, %v2336_v38  ;;  %v1422_v51 = vrot.slane %v1371_v3, 4 }
 0x24d   : > { %v1386_v4 = vrot.slane %v1343_v35, 4 }
 0x24e   : > { %1512 = vmax.xlane.f32.xlu2 %v1511_v37  ;;  %v1384_v37 = vrot.slane %v2975_v30, 4  ;;  %v1326_v43 = vrot.slane %v1283_v49, 4 }
 0x24f   : > { %1518 = vmax.xlane.f32.xlu1 %v1517_v61  ;;  %v999_v61 = vsel %vm552_vm3, %v983_v32, %v998_v14  ;;  %v1432_v32 = vrot.slane %v3003_v20, 4  ;;  %v1387_v25 = vsel %vm552_vm3, %v2975_v30, %v1386_v4  ;;  %v1324_v30 = vrot.slane %v1307_v31, 4 }
 0x250   : > { %1524 = vmax.xlane.f32.xlu0 %v1523_v50  ;;  %v1279_v50 = vperm.slane %v1273_v19, %v2336_v38  ;;  %v1541_v47 = vsel %vm274_vm1, %v999_v61, -inf  ;;  %v1385_v24 = vsel %vm552_vm3, %v1384_v37, %v1343_v35  ;;  %v1395_v60 = vperm.slane %v1387_v25, %v2336_v38 }
 0x251   : > { %v1391_v7 = vperm.slane %v1385_v24, %v2336_v38  ;;  %v1339_v61 = vsel %vm552_vm3, %v2890_v59, %v1338_v33  ;;  %v1704_v35 = vlaneseq  ;;  %v1325_v55 = vsel %vm552_vm3, %v1324_v30, %v1283_v49 }
 0x252   : > { %v1321_v34 = vsel %vm552_vm3, %v1320_v26, %v1279_v50  ;;  %v1286_v26 = vrot.slane %v1235_v58, 4  ;;  %v3091_v59 = vperm.slane %v1339_v61, %v2291_v63  ;;  %v1291_v24 = vperm.slane %v1285_v5, %v2336_v38 }
 0x253   : > { %v1433_v13 = vsel %vm552_vm3, %v1432_v32, %v1391_v7  ;;  %v1592_v15 = vsel %vm274_vm1, %v1321_v34, -inf  ;;  %v1434_v8 = vrot.slane %v1391_v7, 4  ;;  %v3095_v57 = vand.u32 127, %v1704_v35 }
 0x254   : > { %v1595_v19 = vsel %vm274_vm1, %v1433_v13, -inf  ;;  %v1328_v32 = vrot.slane %v3077_v28, 4  ;;  %v1287_v52 = vsel %vm552_vm3, %v3019_v12, %v1286_v26  ;;  %v1311_v4 = vsel %vm552_vm3, %v3011_v16, %v1310_v44 }
 0x255   : > { %v3104_v62 = vadd.s32 4294967288, %v3095_v57  ;;  %v1327_v7 = vsel %vm552_vm3, %v1307_v31, %v1326_v43  ;;  %v1438_v45 = vrot.slane %v1395_v60, 4  ;;  %v3123_v39 = vperm.slane %v1311_v4, %v2336_v38 }
 0x256   : > { %1521 = vmax.xlane.f32.xlu2 %v1520_v36  ;;  %v1329_v13 = vsel %vm552_vm3, %v1328_v32, %v1291_v24  ;;  %v1610_v29 = vsel %vm274_vm1, %v1327_v7, -inf  ;;  %v1398_v5 = vrot.slane %v3091_v59, 4 }
 0x257   : > { %1527 = vmax.xlane.f32.xlu1 %v1526_v11  ;;  %v3048_v11 = vperm.slane %v1375_v56, %v2291_v63  ;;  %v1604_v56 = vsel %vm274_vm1, %v1325_v55, -inf  ;;  %v1439_v31 = vsel %vm552_vm3, %v3043_v27, %v1438_v45  ;;  %v1616_v9 = vsel %vm274_vm1, %v1329_v13, -inf }
 0x258   : > { %1533 = vmax.xlane.f32.xlu0 %v1532_v54  ;;  %v1322_v54 = vrot.slane %v1279_v50, 4  ;;  %v1396_v50 = vrot.slane %v3063_v1, 4  ;;  %v1613_v33 = vsel %vm274_vm1, %v1439_v31, -inf  ;;  %v1399_v44 = vsel %vm552_vm3, %v3063_v1, %v1398_v5 }
 0x259   : > { %v2980_v17 = vpop.xlane.xlu2 %1455  ;;  %v1420_v18 = vrot.slane %v3048_v11, 4  ;;  %v1407_v45 = vperm.slane %v1399_v44, %v2336_v38 }
 0x25a   : > { %v2985_v22 = vpop.xlane.xlu1 %1491  ;;  %v1323_v0 = vsel %vm552_vm3, %v1303_v41, %v1322_v54  ;;  %v1436_v41 = vrot.slane %v3043_v27, 4  ;;  %v1397_v63 = vsel %vm552_vm3, %v1396_v50, %v3091_v59  ;;  %v1423_v27 = vsel %vm552_vm3, %v3048_v11, %v1422_v51 }
 0x25b   : > { %v2997_v46 = vpop.xlane.xlu0 %1449  ;;  %v1598_v14 = vsel %vm274_vm1, %v1323_v0, -inf  ;;  %v1421_v48 = vsel %vm552_vm3, %v1420_v18, %v1371_v3  ;;  %v1403_v6 = vperm.slane %v1397_v63, %v2336_v38  ;;  %v1431_v35 = vperm.slane %v1423_v27, %v2336_v38 }
 0x25c   : > { %v1427_v54 = vperm.slane %v1421_v48, %v2336_v38  ;;  %v1729_v51 = vperm.slane %v2985_v22, %v3095_v57 }
 0x25d   : > { %v1444_v63 = vrot.slane %v1431_v35, 4 }
 0x25e   : > { %1530 = vmax.xlane.f32.xlu2 %v1529_v2  ;;  %v1435_v2 = vsel %vm552_vm3, %v3003_v20, %v1434_v8  ;;  %v1440_v40 = vrot.slane %v1427_v54, 4 }
 0x25f   : > { %1536 = vmax.xlane.f32.xlu1 %v1535_v42  ;;  %v1437_v42 = vsel %vm552_vm3, %v1436_v41, %v1395_v60 }
 0x260   : > { %1542 = vmax.xlane.f32.xlu0 %v1541_v47  ;;  %v1601_v47 = vsel %vm274_vm1, %v1435_v2, -inf  ;;  %v1607_v20 = vsel %vm274_vm1, %v1437_v42, -inf  ;;  %v1441_v18 = vsel %vm552_vm3, %v1440_v40, %v1403_v6  ;;  %v1445_v40 = vsel %vm552_vm3, %v1444_v63, %v1407_v45 }
 0x261   : > { %v3029_v36 = vpop.xlane.xlu2 %1458 }
 0x262   : > { %v3034_v53 = vpop.xlane.xlu1 %1452  ;;  %v1712_v12 = vperm.slane %v3029_v36, %v3104_v62  ;;  %v1706_v36 = vperm.slane %v2997_v46, %v3095_v57 }
 0x263   : > { %v3039_v23 = vpop.xlane.xlu0 %1461  ;;  %v1708_v16 = vperm.slane %v3034_v53, %v3104_v62  ;;  %v1442_v53 = vrot.slane %v1403_v6, 4 }
 0x264   : > { %v1714_v41 = vperm.slane %v3039_v23, %v3095_v57 }
 0x265   : > { %v1443_v42 = vsel %vm552_vm3, %v1427_v54, %v1442_v53 }
 0x266   : > { %1593 = vmax.xlane.f32.xlu2 %v1592_v15  ;;  %v1330_v15 = vrot.slane %v1291_v24, 4 }
 0x267   : > { %1599 = vmax.xlane.f32.xlu1 %v1598_v14  ;;  %v3114_v14 = vperm.slane %v1287_v52, %v2336_v38 }
 0x268   : > { %1596 = vmax.xlane.f32.xlu0 %v1595_v19  ;;  %v1711_v19 = vperm.slane %v2980_v17, %v3095_v57  ;;  %v1710_v17 = vsel %vm1709_vm4, %v1708_v16, %v1706_v36  ;;  %v1331_v3 = vsel %vm552_vm3, %v3077_v28, %v1330_v15  ;;  %v1446_v16 = vrot.slane %v1407_v45, 4 }
 0x269   : > { %v3071_v37 = vpop.xlane.xlu2 %1467  ;;  %v1622_v32 = vsel %vm274_vm1, %v1331_v3, -inf  ;;  %v1334_v54 = vrot.slane %v3114_v14, 4 }
 0x26a   : > { %v1465_v10 = vpop.xlane.xlu1 %1464  ;;  %v1713_v8 = vsel %vm1709_vm4, %v1712_v12, %v1711_v19  ;;  %v1717_v46 = vperm.slane %v3071_v37, %v3095_v57  ;;  %v1332_v37 = vrot.slane %v3123_v39, 4  ;;  %v1631_v12 = vsel %vm274_vm1, %v1445_v40, -inf }
 0x26b   : > { %v3085_v21 = vpop.xlane.xlu0 %1470  ;;  %v1715_v25 = vperm.slane %v1465_v10, %v3104_v62  ;;  %v1805_v10 = vsel %vm1804_vm5, %v1713_v8, %v1710_v17  ;;  %v1335_v6 = vsel %vm552_vm3, %v3123_v39, %v1334_v54 }
 0x26c   : > { %v1718_v30 = vperm.slane %v3085_v21, %v3104_v62  ;;  %v1619_v21 = vsel %vm274_vm1, %v1441_v18, -inf  ;;  %v1333_v7 = vsel %vm552_vm3, %v1332_v37, %v3114_v14  ;;  %v1634_v14 = vsel %vm274_vm1, %v1335_v6, -inf }
 0x26d   : > { %v1716_v23 = vsel %vm1709_vm4, %v1715_v25, %v1714_v41  ;;  %v1628_v38 = vsel %vm274_vm1, %v1333_v7, -inf  ;;  %v1447_v25 = vsel %vm552_vm3, %v1431_v35, %v1446_v16 }
 0x26e   : > { %1602 = vmax.xlane.f32.xlu2 %v1601_v47  ;;  %v1719_v26 = vsel %vm1709_vm4, %v1718_v30, %v1717_v46  ;;  %v1807_v55 = vsel %vm1806_vm6, %v1716_v23, %v1805_v10 }
 0x26f   : > { %1608 = vmax.xlane.f32.xlu1 %v1607_v20  ;;  %v1625_v20 = vsel %vm274_vm1, %v1443_v42, -inf  ;;  %v1809_v43 = vsel %vm1808_vm7, %v1719_v26, %v1807_v55 }
 0x270   : > { %1605 = vmax.xlane.f32.xlu0 %v1604_v56 }
 0x271   : > { %v1477_v34 = vpop.xlane.xlu2 %1476 }
 0x272   : > { %v1474_v0 = vpop.xlane.xlu1 %1473  ;;  %v1721_v11 = vperm.slane %v1477_v34, %v3104_v62 }
 0x273   : > { %v1480_v58 = vpop.xlane.xlu0 %1479  ;;  %v1720_v49 = vperm.slane %v1474_v0, %v3095_v57 }
 0x274   : > { %v1723_v28 = vperm.slane %v1480_v58, %v3095_v57 }
 0x275   : > { %v1722_v48 = vsel %vm1709_vm4, %v1721_v11, %v1720_v49 }
 0x276   : > { %1611 = vmax.xlane.f32.xlu2 %v1610_v29  ;;  %v1811_v56 = vsel %vm1810_vm8, %v1722_v48, %v1809_v43 }
 0x277   : > { %1617 = vmax.xlane.f32.xlu1 %v1616_v9  ;;  %v1637_v9 = vsel %vm274_vm1, %v1447_v25, -inf }
 0x278   : > { %1614 = vmax.xlane.f32.xlu0 %v1613_v33 }
 0x279   : > { %v1486_v60 = vpop.xlane.xlu2 %1485 }
 0x27a   : > { %v1483_v61 = vpop.xlane.xlu1 %1482  ;;  %v1726_v59 = vperm.slane %v1486_v60, %v3095_v57 }
 0x27b   : > { %v1489_v2 = vpop.xlane.xlu0 %1488  ;;  %v1724_v50 = vperm.slane %v1483_v61, %v3104_v62 }
 0x27c   : > { %v1727_v47 = vperm.slane %v1489_v2, %v3104_v62 }
 0x27d   : > { %v1725_v24 = vsel %vm1709_vm4, %v1724_v50, %v1723_v28 }
 0x27e   : > { %1620 = vmax.xlane.f32.xlu2 %v1619_v21  ;;  %v1728_v52 = vsel %vm1709_vm4, %v1727_v47, %v1726_v59  ;;  %v1813_v4 = vsel %vm1812_vm9, %v1725_v24, %v1811_v56 }
 0x27f   : > { %1626 = vmax.xlane.f32.xlu1 %v1625_v20  ;;  %v1815_v22 = vsel %vm1814_vm10, %v1728_v52, %v1813_v4 }
 0x280   : > { %1623 = vmax.xlane.f32.xlu0 %v1622_v32 }
 0x281   : > { %v1495_v34 = vpop.xlane.xlu2 %1494 }
 0x282   : > { %v1730_v1 = vperm.slane %v1495_v34, %v3104_v62  ;;  %v1546_v0 = vpop.xlane.xlu1 %1545 }
 0x283   : > { %v3184_v13 = vpop.xlane.xlu0 %1587  ;;  %v1756_v23 = vperm.slane %v1546_v0, %v3095_v57 }
 0x284   : > { %v1731_v58 = vsel %vm1709_vm4, %v1730_v1, %v1729_v51  ;;  %v1777_v54 = vperm.slane %v3184_v13, %v3095_v57 }
 0x285   : > { %v1817_v15 = vsel %vm1816_vm11, %v1731_v58, %v1815_v22 }
 0x286   : > { %1843 = vst.msk [vmem:[%s3182_s15] sm:$0xff] %vm337_vm2, %v1817_v15  ;;  %1629 = vmax.xlane.f32.xlu2 %v1628_v38 }
 0x287   : > { %1635 = vmax.xlane.f32.xlu1 %v1634_v14 }
 0x288   : > { %1632 = vmax.xlane.f32.xlu0 %v1631_v12 }
 0x289   : > { %v3197_v31 = vpop.xlane.xlu2 %1539 }
 0x28a   : > { %v1555_v39 = vpop.xlane.xlu1 %1554 }
 0x28b   : > { %v1552_v29 = vpop.xlane.xlu0 %1551  ;;  %v1760_v49 = vperm.slane %v1555_v39, %v3104_v62 }
 0x28c   : > { %v1759_v11 = vperm.slane %v1552_v29, %v3095_v57 }
 0x28e   : > { %1638 = vmax.xlane.f32.xlu2 %v1637_v9  ;;  %v1761_v50 = vsel %vm1709_vm4, %v1760_v49, %v1759_v11 }
 0x291   : > { %v1549_v19 = vpop.xlane.xlu2 %1548 }
 0x292   : > { %v1564_v36 = vpop.xlane.xlu1 %1563  ;;  %v1757_v46 = vperm.slane %v1549_v19, %v3104_v62 }
 0x293   : > { %v1561_v53 = vpop.xlane.xlu0 %1560  ;;  %v1765_v35 = vperm.slane %v1564_v36, %v3095_v57 }
 0x294   : > { %v1763_v61 = vperm.slane %v1561_v53, %v3104_v62  ;;  %v1758_v37 = vsel %vm1709_vm4, %v1757_v46, %v1756_v23 }
 0x295   : > { %v1825_v26 = vsel %vm1804_vm5, %v1761_v50, %v1758_v37 }
 0x299   : > { %v1558_v27 = vpop.xlane.xlu2 %1557 }
 0x29a   : > { %v1573_v41 = vpop.xlane.xlu1 %1572  ;;  %v1762_v30 = vperm.slane %v1558_v27, %v3095_v57 }
 0x29b   : > { %v1570_v33 = vpop.xlane.xlu0 %1569  ;;  %v1769_v28 = vperm.slane %v1573_v41, %v3104_v62 }
 0x29c   : > { %v1764_v2 = vsel %vm1709_vm4, %v1763_v61, %v1762_v30  ;;  %v1768_v55 = vperm.slane %v1570_v33, %v3095_v57 }
 0x29d   : > { %v1826_v48 = vsel %vm1806_vm6, %v1764_v2, %v1825_v26 }
 0x29e   : > { %v1770_v32 = vsel %vm1709_vm4, %v1769_v28, %v1768_v55 }
 0x2a1   : > { %v1567_v18 = vpop.xlane.xlu2 %1566 }
 0x2a2   : > { %v1582_v8 = vpop.xlane.xlu1 %1581  ;;  %v1766_v60 = vperm.slane %v1567_v18, %v3104_v62 }
 0x2a3   : > { %v1579_v17 = vpop.xlane.xlu0 %1578  ;;  %v1774_v44 = vperm.slane %v1582_v8, %v3095_v57 }
 0x2a4   : > { %v1767_v21 = vsel %vm1709_vm4, %v1766_v60, %v1765_v35  ;;  %v1772_v59 = vperm.slane %v1579_v17, %v3104_v62  ;;  %v1753_v35 = vperm.slane %v3197_v31, %v3095_v57 }
 0x2a5   : > { %v1827_v47 = vsel %vm1808_vm7, %v1767_v21, %v1826_v48 }
 0x2a6   : > { %v1828_v52 = vsel %vm1810_vm8, %v1770_v32, %v1827_v47 }
 0x2a9   : > { %v1576_v5 = vpop.xlane.xlu2 %1575 }
 0x2aa   : > { %v1591_v3 = vpop.xlane.xlu1 %1590  ;;  %v1771_v42 = vperm.slane %v1576_v5, %v3095_v57 }
 0x2ab   : > { %v1498_v10 = vpop.xlane.xlu0 %1497  ;;  %v1778_v20 = vperm.slane %v1591_v3, %v3104_v62 }
 0x2ac   : > { %v1773_v24 = vsel %vm1709_vm4, %v1772_v59, %v1771_v42  ;;  %v1732_v9 = vperm.slane %v1498_v10, %v3095_v57 }
 0x2ad   : > { %v1829_v34 = vsel %vm1812_vm9, %v1773_v24, %v1828_v52  ;;  %v1779_v51 = vsel %vm1709_vm4, %v1778_v20, %v1777_v54 }
 0x2b1   : > { %v1585_v43 = vpop.xlane.xlu2 %1584 }
 0x2b2   : > { %v1775_v56 = vperm.slane %v1585_v43, %v3104_v62  ;;  %v1501_v63 = vpop.xlane.xlu1 %1500 }
 0x2b3   : > { %v1507_v4 = vpop.xlane.xlu0 %1506  ;;  %v1733_v16 = vperm.slane %v1501_v63, %v3104_v62 }
 0x2b4   : > { %v1776_v7 = vsel %vm1709_vm4, %v1775_v56, %v1774_v44  ;;  %v1736_v12 = vperm.slane %v1507_v4, %v3104_v62 }
 0x2b5   : > { %v1830_v1 = vsel %vm1814_vm10, %v1776_v7, %v1829_v34  ;;  %v1734_v41 = vsel %vm1709_vm4, %v1733_v16, %v1732_v9 }
 0x2b6   : > { %v1831_v0 = vsel %vm1816_vm11, %v1779_v51, %v1830_v1 }
 0x2b7   : > { %1845 = vst.msk [vmem:[%s3182_s15 + $0x10] sm:$0xff] %vm337_vm2, %v1831_v0 }
 0x2b9   : > { %v1504_v45 = vpop.xlane.xlu2 %1503 }
 0x2ba   : > { %v1510_v6 = vpop.xlane.xlu1 %1509  ;;  %v1735_v15 = vperm.slane %v1504_v45, %v3095_v57 }
 0x2bb   : > { %v1516_v58 = vpop.xlane.xlu0 %1515  ;;  %v1738_v25 = vperm.slane %v1510_v6, %v3095_v57 }
 0x2bc   : > { %v1737_v19 = vsel %vm1709_vm4, %v1736_v12, %v1735_v15  ;;  %v1741_v33 = vperm.slane %v1516_v58, %v3095_v57 }
 0x2bd   : > { %v1818_v18 = vsel %vm1804_vm5, %v1737_v19, %v1734_v41 }
 0x2c1   : > { %v1513_v22 = vpop.xlane.xlu2 %1512 }
 0x2c2   : > { %v1519_v13 = vpop.xlane.xlu1 %1518  ;;  %v1739_v38 = vperm.slane %v1513_v22, %v3104_v62 }
 0x2c3   : > { %v1525_v40 = vpop.xlane.xlu0 %1524  ;;  %v1742_v36 = vperm.slane %v1519_v13, %v3104_v62 }
 0x2c4   : > { %v1740_v53 = vsel %vm1709_vm4, %v1739_v38, %v1738_v25  ;;  %v1745_v8 = vperm.slane %v1525_v40, %v3104_v62 }
 0x2c5   : > { %v1819_v17 = vsel %vm1806_vm6, %v1740_v53, %v1818_v18  ;;  %v1743_v46 = vsel %vm1709_vm4, %v1742_v36, %v1741_v33 }
 0x2c6   : > { %v1820_v5 = vsel %vm1808_vm7, %v1743_v46, %v1819_v17 }
 0x2c9   : > { %v1522_v14 = vpop.xlane.xlu2 %1521 }
 0x2ca   : > { %v1528_v39 = vpop.xlane.xlu1 %1527  ;;  %v1744_v27 = vperm.slane %v1522_v14, %v3095_v57 }
 0x2cb   : > { %v1534_v29 = vpop.xlane.xlu0 %1533  ;;  %v1747_v11 = vperm.slane %v1528_v39, %v3095_v57 }
 0x2cc   : > { %v1746_v30 = vsel %vm1709_vm4, %v1745_v8, %v1744_v27  ;;  %v1750_v61 = vperm.slane %v1534_v29, %v3095_v57 }
 0x2cd   : > { %v1821_v10 = vsel %vm1810_vm8, %v1746_v30, %v1820_v5 }
 0x2d1   : > { %v1531_v23 = vpop.xlane.xlu2 %1530 }
 0x2d2   : > { %v1748_v49 = vperm.slane %v1531_v23, %v3104_v62  ;;  %v1537_v60 = vpop.xlane.xlu1 %1536 }
 0x2d3   : > { %v1543_v3 = vpop.xlane.xlu0 %1542  ;;  %v1751_v37 = vperm.slane %v1537_v60, %v3104_v62 }
 0x2d4   : > { %v1749_v2 = vsel %vm1709_vm4, %v1748_v49, %v1747_v11  ;;  %v1754_v50 = vperm.slane %v1543_v3, %v3104_v62 }
 0x2d5   : > { %v1822_v21 = vsel %vm1812_vm9, %v1749_v2, %v1821_v10  ;;  %v1752_v42 = vsel %vm1709_vm4, %v1751_v37, %v1750_v61 }
 0x2d6   : > { %v1755_v26 = vsel %vm1709_vm4, %v1754_v50, %v1753_v35  ;;  %v1823_v55 = vsel %vm1814_vm10, %v1752_v42, %v1822_v21 }
 0x2d7   : > { %v1824_v28 = vsel %vm1816_vm11, %v1755_v26, %v1823_v55 }
 0x2d8   : > { %1844 = vst.msk [vmem:[%s3182_s15 + $0x8] sm:$0xff] %vm337_vm2, %v1824_v28 }
 0x2d9   : > { %v1594_v48 = vpop.xlane.xlu2 %1593 }
 0x2da   : > { %v1600_v31 = vpop.xlane.xlu1 %1599  ;;  %v1780_v4 = vperm.slane %v1594_v48, %v3095_v57 }
 0x2db   : > { %v1597_v59 = vpop.xlane.xlu0 %1596  ;;  %v1783_v7 = vperm.slane %v1600_v31, %v3095_v57 }
 0x2dc   : > { %v1781_v34 = vperm.slane %v1597_v59, %v3104_v62 }
 0x2de   : > { %v1782_v13 = vsel %vm1709_vm4, %v1781_v34, %v1780_v4 }
 0x2e1   : > { %v1603_v47 = vpop.xlane.xlu2 %1602 }
 0x2e2   : > { %v1609_v24 = vpop.xlane.xlu1 %1608  ;;  %v1784_v54 = vperm.slane %v1603_v47, %v3104_v62 }
 0x2e3   : > { %v1606_v20 = vpop.xlane.xlu0 %1605  ;;  %v1787_v1 = vperm.slane %v1609_v24, %v3104_v62 }
 0x2e4   : > { %v1786_v51 = vperm.slane %v1606_v20, %v3095_v57  ;;  %v1785_v0 = vsel %vm1709_vm4, %v1784_v54, %v1783_v7 }
 0x2e5   : > { %v1832_v40 = vsel %vm1804_vm5, %v1785_v0, %v1782_v13 }
 0x2e6   : > { %v1788_v15 = vsel %vm1709_vm4, %v1787_v1, %v1786_v51 }
 0x2e7   : > { %v1833_v19 = vsel %vm1806_vm6, %v1788_v15, %v1832_v40 }
 0x2e9   : > { %v1612_v43 = vpop.xlane.xlu2 %1611 }
 0x2ea   : > { %v1618_v44 = vpop.xlane.xlu1 %1617  ;;  %v1789_v45 = vperm.slane %v1612_v43, %v3095_v57 }
 0x2eb   : > { %v1615_v32 = vpop.xlane.xlu0 %1614  ;;  %v1792_v38 = vperm.slane %v1618_v44, %v3095_v57 }
 0x2ec   : > { %v1790_v6 = vperm.slane %v1615_v32, %v3104_v62 }
 0x2ee   : > { %v1791_v12 = vsel %vm1709_vm4, %v1790_v6, %v1789_v45 }
 0x2ef   : > { %v1834_v36 = vsel %vm1808_vm7, %v1791_v12, %v1833_v19 }
 0x2f1   : > { %v1621_v56 = vpop.xlane.xlu2 %1620 }
 0x2f2   : > { %v1627_v52 = vpop.xlane.xlu1 %1626  ;;  %v1793_v58 = vperm.slane %v1621_v56, %v3104_v62 }
 0x2f3   : > { %v1624_v63 = vpop.xlane.xlu0 %1623  ;;  %v1796_v39 = vperm.slane %v1627_v52, %v3104_v62 }
 0x2f4   : > { %v1795_v16 = vperm.slane %v1624_v63, %v3095_v57  ;;  %v1794_v25 = vsel %vm1709_vm4, %v1793_v58, %v1792_v38 }
 0x2f5   : > { %v1835_v27 = vsel %vm1810_vm8, %v1794_v25, %v1834_v36 }
 0x2f6   : > { %v1797_v41 = vsel %vm1709_vm4, %v1796_v39, %v1795_v16 }
 0x2f7   : > { %v1836_v46 = vsel %vm1812_vm9, %v1797_v41, %v1835_v27 }
 0x2f9   : > { %v1630_v22 = vpop.xlane.xlu2 %1629 }
 0x2fa   : > { %v1798_v29 = vperm.slane %v1630_v22, %v3095_v57  ;;  %v1636_v53 = vpop.xlane.xlu1 %1635 }
 0x2fb   : > { %v1633_v14 = vpop.xlane.xlu0 %1632  ;;  %v1801_v8 = vperm.slane %v1636_v53, %v3095_v57 }
 0x2fc   : > { %v1799_v9 = vperm.slane %v1633_v14, %v3104_v62 }
 0x2fe   : > { %v1800_v33 = vsel %vm1709_vm4, %v1799_v9, %v1798_v29 }
 0x2ff   : > { %v1837_v30 = vsel %vm1814_vm10, %v1800_v33, %v1836_v46 }
 0x301   : > { %v1639_v18 = vpop.xlane.xlu2 %1638 }
 0x302   : > { %v1802_v17 = vperm.slane %v1639_v18, %v3104_v62 }
 0x304   : > { %v1803_v23 = vsel %vm1709_vm4, %v1802_v17, %v1801_v8 }
 0x305   : > { %v1838_v11 = vsel %vm1816_vm11, %v1803_v23, %v1837_v30 }
 0x306   : > { %1846 = vst.msk [vmem:[%s3182_s15 + $0x18] sm:$0xff] %vm337_vm2, %v1838_v11 }
 0x307 PF: > { %s15_s20 = sadd.s32 1, %s2024_s20   ;;  %s3317_s18 = smov %s2020_s19 }
 0x308   : > { %p12_p5 = scmp.ge.s32.totalorder %s15_s20, 4   ;;  %s3318_s19 = smov %s3320_s21 }
 0x30a   :  { %14 = sbr.rel (!%p12_p5) target bundleno = 2 (0x2), region = 70 }

// kernel: a_call__.3
= control target key start
LH: loop header
LB: loop body
LE: loop exit
PB: predicated region body
PF: predicated region fallthrough
CT: control target
= control target key end

     0   :  { %s2887_s18 = smov 0   ;;  %s2889_s19 = smov 0   ;;  %s4867_s0 = inlined_call_operand.vmem [shape: bf16[2,8,256], index: 0, kind: input, shape index: {}]   ;;  %s4868_s1 = inlined_call_operand.vmem [shape: bf16[16,8], index: 1, kind: input, shape index: {}]   ;;  %s4869_s2 = inlined_call_operand.vmem [shape: f32[16,1], index: 2, kind: input, shape index: {}]   ;;  %s4870_s3 = inlined_call_operand.vmem [shape: bf16[48,16], index: 3, kind: input, shape index: {}]   ;;  %s4871_s4 = inlined_call_operand.vmem [shape: f32[48,1], index: 4, kind: input, shape index: {}]   ;;  %s4872_s5 = inlined_call_operand.vmem [shape: f32[2,48,16], index: 5, kind: output, shape index: {}]  }
   0x1   :  { %s2891_s20 = smov 0  }
   0x2 LB: > { %s27_s21 = sadd.s32 1, %s2841_s19  ;;  %p2748_p0 = scmp.ge.s32.totalorder %s2845_s20, 1  ;;  %s2845_s20 = sphi %s2891_s20, %s15_s20   ;;  %s2841_s19 = sphi %s2889_s19, %s5064_s19   ;;  %s2837_s18 = sphi %s2887_s18, %s5063_s18  }
   0x3   : > { %p29_p1 = scmp.ge.s32.totalorder %s27_s21, 2  ;;  %p208_p2 = scmp.lt.s32.totalorder %s2845_s20, 3 }
   0x5   : > { %s5066_s21 = smov (%p29_p1, %s27_s21), 0  ;;  %p209_p3 = pnand %p2748_p0, %p208_p2 }
   0x7   : > { %212 = sbr.rel (%p209_p3) target bundleno = 936 (0x3a8), region = 40 }
   0xc   : > { %v265_v0 = vld [vmem:[%s4869_s2] sm:$0xff]  ;;  %p244_p4 = scmp.lt.s32.totalorder %s2837_s18, 1  ;;  %v2847_v1 = vmov 0   ;;  %v266_v5 = vld [vmem:[%s4869_s2 + $0x8] sm:$0xff]  ;;  %vm291_vm0 = vcmask 1043456   ;;  %vm287_vm1 = vcmask 64512  }
   0xd   : > { %2820 = vset.pattern.permute.xlu0 %v2847_v1  ;;  %2821 = vset.pattern.permute.xlu1 %v2847_v1  ;;  %v2779_v10 = vld [vmem:[%s4868_s1] sm:$0xff]  ;;  %v339_v13 = vld [vmem:[%s4871_s4 + $0x8] sm:$0xff]  ;;  %v340_v18 = vld [vmem:[%s4871_s4 + $0x10] sm:$0xff]  ;;  %vm389_vm2 = vcmask 130048   ;;  %s2848_s29 = smov 112   ;;  %s2849_s30 = smov 96  }
   0xe   : > { %269 = vperm.xlu0 %2820, %v265_v0   ;;  %s5068_s18 = smov (!%p244_p4, %s2837_s18), 1  ;;  %2822 = vset.pattern.permute.xlu2 %v2847_v1  ;;  %v342_v11 = vld [vmem:[%s4871_s4 + $0x20] sm:$0xff]  ;;  %v343_v15 = vld [vmem:[%s4871_s4 + $0x28] sm:$0xff]  ;;  %v341_v26 = vld [vmem:[%s4871_s4 + $0x18] sm:$0xff]  ;;  %s2850_s6 = smov 80   ;;  %vm724_vm3 = vcmask 1047556  }
   0xf   : > { %s2778_s24 = sshll.u32 %s5068_s18, 3  ;;  %v338_v12 = vld [vmem:[%s4871_s4] sm:$0xff]  ;;  %356 = vperm.xlu2 %2822, %v340_v18   ;;  %v2781_v34 = vld [vmem:[%s4870_s3 + $0x8] sm:$0xff]  ;;  %v2782_v35 = vld [vmem:[%s4870_s3 + $0x10] sm:$0xff]  ;;  %s2851_s7 = smov 64   ;;  %vm2457_vm4 = vcmask 130112  }
  0x10   : > { %s251_s27 = scalar_lea.vmem %s4867_s0, %s2778_s24  ;;  %346 = vperm.xlu1 %2821, %v338_v12   ;;  %v2780_v33 = vld [vmem:[%s4870_s3] sm:$0xff]  ;;  %s2852_s8 = smov 48   ;;  %v2855_v18 = vmov 1983009808   ;;  %vm2600_vm5 = vcmask 1041409   ;;  %vm2602_vm6 = vcmask 1042434  }
  0x11   : > { %v262_v2 = vld [vmem:[%s251_s27] sm:$0xff]  ;;  %s2853_s9 = smov 32   ;;  %s2854_s10 = smov 16   ;;  %vm2604_vm7 = vcmask 1043459   ;;  %vm2606_vm8 = vcmask 1044484   ;;  %vm2608_vm9 = vcmask 1045509  }
  0x12   : > { %v283_v3 = vunpack.c.l.b16 %v262_v2  ;;  %v284_v4 = vunpack.c.h.b16 %v262_v2  ;;  %s2785_s11 = smul.u32 48, %s5068_s18  ;;  %vm2610_vm10 = vcmask 1046534   ;;  %vm2612_vm11 = vcmask 1047559  }
  0x14   : > { %v285_v6 = vpack.c.b16 %v283_v3, %v283_v3  ;;  %v286_v7 = vpack.c.b16 %v284_v4, %v284_v4  ;;  %s4604_s13 = scalar_lea.vmem %s4872_s5, %s2785_s11 }
  0x16   : > { %274 = vperm.xlu0 %2820, %v266_v5   ;;  %v293_v8 = vsel %vm291_vm0, %v285_v6, 0  ;;  %v296_v9 = vsel %vm291_vm0, %v286_v7, 0 }
  0x17   : > { %305 = vmatpush.bf16.msra.mxu0 %v293_v8  ;;  %319 = vmatpush.bf16.msra.mxu1 %v296_v9 }
  0x18   : > { %351 = vperm.xlu1 %2821, %v339_v13   ;;  %361 = vperm.xlu2 %2822, %v341_v26  }
  0x1a   : > { %2756 = vmatmul.msk.bf16.vlgmr.msra.gmra.mxu0 %vm287_vm1, %v2779_v10  ;;  %2757 = vmatmul.msk.bf16.vlgmr.msra.gmra.mxu1 %vm287_vm1, %v2779_v10 }
  0x1e   : > { %366 = vperm.xlu0 %2820, %v342_v11  }
  0x20   : > { %371 = vperm.xlu1 %2821, %v343_v15  }
  0x69   : > { %v357_v40 = vpop.permute.xlu2 %356 }
  0x72   : > { %v3027_v57 = vpop.permute.xlu2 %361 }
  0x80   : > { %v270_v14 = vpop.permute.xlu0 %269 }
  0x82   : > { %v347_v36 = vpop.permute.xlu1 %346 }
  0x88   : > { %v275_v19 = vpop.permute.xlu0 %274 }
  0x8a   : > { %v352_v43 = vpop.permute.xlu1 %351 }
  0x90   : > { %v3065_v4 = vpop.permute.xlu0 %366 }
  0x92   : > { %v3058_v2 = vpop.permute.xlu1 %371 }
  0x97   : > { %v307_v16 = vpop.f32.mrf.mxu0  ;;  %v321_v17 = vpop.f32.mrf.mxu1 }
  0x98   : > { %v308_v20 = vadd.f32 %v307_v16, %v270_v14  ;;  %v322_v21 = vadd.f32 %v321_v17, %v270_v14 }
  0x9a   : > { %v326_v27 = vmax.f32 %v308_v20, 0.0  ;;  %v327_v28 = vmax.f32 %v322_v21, 0.0 }
  0x9f   : > { %v309_v22 = vpop.f32.mrf.mxu0  ;;  %v323_v23 = vpop.f32.mrf.mxu1 }
  0xa0   : > { %v310_v24 = vadd.f32 %v309_v22, %v275_v19  ;;  %v324_v25 = vadd.f32 %v323_v23, %v275_v19  ;;  %v729_v19 = vunpack.c.l.s4 %v2855_v18 }
  0xa2   : > { %v328_v29 = vmax.f32 %v310_v24, 0.0  ;;  %v329_v30 = vmax.f32 %v324_v25, 0.0  ;;  %v3125_v26 = vunpack.c.0.s8 %v729_v19 }
  0xa4   : > { %v330_v31 = vpack.c.bf16 %v328_v29, %v326_v27  ;;  %v331_v32 = vpack.c.bf16 %v329_v30, %v327_v28 }
  0xa6   : > { %406 = vmatpush.bf16.msrb.mxu0 %v330_v31  ;;  %2783 = vmatpush.bf16.msra.mxu2 %v330_v31 }
  0xa7   : > { %430 = vmatpush.bf16.msrb.mxu1 %v331_v32  ;;  %2784 = vmatpush.bf16.msra.mxu3 %v331_v32 }
  0xa9   : > { %2770 = vmatmul.msk.bf16.vlgmr.msrb.gmra.mxu0 %vm389_vm2, %v2780_v33  ;;  %2771 = vmatmul.msk.bf16.vlgmr.msra.gmra.mxu2 %vm389_vm2, %v2781_v34 }
  0xaa   : > { %2774 = vmatmul.msk.bf16.vlgmr.msra.gmra.mxu3 %vm389_vm2, %v2781_v34  ;;  %2773 = vmatmul.msk.bf16.vlgmr.msrb.gmra.mxu1 %vm389_vm2, %v2780_v33 }
  0xb9   : > { %2772 = vmatmul.msk.bf16.gmra.mxu2 %vm389_vm2, %v2782_v35 }
  0xba   : > { %2775 = vmatmul.msk.bf16.gmra.mxu3 %vm389_vm2, %v2782_v35 }
 0x126   : > { %v408_v37 = vpop.f32.mrf.mxu0 }
 0x127   : > { %v409_v38 = vadd.f32 %v408_v37, %v347_v36  ;;  %v432_v48 = vpop.f32.mrf.mxu1 }
 0x128   : > { %v433_v49 = vadd.f32 %v432_v48, %v347_v36 }
 0x129   : > { %v2953_v39 = vmax.f32 %v409_v38, 0.0 }
 0x12a   : > { %v2997_v50 = vmax.f32 %v433_v49, 0.0 }
 0x12b   : > { %465 = vrot.lane.b32.xlu2 %v2953_v39, %s2848_s29 }
 0x12c   : > { %v413_v41 = vpop.f32.mrf.mxu2 }
 0x12d   : > { %v414_v42 = vadd.f32 %v413_v41, %v357_v40  ;;  %v437_v51 = vpop.f32.mrf.mxu3 }
 0x12e   : > { %v410_v44 = vpop.f32.mrf.mxu0  ;;  %v438_v53 = vadd.f32 %v437_v51, %v357_v40  ;;  %v726_v51 = vrot.slane %v2953_v39, 4 }
 0x12f   : > { %v2957_v45 = vmax.f32 %v414_v42, 0.0  ;;  %v411_v46 = vadd.f32 %v410_v44, %v352_v43  ;;  %v434_v52 = vpop.f32.mrf.mxu1 }
 0x130   : > { %v435_v54 = vadd.f32 %v434_v52, %v352_v43  ;;  %v3005_v55 = vmax.f32 %v438_v53, 0.0 }
 0x131   : > { %v2959_v47 = vmax.f32 %v411_v46, 0.0  ;;  %469 = vrot.lane.b32.xlu1 %v2957_v45, %s2848_s29 }
 0x132   : > { %4915 = vst [vmem:[#allocation2_spill] sm:$0xff] %v3005_v55  ;;  %v3007_v56 = vmax.f32 %v435_v54, 0.0 }
 0x133   : > { %467 = vrot.lane.b32.xlu0 %v2959_v47, %s2848_s29  ;;  %483 = vrot.lane.b32.xlu2 %v2953_v39, %s2849_s30  ;;  %v950_v28 = vrot.slane %v2959_v47, 4 }
 0x134   : > { %4916 = vst [vmem:[#allocation3_spill] sm:$0xff] %v3007_v56  ;;  %v415_v58 = vpop.f32.mrf.mxu2 }
 0x135   : > { %v416_v62 = vadd.f32 %v415_v58, %v3027_v57  ;;  %v439_v22 = vpop.f32.mrf.mxu3 }
 0x136   : > { %v440_v38 = vadd.f32 %v439_v22, %v3027_v57  ;;  %v2856_v22 = vmov 1934713408  }
 0x137   : > { %v3054_v1 = vmax.f32 %v416_v62, 0.0 }
 0x138   : > { %v3166_v43 = vmax.f32 %v440_v38, 0.0 }
 0x139   : > { %487 = vrot.lane.b32.xlu1 %v2957_v45, %s2849_s30 }
 0x13b   : > { %485 = vrot.lane.b32.xlu0 %v2959_v47, %s2849_s30  ;;  %501 = vrot.lane.b32.xlu2 %v2953_v39, %s2850_s6 }
 0x13c   : > { %v418_v61 = vpop.f32.mrf.mxu2 }
 0x13d   : > { %v419_v5 = vadd.f32 %v418_v61, %v3065_v4  ;;  %v442_v34 = vpop.f32.mrf.mxu3 }
 0x13e   : > { %v443_v49 = vadd.f32 %v442_v34, %v3065_v4 }
 0x13f   : > { %v3072_v8 = vmax.f32 %v419_v5, 0.0 }
 0x141   : > { %505 = vrot.lane.b32.xlu1 %v2957_v45, %s2850_s6  ;;  %4918 = vst [vmem:[#allocation5_spill] sm:$0xff] %v3072_v8 }
 0x143   : > { %503 = vrot.lane.b32.xlu0 %v2959_v47, %s2850_s6  ;;  %519 = vrot.lane.b32.xlu2 %v2953_v39, %s2851_s7 }
 0x144   : > { %v420_v0 = vpop.f32.mrf.mxu2 }
 0x145   : > { %v421_v3 = vadd.f32 %v420_v0, %v3058_v2  ;;  %v444_v42 = vpop.f32.mrf.mxu3 }
 0x146   : > { %v445_v44 = vadd.f32 %v444_v42, %v3058_v2 }
 0x147   : > { %v3070_v7 = vmax.f32 %v421_v3, 0.0  ;;  %v3195_v3 = vmax.f32 %v443_v49, 0.0 }
 0x148   : > { %v3186_v58 = vmax.f32 %v445_v44, 0.0 }
 0x149   : > { %523 = vrot.lane.b32.xlu1 %v2957_v45, %s2851_s7  ;;  %4917 = vst [vmem:[#allocation4_spill] sm:$0xff] %v3070_v7 }
 0x14a   : > { %4919 = vst [vmem:[#allocation6_spill] sm:$0xff] %v3186_v58 }
 0x14b   : > { %521 = vrot.lane.b32.xlu0 %v2959_v47, %s2851_s7  ;;  %537 = vrot.lane.b32.xlu2 %v2953_v39, %s2852_s8  ;;  %4920 = vst [vmem:[#allocation7_spill] sm:$0xff] %v3195_v3 }
 0x151   : > { %541 = vrot.lane.b32.xlu1 %v2957_v45, %s2852_s8 }
 0x153   : > { %539 = vrot.lane.b32.xlu0 %v2959_v47, %s2852_s8  ;;  %555 = vrot.lane.b32.xlu2 %v2953_v39, %s2853_s9 }
 0x159   : > { %559 = vrot.lane.b32.xlu1 %v2957_v45, %s2853_s9 }
 0x15b   : > { %557 = vrot.lane.b32.xlu0 %v2959_v47, %s2853_s9  ;;  %573 = vrot.lane.b32.xlu2 %v2953_v39, %s2854_s10 }
 0x161   : > { %577 = vrot.lane.b32.xlu1 %v2957_v45, %s2854_s10 }
 0x163   : > { %575 = vrot.lane.b32.xlu0 %v2959_v47, %s2854_s10  ;;  %597 = vrot.lane.b32.xlu2 %v2997_v50, %s2848_s29 }
 0x169   : > { %601 = vrot.lane.b32.xlu1 %v3005_v55, %s2848_s29 }
 0x16b   : > { %599 = vrot.lane.b32.xlu0 %v3007_v56, %s2848_s29  ;;  %615 = vrot.lane.b32.xlu2 %v2997_v50, %s2849_s30 }
 0x171   : > { %619 = vrot.lane.b32.xlu1 %v3005_v55, %s2849_s30 }
 0x173   : > { %617 = vrot.lane.b32.xlu0 %v3007_v56, %s2849_s30  ;;  %633 = vrot.lane.b32.xlu2 %v2997_v50, %s2850_s6 }
 0x179   : > { %637 = vrot.lane.b32.xlu1 %v3005_v55, %s2850_s6 }
 0x17b   : > { %635 = vrot.lane.b32.xlu0 %v3007_v56, %s2850_s6  ;;  %651 = vrot.lane.b32.xlu2 %v2997_v50, %s2851_s7 }
 0x181   : > { %655 = vrot.lane.b32.xlu1 %v3005_v55, %s2851_s7 }
 0x183   : > { %653 = vrot.lane.b32.xlu0 %v3007_v56, %s2851_s7  ;;  %669 = vrot.lane.b32.xlu2 %v2997_v50, %s2852_s8 }
 0x185   : > { %v3035_v59 = vpop.permute.xlu2 %465 }
 0x186   : > { %v738_v54 = vrot.slane %v3035_v59, 4 }
 0x189   : > { %673 = vrot.lane.b32.xlu1 %v3005_v55, %s2852_s8 }
 0x18b   : > { %671 = vrot.lane.b32.xlu0 %v3007_v56, %s2852_s8  ;;  %687 = vrot.lane.b32.xlu2 %v2997_v50, %s2853_s9 }
 0x18d   : > { %v3043_v60 = vpop.permute.xlu2 %483 }
 0x18e   : > { %v723_v48 = vrot.slane %v3043_v60, 4  ;;  %v727_v61 = vsel %vm724_vm3, %v3043_v60, %v726_v51 }
 0x18f   : > { %v735_v60 = vperm.slane %v727_v61, %v3125_v26 }
 0x190   : > { %v725_v0 = vsel %vm724_vm3, %v723_v48, %v2953_v39 }
 0x191   : > { %691 = vrot.lane.b32.xlu1 %v3005_v55, %s2853_s9  ;;  %v3206_v39 = vperm.slane %v725_v0, %v3125_v26  ;;  %v786_v42 = vrot.slane %v735_v60, 4 }
 0x193   : > { %689 = vrot.lane.b32.xlu0 %v3007_v56, %s2853_s9  ;;  %705 = vrot.lane.b32.xlu2 %v2997_v50, %s2854_s10  ;;  %v774_v51 = vrot.slane %v3206_v39, 4 }
 0x195   : > { %v3052_v63 = vpop.permute.xlu2 %501 }
 0x196   : > { %v736_v57 = vrot.slane %v3052_v63, 4  ;;  %v739_v2 = vsel %vm724_vm3, %v3052_v63, %v738_v54 }
 0x197   : > { %v747_v63 = vperm.slane %v739_v2, %v3125_v26 }
 0x198   : > { %v737_v18 = vsel %vm724_vm3, %v736_v57, %v3035_v59 }
 0x199   : > { %709 = vrot.lane.b32.xlu1 %v3005_v55, %s2854_s10  ;;  %v784_v54 = vrot.slane %v747_v63, 4 }
 0x19b   : > { %707 = vrot.lane.b32.xlu0 %v3007_v56, %s2854_s10  ;;  %471 = vrot.lane.b32.xlu2 %v3054_v1, %s2848_s29 }
 0x19d   : > { %v3068_v6 = vpop.permute.xlu2 %519 }
 0x1a1   : > { %475 = vrot.lane.b32.xlu1 %v3070_v7, %s2848_s29 }
 0x1a3   : > { %v3076_v9 = vpop.permute.xlu1 %469  ;;  %473 = vrot.lane.b32.xlu0 %v3072_v8, %s2848_s29  ;;  %489 = vrot.lane.b32.xlu2 %v3054_v1, %s2849_s30 }
 0x1a5   : > { %v3082_v10 = vpop.permute.xlu0 %467  ;;  %v3084_v11 = vpop.permute.xlu2 %537 }
 0x1a6   : > { %v962_v20 = vrot.slane %v3082_v10, 4 }
 0x1a9   : > { %493 = vrot.lane.b32.xlu1 %v3070_v7, %s2849_s30 }
 0x1ab   : > { %v3088_v12 = vpop.permute.xlu1 %487  ;;  %491 = vrot.lane.b32.xlu0 %v3072_v8, %s2849_s30  ;;  %507 = vrot.lane.b32.xlu2 %v3054_v1, %s2850_s6 }
 0x1ad   : > { %v3094_v13 = vpop.permute.xlu0 %485  ;;  %v3096_v14 = vpop.permute.xlu2 %555 }
 0x1ae   : > { %v951_v29 = vsel %vm724_vm3, %v3094_v13, %v950_v28  ;;  %v743_v28 = vperm.slane %v737_v18, %v3125_v26  ;;  %v748_v57 = vrot.slane %v3096_v14, 4 }
 0x1af   : > { %v3147_v35 = vperm.slane %v951_v29, %v3125_v26  ;;  %v1174_v29 = vrot.slane %v2957_v45, 4 }
 0x1b1   : > { %511 = vrot.lane.b32.xlu1 %v3070_v7, %s2850_s6 }
 0x1b3   : > { %v3100_v15 = vpop.permute.xlu1 %505  ;;  %509 = vrot.lane.b32.xlu0 %v3072_v8, %s2850_s6  ;;  %525 = vrot.lane.b32.xlu2 %v3054_v1, %s2851_s7 }
 0x1b5   : > { %v3106_v16 = vpop.permute.xlu0 %503  ;;  %v3108_v17 = vpop.permute.xlu2 %573 }
 0x1b6   : > { %v963_v23 = vsel %vm724_vm3, %v3106_v16, %v962_v20  ;;  %v760_v0 = vrot.slane %v3108_v17, 4 }
 0x1b7   : > { %v3128_v27 = vperm.slane %v963_v23, %v3125_v26  ;;  %v777_v23 = vunpack.c.l.s4 %v2856_v22  ;;  %v775_v22 = vsel %vm724_vm3, %v743_v28, %v774_v51 }
 0x1b9   : > { %529 = vrot.lane.b32.xlu1 %v3070_v7, %s2851_s7  ;;  %v1008_v31 = vrot.slane %v3128_v27, 4  ;;  %v3230_v61 = vunpack.c.0.s8 %v777_v23  ;;  %v750_v23 = vrot.slane %v3068_v6, 4 }
 0x1bb   : > { %v3113_v21 = vpop.permute.xlu1 %523  ;;  %527 = vrot.lane.b32.xlu0 %v3072_v8, %s2851_s7  ;;  %543 = vrot.lane.b32.xlu2 %v3054_v1, %s2852_s8  ;;  %v3151_v36 = vsel %vm724_vm3, %v1008_v31, %v3147_v35  ;;  %v749_v31 = vsel %vm724_vm3, %v748_v57, %v3068_v6  ;;  %v3262_v6 = vperm.slane %v775_v22, %v3230_v61  ;;  %v1186_v57 = vrot.slane %v3076_v9, 4 }
 0x1bd   : > { %v3121_v24 = vpop.permute.xlu0 %521  ;;  %v3123_v25 = vpop.permute.xlu2 %597 }
 0x1be   : > { %v974_v62 = vrot.slane %v3121_v24, 4 }
 0x1c1   : > { %547 = vrot.lane.b32.xlu1 %v3070_v7, %s2852_s8 }
 0x1c3   : > { %v3135_v30 = vpop.permute.xlu1 %541  ;;  %545 = vrot.lane.b32.xlu0 %v3072_v8, %s2852_s8  ;;  %561 = vrot.lane.b32.xlu2 %v3054_v1, %s2853_s9 }
 0x1c5   : > { %v3142_v32 = vpop.permute.xlu0 %539  ;;  %v3144_v33 = vpop.permute.xlu2 %615 }
 0x1c6   : > { %v986_v4 = vrot.slane %v3142_v32, 4 }
 0x1c9   : > { %565 = vrot.lane.b32.xlu1 %v3070_v7, %s2853_s9 }
 0x1cb   : > { %v3155_v37 = vpop.permute.xlu1 %559  ;;  %563 = vrot.lane.b32.xlu0 %v3072_v8, %s2853_s9  ;;  %579 = vrot.lane.b32.xlu2 %v3054_v1, %s2854_s10 }
 0x1cd   : > { %v3162_v40 = vpop.permute.xlu0 %557  ;;  %v3164_v41 = vpop.permute.xlu2 %633 }
 0x1ce   : > { %v975_v5 = vsel %vm724_vm3, %v3162_v40, %v974_v62  ;;  %v762_v62 = vrot.slane %v3084_v11, 4 }
 0x1cf   : > { %v983_v59 = vperm.slane %v975_v5, %v3125_v26 }
 0x1d0   : > { %v763_v48 = vsel %vm724_vm3, %v3108_v17, %v762_v62  ;;  %v751_v17 = vsel %vm724_vm3, %v3096_v14, %v750_v23  ;;  %v1172_v62 = vrot.slane %v3088_v12, 4  ;;  %v3284_v23 = vperm.slane %v3151_v36, %v3230_v61 }
 0x1d1   : > { %583 = vrot.lane.b32.xlu1 %v3070_v7, %s2854_s10  ;;  %v1034_v2 = vrot.slane %v983_v59, 4  ;;  %v759_v22 = vperm.slane %v751_v17, %v3125_v26 }
 0x1d3   : > { %v3171_v46 = vpop.permute.xlu1 %577  ;;  %581 = vrot.lane.b32.xlu0 %v3072_v8, %s2854_s10  ;;  %603 = vrot.lane.b32.xlu2 %v3166_v43, %s2848_s29 }
 0x1d5   : > { %v3180_v52 = vpop.permute.xlu0 %575  ;;  %v3182_v53 = vpop.permute.xlu2 %651 }
 0x1d6   : > { %v987_v19 = vsel %vm724_vm3, %v3180_v52, %v986_v4  ;;  %v787_v4 = vsel %vm724_vm3, %v747_v63, %v786_v42  ;;  %v772_v42 = vrot.slane %v743_v28, 4  ;;  %v761_v28 = vsel %vm724_vm3, %v760_v0, %v3084_v11 }
 0x1d7   : > { %v995_v44 = vperm.slane %v987_v19, %v3125_v26  ;;  %v3255_v51 = vperm.slane %v787_v4, %v3230_v61  ;;  %v1175_v11 = vsel %vm724_vm3, %v3088_v12, %v1174_v29  ;;  %v948_v0 = vrot.slane %v3094_v13, 4 }
 0x1d8   : > { %v1184_v19 = vrot.slane %v3100_v15, 4  ;;  %v960_v12 = vrot.slane %v3106_v16, 4  ;;  %v773_v13 = vsel %vm724_vm3, %v772_v42, %v3206_v39  ;;  %v3294_v29 = vperm.slane %v1175_v11, %v3125_v26 }
 0x1d9   : > { %607 = vrot.lane.b32.xlu1 %v3186_v58, %s2848_s29  ;;  %v1035_v63 = vsel %vm724_vm3, %v995_v44, %v1034_v2  ;;  %v1032_v5 = vrot.slane %v995_v44, 4  ;;  %v785_v44 = vsel %vm724_vm3, %v784_v54, %v735_v60  ;;  %v771_v2 = vperm.slane %v763_v48, %v3125_v26 }
 0x1da   : > { %v3273_v14 = vperm.slane %v1035_v63, %v3230_v61  ;;  %v1010_v60 = vrot.slane %v3147_v35, 4  ;;  %v755_v54 = vperm.slane %v749_v31, %v3125_v26  ;;  %v767_v48 = vperm.slane %v761_v28, %v3125_v26 }
 0x1db   : > { %v3211_v20 = vpop.permute.xlu1 %601  ;;  %605 = vrot.lane.b32.xlu0 %v3195_v3, %s2848_s29  ;;  %621 = vrot.lane.b32.xlu2 %v3166_v43, %s2849_s30  ;;  %v1033_v63 = vsel %vm724_vm3, %v1032_v5, %v983_v59  ;;  %v1187_v31 = vsel %vm724_vm3, %v3100_v15, %v1186_v57  ;;  %v808_v36 = vrot.slane %v771_v2, 4  ;;  %v1173_v16 = vsel %vm724_vm3, %v1172_v62, %v2957_v45 }
 0x1dc   : > { %4921 = vst [vmem:[#allocation8_spill] sm:$0xff] %v3211_v20  ;;  %v1011_v35 = vsel %vm724_vm3, %v3128_v27, %v1010_v60  ;;  %v1056_v59 = vrot.slane %v3273_v14, 4  ;;  %v949_v39 = vsel %vm724_vm3, %v948_v0, %v2959_v47  ;;  %v798_v5 = vrot.slane %v755_v54, 4 }
 0x1dd   : > { %v3221_v34 = vpop.permute.xlu0 %599  ;;  %v3223_v38 = vpop.permute.xlu2 %669  ;;  %4925 = vst [vmem:[#allocation12_spill] sm:$0xff] %v3273_v14  ;;  %v3306_v27 = vperm.slane %v1033_v63, %v3230_v61  ;;  %v810_v42 = vrot.slane %v759_v22, 4  ;;  %v796_v17 = vrot.slane %v767_v48, 4  ;;  %v3315_v15 = vperm.slane %v1011_v35, %v3230_v61 }
 0x1de   : > { %4922 = vst [vmem:[#allocation9_spill] sm:$0xff] %v3221_v34  ;;  %v1054_v45 = vrot.slane %v3284_v23, 4  ;;  %v1185_v47 = vsel %vm724_vm3, %v1184_v19, %v3076_v9  ;;  %v3321_v57 = vperm.slane %v1187_v31, %v3125_v26  ;;  %v961_v62 = vsel %vm724_vm3, %v960_v12, %v3082_v10 }
 0x1df   : > { %v799_v11 = vsel %vm724_vm3, %v767_v48, %v798_v5  ;;  %v811_v63 = vsel %vm724_vm3, %v771_v2, %v810_v42  ;;  %v809_v35 = vsel %vm724_vm3, %v808_v36, %v759_v22  ;;  %v3338_v9 = vsel %vm724_vm3, %v1056_v59, %v3315_v15 }
 0x1e0   : > { %v3334_v18 = vsel %vm724_vm3, %v3306_v27, %v1054_v45  ;;  %4929 = vst [vmem:[#allocation16_spill] sm:$0xff] %v3338_v9  ;;  %v1179_v10 = vperm.slane %v1173_v16, %v3125_v26  ;;  %v1234_v19 = vrot.slane %v3294_v29, 4  ;;  %v779_v48 = vperm.slane %v773_v13, %v3230_v61 }
 0x1e1   : > { %625 = vrot.lane.b32.xlu1 %v3186_v58, %s2849_s30  ;;  %4928 = vst [vmem:[#allocation15_spill] sm:$0xff] %v3334_v18  ;;  %v791_v12 = vperm.slane %v785_v44, %v3230_v61  ;;  %v3345_v2 = vperm.slane %v949_v39, %v3125_v26  ;;  %v1191_v22 = vperm.slane %v1185_v47, %v3125_v26  ;;  %v834_v44 = vrot.slane %v3255_v51, 4 }
 0x1e2   : > { %v797_v31 = vsel %vm724_vm3, %v796_v17, %v755_v54  ;;  %v807_v36 = vperm.slane %v799_v11, %v3230_v61  ;;  %v3351_v59 = vperm.slane %v961_v62, %v3125_v26  ;;  %v819_v5 = vperm.slane %v811_v63, %v3230_v61 }
 0x1e3   : > { %v3248_v55 = vpop.permute.xlu1 %619  ;;  %623 = vrot.lane.b32.xlu0 %v3195_v3, %s2849_s30  ;;  %639 = vrot.lane.b32.xlu2 %v3166_v43, %s2850_s6  ;;  %4930 = vst [vmem:[#allocation17_spill] sm:$0xff] %v3345_v2  ;;  %v815_v13 = vperm.slane %v809_v35, %v3230_v61  ;;  %v826_v39 = vrot.slane %v3262_v6, 4  ;;  %v1235_v42 = vsel %vm724_vm3, %v3321_v57, %v1234_v19  ;;  %v1222_v17 = vrot.slane %v1179_v10, 4 }
 0x1e4   : > { %4923 = vst [vmem:[#allocation10_spill] sm:$0xff] %v3248_v55  ;;  %v803_v45 = vperm.slane %v797_v31, %v3230_v61  ;;  %v822_v47 = vrot.slane %v779_v48, 4  ;;  %v830_v62 = vrot.slane %v791_v12, 4  ;;  %v1220_v63 = vrot.slane %v1191_v22, 4 }
 0x1e5   : > { %v3268_v49 = vpop.permute.xlu0 %617  ;;  %v3270_v4 = vpop.permute.xlu2 %687  ;;  %4931 = vst [vmem:[#allocation18_spill] sm:$0xff] %v3351_v59  ;;  %v1232_v35 = vrot.slane %v3321_v57, 4  ;;  %v824_v54 = vrot.slane %v807_v36, 4  ;;  %v996_v19 = vrot.slane %v3351_v59, 4  ;;  %v835_v31 = vsel %vm724_vm3, %v819_v5, %v834_v44 }
 0x1e6   : > { %4924 = vst [vmem:[#allocation11_spill] sm:$0xff] %v3268_v49  ;;  %v828_v9 = vrot.slane %v815_v13, 4  ;;  %v3375_v18 = vperm.slane %v1235_v42, %v3230_v61  ;;  %v836_v11 = vrot.slane %v3144_v33, 4  ;;  %v827_v14 = vsel %vm724_vm3, %v807_v36, %v826_v39 }
 0x1e7   : > { %v831_v8 = vsel %vm724_vm3, %v815_v13, %v830_v62  ;;  %v832_v7 = vrot.slane %v819_v5, 4  ;;  %v850_v59 = vrot.slane %v3123_v25, 4  ;;  %v820_v44 = vrot.slane %v803_v45, 4 }
 0x1e8   : > { %4933 = vst [vmem:[#allocation20_spill] sm:$0xff] %v3375_v18  ;;  %v823_v55 = vsel %vm724_vm3, %v803_v45, %v822_v47  ;;  %v848_v42 = vrot.slane %v3164_v41, 4  ;;  %v3389_v20 = vsel %vm389_vm2, %v835_v31, -inf  ;;  %v1221_v36 = vsel %vm724_vm3, %v1220_v63, %v1179_v10 }
 0x1e9   : > { %643 = vrot.lane.b32.xlu1 %v3186_v58, %s2850_s6  ;;  %v4935_v13 = vrot.slane %v2997_v50, 4  ;;  %v3399_v39 = vsel %vm389_vm2, %v827_v14, -inf  ;;  %v3402_v45 = vsel %vm389_vm2, %v831_v8, -inf  ;;  %v829_v47 = vsel %vm724_vm3, %v828_v9, %v791_v12 }
 0x1ea   : > { %4936 = vst [vmem:[#allocation22_spill] sm:$0xff] %v3399_v39  ;;  %v837_v62 = vsel %vm724_vm3, %v836_v11, %v2997_v50  ;;  %v3412_v10 = vsel %vm389_vm2, %v823_v55, -inf  ;;  %v821_v8 = vsel %vm724_vm3, %v820_v44, %v779_v48  ;;  %v3421_v9 = vperm.slane %v1221_v36, %v3230_v61 }
 0x1eb   : > { %v3308_v28 = vpop.permute.xlu1 %637  ;;  %641 = vrot.lane.b32.xlu0 %v3195_v3, %s2850_s6  ;;  %657 = vrot.lane.b32.xlu2 %v3166_v43, %s2851_s7  ;;  %v839_v5 = vsel %vm724_vm3, %v3144_v33, %v4935_v13  ;;  %4937 = vst [vmem:[#allocation23_spill] sm:$0xff] %v3402_v45  ;;  %v833_v33 = vsel %vm724_vm3, %v832_v7, %v3255_v51  ;;  %v3434_v7 = vsel %vm389_vm2, %v829_v47, -inf  ;;  %v3450_v31 = vsel %vm389_vm2, %v821_v8, -inf }
 0x1ec   : > { %4926 = vst [vmem:[#allocation13_spill] sm:$0xff] %v3308_v28  ;;  %v1198_v28 = vrot.slane %v3113_v21, 4  ;;  %v1223_v50 = vsel %vm724_vm3, %v1191_v22, %v1222_v17  ;;  %v849_v12 = vsel %vm724_vm3, %v848_v42, %v3123_v25  ;;  %v1233_v51 = vsel %vm724_vm3, %v1232_v35, %v3294_v29 }
 0x1ed   : > { %v3326_v0 = vpop.permute.xlu0 %635  ;;  %v3328_v60 = vpop.permute.xlu2 %705  ;;  %4938 = vst [vmem:[#allocation24_spill] sm:$0xff] %v3421_v9  ;;  %v843_v48 = vperm.slane %v837_v62, %v3125_v26  ;;  %v3441_v25 = vsel %vm389_vm2, %v833_v33, -inf  ;;  %v855_v35 = vperm.slane %v849_v12, %v3125_v26  ;;  %v3456_v44 = vperm.slane %v1223_v50, %v3230_v61 }
 0x1ee   : > { %4927 = vst [vmem:[#allocation14_spill] sm:$0xff] %v3326_v0  ;;  %v1199_v17 = vsel %vm724_vm3, %v3155_v37, %v1198_v28  ;;  %v997_v36 = vsel %vm724_vm3, %v996_v19, %v3345_v2  ;;  %v972_v33 = vrot.slane %v3162_v40, 4  ;;  %v1208_v8 = vrot.slane %v3171_v46, 4 }
 0x1ef   : > { %4940 = vst [vmem:[#allocation26_spill] sm:$0xff] %v3434_v7  ;;  %v886_v13 = vrot.slane %v843_v48, 4  ;;  %v4945_v50 = vrot.slane %v3054_v1, 4  ;;  %v884_v12 = vrot.slane %v855_v35, 4  ;;  %v1074_v29 = vrot.slane %v3221_v34, 4 }
 0x1f0   : > { %4941 = vst [vmem:[#allocation27_spill] sm:$0xff] %v3441_v25 }
 0x1f1   : > { %661 = vrot.lane.b32.xlu1 %v3186_v58, %s2851_s7  ;;  %4942 = vst [vmem:[#allocation28_spill] sm:$0xff] %v3456_v44 }
 0x1f3   : > { %v3366_v16 = vpop.permute.xlu1 %655  ;;  %659 = vrot.lane.b32.xlu0 %v3195_v3, %s2851_s7  ;;  %675 = vrot.lane.b32.xlu2 %v3166_v43, %s2852_s8 }
 0x1f4   : > { %4932 = vst [vmem:[#allocation19_spill] sm:$0xff] %v3366_v16 }
 0x1f5   : > { %v3378_v57 = vpop.permute.xlu0 %653  ;;  %v3380_v16 = vpop.permute.xlu2 %471 }
 0x1f6   : > { %4934 = vst [vmem:[#allocation21_spill] sm:$0xff] %v3378_v57  ;;  %v825_v57 = vsel %vm724_vm3, %v824_v54, %v3262_v6  ;;  %v851_v6 = vsel %vm724_vm3, %v3164_v41, %v850_v59  ;;  %v847_v41 = vperm.slane %v839_v5, %v3125_v26  ;;  %v1052_v59 = vrot.slane %v3306_v27, 4 }
 0x1f7   : > { %v3418_v14 = vsel %vm389_vm2, %v825_v57, -inf  ;;  %v859_v22 = vperm.slane %v851_v6, %v3125_v26  ;;  %v1196_v54 = vrot.slane %v3155_v37, 4  ;;  %v3459_v27 = vperm.slane %v1233_v51, %v3230_v61 }
 0x1f8   : > { %v1210_v37 = vrot.slane %v3135_v30, 4  ;;  %v898_v28 = vrot.slane %v847_v41, 4  ;;  %v3466_v5 = vperm.slane %v1199_v17, %v3125_v26  ;;  %v3470_v62 = vsel %vm724_vm3, %v1052_v59, %v3284_v23 }
 0x1f9   : > { %679 = vrot.lane.b32.xlu1 %v3186_v58, %s2852_s8  ;;  %4943 = vst [vmem:[#allocation29_spill] sm:$0xff] %v3459_v27  ;;  %v896_v47 = vrot.slane %v859_v22, 4  ;;  %v1197_v6 = vsel %vm724_vm3, %v1196_v54, %v3113_v21  ;;  %v887_v17 = vsel %vm724_vm3, %v855_v35, %v886_v13  ;;  %v1209_v59 = vsel %vm724_vm3, %v1208_v8, %v3135_v30 }
 0x1fa   : > { %4944 = vst [vmem:[#allocation30_spill] sm:$0xff] %v3470_v62  ;;  %v899_v51 = vsel %vm724_vm3, %v859_v22, %v898_v28  ;;  %v1211_v21 = vsel %vm724_vm3, %v3171_v46, %v1210_v37  ;;  %v3494_v22 = vperm.slane %v997_v36, %v3230_v61  ;;  %v3497_v28 = vperm.slane %v1197_v6, %v3125_v26 }
 0x1fb   : > { %v3427_v55 = vpop.permute.xlu1 %673  ;;  %677 = vrot.lane.b32.xlu0 %v3195_v3, %s2852_s8  ;;  %693 = vrot.lane.b32.xlu2 %v3166_v43, %s2853_s9  ;;  %v973_v37 = vsel %vm724_vm3, %v972_v33, %v3121_v24  ;;  %v1410_v35 = vrot.slane %v3380_v16, 4  ;;  %v3510_v6 = vperm.slane %v899_v51, %v3230_v61  ;;  %v3513_v42 = vperm.slane %v1211_v21, %v3125_v26 }
 0x1fc   : > { %4939 = vst [vmem:[#allocation25_spill] sm:$0xff] %v3427_v55  ;;  %v885_v23 = vsel %vm724_vm3, %v884_v12, %v843_v48  ;;  %v984_v24 = vrot.slane %v3180_v52, 4  ;;  %v1215_v8 = vperm.slane %v1209_v59, %v3125_v26  ;;  %v1246_v52 = vrot.slane %v3497_v28, 4 }
 0x1fd   : > { %v3447_v11 = vpop.permute.xlu0 %671  ;;  %v490_v63 = vpop.permute.xlu2 %489  ;;  %4947 = vst [vmem:[#allocation32_spill] sm:$0xff] %v3494_v22  ;;  %v3535_v21 = vperm.slane %v973_v37, %v3125_v26  ;;  %v4953_v62 = vrot.slane %v3007_v56, 4  ;;  %v860_v27 = vrot.slane %v3270_v4, 4  ;;  %v1075_v22 = vsel %vm724_vm3, %v3326_v0, %v1074_v29 }
 0x1fe   : > { %v1399_v19 = vsel %vm724_vm3, %v490_v63, %v4945_v50  ;;  %v1396_v40 = vrot.slane %v490_v63, 4  ;;  %v1258_v50 = vrot.slane %v3466_v5, 4  ;;  %v897_v63 = vsel %vm724_vm3, %v896_v47, %v847_v41  ;;  %4948 = vst [vmem:[#allocation33_spill] sm:$0xff] %v3510_v6 }
 0x1ff   : > { %v3501_v46 = vperm.slane %v1399_v19, %v3125_v26  ;;  %v3517_v41 = vperm.slane %v887_v17, %v3230_v61  ;;  %v3524_v33 = vperm.slane %v897_v63, %v3230_v61  ;;  %4951 = vst [vmem:[#allocation36_spill] sm:$0xff] %v3535_v21  ;;  %v872_v17 = vrot.slane %v3328_v60, 4  ;;  %v4954_v21 = vld [vmem:[#allocation21_spill] sm:$0xff] }
 0x200   : > { %v1397_v30 = vsel %vm724_vm3, %v1396_v40, %v3054_v1  ;;  %v862_v40 = vrot.slane %v3182_v53, 4  ;;  %v1259_v37 = vsel %vm724_vm3, %v3513_v42, %v1258_v50  ;;  %v4970_v55 = vrot.slane %v3510_v6, 4 }
 0x201   : > { %697 = vrot.lane.b32.xlu1 %v3186_v58, %s2853_s9  ;;  %4949 = vst [vmem:[#allocation34_spill] sm:$0xff] %v3517_v41  ;;  %v1458_v51 = vrot.slane %v3501_v46, 4 }
 0x202   : > { %4950 = vst [vmem:[#allocation35_spill] sm:$0xff] %v3524_v33  ;;  %v863_v34 = vsel %vm724_vm3, %v3270_v4, %v862_v40 }
 0x203   : > { %v3486_v54 = vpop.permute.xlu1 %691  ;;  %695 = vrot.lane.b32.xlu0 %v3195_v3, %s2853_s9  ;;  %711 = vrot.lane.b32.xlu2 %v3166_v43, %s2854_s10 }
 0x204   : > { %4946 = vst [vmem:[#allocation31_spill] sm:$0xff] %v3486_v54 }
 0x205   : > { %v690_v36 = vpop.permute.xlu0 %689  ;;  %v508_v13 = vpop.permute.xlu2 %507 }
 0x206   : > { %v1408_v19 = vrot.slane %v508_v13, 4  ;;  %v1411_v47 = vsel %vm724_vm3, %v508_v13, %v1410_v35  ;;  %v985_v35 = vsel %vm724_vm3, %v984_v24, %v3142_v32  ;;  %v874_v32 = vrot.slane %v3223_v38, 4 }
 0x207   : > { %v3531_v12 = vperm.slane %v1411_v47, %v3125_v26  ;;  %v1084_v24 = vrot.slane %v690_v36, 4  ;;  %v1063_v47 = vsel %vm724_vm3, %v3268_v49, %v4953_v62  ;;  %v3597_v49 = vperm.slane %v863_v34, %v3125_v26 }
 0x208   : > { %v1409_v48 = vsel %vm724_vm3, %v1408_v19, %v3380_v16  ;;  %v1403_v16 = vperm.slane %v1397_v30, %v3125_v26  ;;  %v3556_v19 = vperm.slane %v885_v23, %v3230_v61  ;;  %v1244_v30 = vrot.slane %v1215_v8, 4 }
 0x209   : > { %v1415_v1 = vperm.slane %v1409_v48, %v3125_v26  ;;  %715 = vrot.lane.b32.xlu1 %v3186_v58, %s2854_s10  ;;  %v3546_v63 = vsel %vm724_vm3, %v3531_v12, %v1458_v51  ;;  %v1247_v23 = vsel %vm724_vm3, %v1215_v8, %v1246_v52  ;;  %v873_v51 = vsel %vm724_vm3, %v872_v17, %v3223_v38  ;;  %v4962_v58 = vld [vmem:[#allocation13_spill] sm:$0xff] }
 0x20a   : > { %v1446_v2 = vrot.slane %v1403_v16, 4  ;;  %v1086_v8 = vrot.slane %v4954_v21, 4  ;;  %v1098_v52 = vrot.slane %v3447_v11, 4  ;;  %v875_v17 = vsel %vm724_vm3, %v3328_v60, %v874_v32 }
 0x20b   : > { %v3551_v13 = vpop.permute.xlu1 %709  ;;  %713 = vrot.lane.b32.xlu0 %v3195_v3, %s2854_s10  ;;  %v1444_v48 = vrot.slane %v1415_v1, 4  ;;  %v3591_v4 = vperm.slane %v873_v51, %v3125_v26  ;;  %v1085_v29 = vsel %vm724_vm3, %v1084_v24, %v4954_v21  ;;  %v3609_v21 = vperm.slane %v1259_v37, %v3230_v61 }
 0x20c   : > { %4952 = vst [vmem:[#allocation37_spill] sm:$0xff] %v3551_v13  ;;  %v3586_v38 = vsel %vm724_vm3, %v1415_v1, %v1446_v2  ;;  %v1087_v40 = vsel %vm724_vm3, %v690_v36, %v1086_v8  ;;  %v3603_v1 = vperm.slane %v985_v35, %v3125_v26  ;;  %v1245_v34 = vsel %vm724_vm3, %v1244_v30, %v3497_v28 }
 0x20d   : > { %v708_v59 = vpop.permute.xlu0 %707  ;;  %v3564_v57 = vpop.permute.xlu2 %525  ;;  %v3583_v56 = vsel %vm724_vm3, %v1444_v48, %v1403_v16  ;;  %v934_v48 = vrot.slane %v3556_v19, 4  ;;  %4956 = vst [vmem:[#allocation38_spill] sm:$0xff] %v3609_v21  ;;  %v3616_v36 = vperm.slane %v875_v17, %v3125_v26  ;;  %v1095_v35 = vperm.slane %v1087_v40, %v3125_v26 }
 0x20e   : > { %v1096_v50 = vrot.slane %v708_v59, 4  ;;  %v1099_v16 = vsel %vm724_vm3, %v708_v59, %v1098_v52  ;;  %4955 = vst [vmem:[#allocation21_spill] sm:$0xff] %v3603_v1  ;;  %v1091_v59 = vperm.slane %v1085_v29, %v3125_v26  ;;  %v1071_v51 = vperm.slane %v1063_v47, %v3125_v26 }
 0x20f   : > { %v908_v32 = vrot.slane %v3591_v4, 4  ;;  %v1107_v37 = vperm.slane %v1099_v16, %v3125_v26  ;;  %v3628_v28 = vperm.slane %v1247_v23, %v3230_v61  ;;  %v922_v30 = vrot.slane %v3597_v49, 4  ;;  %v4960_v23 = vld [vmem:[#allocation2_spill] sm:$0xff] }
 0x210   : > { %v1097_v62 = vsel %vm724_vm3, %v1096_v50, %v3447_v11  ;;  %v1083_v11 = vperm.slane %v1075_v22, %v3125_v26  ;;  %v861_v22 = vsel %vm724_vm3, %v860_v27, %v3182_v53  ;;  %v4957_v53 = vld [vmem:[#allocation8_spill] sm:$0xff]  ;;  %v4959_v29 = vrot.slane %v3375_v18, 4 }
 0x211   : > { %v1103_v2 = vperm.slane %v1097_v62, %v3125_v26  ;;  %v1298_v27 = vrot.slane %v4957_v53, 4  ;;  %v4958_v62 = vld [vmem:[#allocation10_spill] sm:$0xff]  ;;  %v867_v47 = vperm.slane %v861_v22, %v3125_v26  ;;  %v3641_v16 = vperm.slane %v1245_v34, %v3230_v61 }
 0x212   : > { %v1120_v8 = vrot.slane %v1083_v11, 4  ;;  %v3638_v40 = vsel %vm724_vm3, %v3609_v21, %v4959_v29  ;;  %v4961_v0 = vrot.slane %v4960_v23, 4  ;;  %v1134_v1 = vrot.slane %v1091_v59, 4 }
 0x213   : > { %v3605_v60 = vpop.permute.xlu1 %475  ;;  %v1132_v52 = vrot.slane %v1103_v2, 4  ;;  %v1146_v3 = vrot.slane %v1095_v35, 4  ;;  %v923_v17 = vsel %vm724_vm3, %v3616_v36, %v922_v30  ;;  %v1122_v22 = vrot.slane %v1071_v51, 4 }
 0x214   : > { %v1287_v44 = vsel %vm724_vm3, %v4958_v62, %v4961_v0  ;;  %v1299_v18 = vsel %vm724_vm3, %v4962_v58, %v1298_v27  ;;  %v1144_v9 = vrot.slane %v1107_v37, 4  ;;  %v909_v29 = vsel %vm724_vm3, %v908_v32, %v867_v47 }
 0x215   : > { %v3623_v24 = vpop.permute.xlu0 %473  ;;  %v3625_v50 = vpop.permute.xlu2 %543  ;;  %v1147_v34 = vsel %vm724_vm3, %v1107_v37, %v1146_v3  ;;  %v3654_v21 = vsel %vm724_vm3, %v1132_v52, %v1091_v59  ;;  %v3657_v25 = vsel %vm724_vm3, %v1103_v2, %v1134_v1  ;;  %v1121_v0 = vsel %vm724_vm3, %v1120_v8, %v1071_v51  ;;  %v4965_v59 = vld [vmem:[#allocation4_spill] sm:$0xff] }
 0x216   : > { %4963 = vst [vmem:[#allocation8_spill] sm:$0xff] %v3654_v21  ;;  %v3661_v7 = vperm.slane %v1287_v44, %v3125_v26  ;;  %v910_v30 = vrot.slane %v867_v47, 4  ;;  %v3667_v32 = vperm.slane %v923_v17, %v3230_v61  ;;  %v3670_v3 = vperm.slane %v1299_v18, %v3125_v26 }
 0x217   : > { %4964 = vst [vmem:[#allocation10_spill] sm:$0xff] %v3657_v25  ;;  %v4966_v37 = vrot.slane %v4965_v59, 4  ;;  %v3677_v1 = vperm.slane %v909_v29, %v3230_v61  ;;  %v1123_v44 = vsel %vm724_vm3, %v1083_v11, %v1122_v22  ;;  %v1422_v51 = vrot.slane %v3564_v57, 4 }
 0x218   : > { %v3682_v17 = vperm.slane %v1147_v34, %v3230_v61  ;;  %v1127_v18 = vperm.slane %v1121_v0, %v3230_v61  ;;  %v1145_v47 = vsel %vm724_vm3, %v1144_v9, %v1095_v35  ;;  %v3696_v34 = vsel %vm724_vm3, %v3667_v32, %v4970_v55 }
 0x219   : > { %v3700_v9 = vsel %vm724_vm3, %v3591_v4, %v910_v30  ;;  %v3709_v0 = vperm.slane %v1123_v44, %v3230_v61  ;;  %v3723_v44 = vperm.slane %v3546_v63, %v3230_v61 }
 0x21a   : > { %4967 = vst [vmem:[#allocation2_spill] sm:$0xff] %v3682_v17  ;;  %v1166_v4 = vrot.slane %v1127_v18, 4  ;;  %v1168_v30 = vrot.slane %v3682_v17, 4 }
 0x21b   : > { %v3664_v27 = vpop.permute.xlu1 %493 }
 0x21c   : > { %v1847_v2 = vsel %vm724_vm3, %v3664_v27, %v4966_v37  ;;  %v4968_v37 = vld [vmem:[#allocation5_spill] sm:$0xff] }
 0x21d   : > { %v492_v8 = vpop.permute.xlu0 %491  ;;  %v562_v52 = vpop.permute.xlu2 %561  ;;  %v4969_v21 = vrot.slane %v4968_v37, 4  ;;  %v1855_v11 = vperm.slane %v1847_v2, %v3125_v26  ;;  %v1151_v2 = vperm.slane %v1145_v47, %v3230_v61 }
 0x21e   : > { %v1620_v25 = vrot.slane %v492_v8, 4  ;;  %v1420_v39 = vrot.slane %v562_v52, 4  ;;  %v1423_v22 = vsel %vm724_vm3, %v562_v52, %v1422_v51 }
 0x21f   : > { %v1623_v29 = vsel %vm724_vm3, %v492_v8, %v4969_v21  ;;  %v3706_v21 = vsel %vm724_vm3, %v3677_v1, %v934_v48  ;;  %v1634_v48 = vrot.slane %v3623_v24, 4  ;;  %v1434_v8 = vrot.slane %v3625_v50, 4 }
 0x220   : > { %v1421_v35 = vsel %vm724_vm3, %v1420_v39, %v3564_v57  ;;  %v1621_v55 = vsel %vm724_vm3, %v1620_v25, %v4968_v37  ;;  %v3715_v51 = vperm.slane %v1623_v29, %v3125_v26  ;;  %v1456_v39 = vrot.slane %v3531_v12, 4 }
 0x221   : > { %v1858_v57 = vrot.slane %v3605_v60, 4  ;;  %v1844_v25 = vrot.slane %v3664_v27, 4  ;;  %v1906_v52 = vrot.slane %v1855_v11, 4  ;;  %v1431_v47 = vperm.slane %v1423_v22, %v3125_v26 }
 0x222   : > { %v3729_v29 = vperm.slane %v1621_v55, %v3125_v26  ;;  %v3733_v17 = vsel %vm724_vm3, %v1151_v2, %v1166_v4  ;;  %v1682_v63 = vrot.slane %v3715_v51, 4  ;;  %v1164_v27 = vrot.slane %v1151_v2, 4 }
 0x223   : > { %v512_v37 = vpop.permute.xlu1 %511  ;;  %4971 = vst [vmem:[#allocation13_spill] sm:$0xff] %v3733_v17  ;;  %v3739_v22 = vsel %vm724_vm3, %v1168_v30, %v3709_v0  ;;  %v1427_v4 = vperm.slane %v1421_v35, %v3125_v26 }
 0x224   : > { %v1856_v12 = vrot.slane %v512_v37, 4  ;;  %v1859_v45 = vsel %vm724_vm3, %v512_v37, %v1858_v57  ;;  %4972 = vst [vmem:[#allocation4_spill] sm:$0xff] %v3739_v22 }
 0x225   : > { %v1867_v54 = vperm.slane %v1859_v45, %v3125_v26  ;;  %v510_v33 = vpop.permute.xlu0 %509  ;;  %v580_v13 = vpop.permute.xlu2 %579 }
 0x226   : > { %v1857_v55 = vsel %vm724_vm3, %v1856_v12, %v3605_v60  ;;  %v1632_v6 = vrot.slane %v510_v33, 4  ;;  %v1635_v57 = vsel %vm724_vm3, %v510_v33, %v1634_v48  ;;  %v1432_v37 = vrot.slane %v580_v13, 4 }
 0x227   : > { %v1904_v17 = vrot.slane %v1867_v54, 4  ;;  %v3746_v41 = vsel %vm724_vm3, %v1867_v54, %v1906_v52  ;;  %v1643_v45 = vperm.slane %v1635_v57, %v3125_v26  ;;  %v1435_v60 = vsel %vm724_vm3, %v580_v13, %v1434_v8 }
 0x228   : > { %4973 = vst [vmem:[#allocation5_spill] sm:$0xff] %v3746_v41  ;;  %v1633_v2 = vsel %vm724_vm3, %v1632_v6, %v3623_v24  ;;  %v1433_v30 = vsel %vm724_vm3, %v1432_v37, %v3625_v50  ;;  %v3755_v12 = vsel %vm724_vm3, %v1164_v27, %v1127_v18  ;;  %v1451_v54 = vperm.slane %v3583_v56, %v3230_v61 }
 0x229   : > { %4974 = vst [vmem:[#allocation39_spill] sm:$0xff] %v3755_v12  ;;  %v3758_v33 = vsel %vm724_vm3, %v1904_v17, %v1855_v11  ;;  %v1639_v35 = vperm.slane %v1633_v2, %v3125_v26  ;;  %v1455_v48 = vperm.slane %v3586_v38, %v3230_v61  ;;  %v1482_v6 = vrot.slane %v1431_v47, 4 }
 0x22a   : > { %v3766_v24 = vsel %vm724_vm3, %v1643_v45, %v1682_v63  ;;  %v1439_v13 = vperm.slane %v1433_v30, %v3125_v26  ;;  %v1443_v50 = vperm.slane %v1435_v60, %v3125_v26  ;;  %v1845_v17 = vsel %vm724_vm3, %v1844_v25, %v4965_v59 }
 0x22b   : > { %v1670_v18 = vrot.slane %v3729_v29, 4  ;;  %v1470_v11 = vrot.slane %v1427_v4, 4  ;;  %v3774_v8 = vperm.slane %v1857_v55, %v3125_v26  ;;  %v3776_v56 = vpop.permute.xlu1 %529  ;;  %v1680_v38 = vrot.slane %v1643_v45, 4 }
 0x22c   : > { %v1468_v52 = vrot.slane %v1439_v13, 4  ;;  %v1480_v27 = vrot.slane %v1443_v50, 4  ;;  %v1483_v63 = vsel %vm724_vm3, %v1443_v50, %v1482_v6  ;;  %2069 = vmax.xlane.f32.xlu2 %v3450_v31  ;;  %v1668_v57 = vrot.slane %v1639_v35, 4 }
 0x22d   : > { %v1491_v37 = vperm.slane %v1483_v63, %v3230_v61  ;;  %v3781_v2 = vpop.permute.xlu0 %527  ;;  %v3783_v59 = vpop.permute.xlu2 %603  ;;  %v1494_v25 = vrot.slane %v1451_v54, 4  ;;  %v1457_v55 = vsel %vm724_vm3, %v1456_v39, %v3501_v46  ;;  %v1471_v45 = vsel %vm724_vm3, %v1439_v13, %v1470_v11 }
 0x22e   : > { %v1481_v30 = vsel %vm724_vm3, %v1480_v27, %v1431_v47  ;;  %v1498_v60 = vrot.slane %v1455_v48, 4  ;;  %v1506_v6 = vrot.slane %v3723_v44, 4  ;;  %v1479_v31 = vperm.slane %v1471_v45, %v3230_v61 }
 0x22f   : > { %v1463_v50 = vperm.slane %v1457_v55, %v3230_v61  ;;  %v1487_v63 = vperm.slane %v1481_v30, %v3230_v61  ;;  %v1504_v22 = vrot.slane %v1491_v37, 4  ;;  %v1469_v12 = vsel %vm724_vm3, %v1468_v52, %v1427_v4 }
 0x230   : > { %v3795_v41 = vsel %vm724_vm3, %v1491_v37, %v1506_v6  ;;  %v3798_v46 = vsel %vm724_vm3, %v1639_v35, %v1670_v18  ;;  %v3802_v39 = vsel %vm724_vm3, %v1680_v38, %v3715_v51  ;;  %v1475_v47 = vperm.slane %v1469_v12, %v3230_v61  ;;  %v4980_v6 = vld [vmem:[#allocation12_spill] sm:$0xff] }
 0x231   : > { %4975 = vst [vmem:[#allocation40_spill] sm:$0xff] %v3795_v41  ;;  %v3806_v13 = vsel %vm724_vm3, %v1479_v31, %v1498_v60  ;;  %v1496_v11 = vrot.slane %v1479_v31, 4  ;;  %v1500_v27 = vrot.slane %v1487_v63, 4  ;;  %v2113_v4 = vsel %vm389_vm2, %v3696_v34, -inf }
 0x232   : > { %v2077_v52 = vsel %vm389_vm2, %v3706_v21, -inf  ;;  %v3814_v35 = vsel %vm724_vm3, %v1504_v22, %v3723_v44  ;;  %v1502_v18 = vrot.slane %v1463_v50, 4  ;;  %v1492_v12 = vrot.slane %v1475_v47, 4 }
 0x233   : > { %4976 = vst [vmem:[#allocation41_spill] sm:$0xff] %v3814_v35  ;;  %v3816_v51 = vpop.permute.xlu1 %547  ;;  %2114 = vmax.xlane.f32.xlu1 %v2113_v4  ;;  %v3819_v38 = vsel %vm724_vm3, %v1475_v47, %v1494_v25  ;;  %v3822_v37 = vsel %vm724_vm3, %v1496_v11, %v1455_v48  ;;  %v3825_v34 = vsel %vm724_vm3, %v1500_v27, %v1463_v50  ;;  %v1892_v55 = vrot.slane %v3774_v8, 4 }
 0x234   : > { %v1851_v21 = vperm.slane %v1845_v17, %v3125_v26  ;;  %2078 = vmax.xlane.f32.xlu2 %v2077_v52  ;;  %v932_v44 = vrot.slane %v3677_v1, 4  ;;  %v4977_v22 = vrot.slane %v3616_v36, 4  ;;  %v919_v48 = vperm.slane %v3700_v9, %v3230_v61 }
 0x235   : > { %v3834_v25 = vpop.permute.xlu0 %545  ;;  %v3836_v45 = vpop.permute.xlu2 %621  ;;  %2111 = vmax.xlane.f32.xlu0 %v3389_v20  ;;  %v3842_v17 = vsel %vm724_vm3, %v1492_v12, %v1451_v54  ;;  %v3845_v60 = vsel %vm724_vm3, %v1487_v63, %v1502_v18  ;;  %v3849_v36 = vsel %vm724_vm3, %v1668_v57, %v3729_v29  ;;  %v4979_v1 = vrot.slane %v3315_v15, 4  ;;  %v4985_v12 = vld [vmem:[#allocation19_spill] sm:$0xff] }
 0x236   : > { %v921_v30 = vsel %vm724_vm3, %v4977_v22, %v3597_v49  ;;  %4978 = vst [vmem:[#allocation42_spill] sm:$0xff] %v3845_v60  ;;  %v1346_v49 = vrot.slane %v3661_v7, 4  ;;  %v3860_v9 = vsel %vm389_vm2, %v3638_v40, -inf  ;;  %v4981_v54 = vrot.slane %v3513_v42, 4  ;;  %v4992_v40 = vld [vmem:[#allocation25_spill] sm:$0xff] }
 0x237   : > { %v3856_v20 = vsel %vm724_vm3, %v4980_v6, %v4979_v1  ;;  %v4982_v29 = vrot.slane %v4958_v62, 4  ;;  %v4983_v15 = vrot.slane %v4962_v58, 4  ;;  %v3877_v63 = vperm.slane %v921_v30, %v3230_v61 }
 0x238   : > { %v3866_v31 = vsel %vm724_vm3, %v4981_v54, %v3466_v5  ;;  %v1894_v47 = vrot.slane %v1851_v21, 4  ;;  %v933_v42 = vsel %vm724_vm3, %v932_v44, %v3556_v19  ;;  %v1347_v5 = vsel %vm724_vm3, %v3670_v3, %v1346_v49 }
 0x239   : > { %v1285_v57 = vsel %vm724_vm3, %v4982_v29, %v4960_v23  ;;  %v1297_v50 = vsel %vm724_vm3, %v4983_v15, %v4957_v53  ;;  %v3885_v62 = vsel %vm724_vm3, %v1892_v55, %v1851_v21  ;;  %v4984_v23 = vrot.slane %v3166_v43, 4  ;;  %v4986_v29 = vld [vmem:[#allocation34_spill] sm:$0xff] }
 0x23a   : > { %v936_v53 = vrot.slane %v919_v48, 4  ;;  %v944_v11 = vrot.slane %v3667_v32, 4  ;;  %v3894_v4 = vperm.slane %v1285_v57, %v3125_v26  ;;  %v3897_v19 = vperm.slane %v1297_v50, %v3125_v26 }
 0x23b   : > { %v1511_v58 = vsel %vm724_vm3, %v3836_v45, %v4984_v23  ;;  %v1870_v52 = vrot.slane %v3776_v56, 4  ;;  %v3902_v18 = vsel %vm724_vm3, %v3774_v8, %v1894_v47  ;;  %v1310_v21 = vrot.slane %v4985_v12, 4  ;;  %v566_v55 = vpop.permute.xlu1 %565  ;;  %2075 = vmax.xlane.f32.xlu1 %v3412_v10  ;;  %v4988_v47 = vld [vmem:[#allocation33_spill] sm:$0xff] }
 0x23c   : > { %v2071_v32 = vsel %vm389_vm2, %v933_v42, -inf  ;;  %v940_v44 = vrot.slane %v3877_v63, 4  ;;  %v3909_v22 = vperm.slane %v1347_v5, %v3230_v61  ;;  %v1646_v30 = vrot.slane %v3781_v2, 4  ;;  %2081 = vmax.xlane.f32.xlu2 %v3418_v14  ;;  %v4989_v5 = vld [vmem:[#allocation37_spill] sm:$0xff] }
 0x23d   : > { %v3913_v49 = vperm.slane %v1511_v58, %v3125_v26  ;;  %v1868_v1 = vrot.slane %v566_v55, 4  ;;  %v1871_v8 = vsel %vm724_vm3, %v566_v55, %v1870_v52  ;;  %v1522_v6 = vrot.slane %v3783_v59, 4  ;;  %v564_v10 = vpop.permute.xlu0 %563  ;;  %v3918_v54 = vpop.permute.xlu2 %639  ;;  %2072 = vmax.xlane.f32.xlu0 %v2071_v32 }
 0x23e   : > { %v4987_v57 = vrot.slane %v4986_v29, 4  ;;  %v937_v50 = vsel %vm724_vm3, %v936_v53, %v4986_v29  ;;  %v945_v42 = vsel %vm724_vm3, %v944_v11, %v4988_v47  ;;  %v1320_v23 = vrot.slane %v4989_v5, 4  ;;  %v4991_v29 = vld [vmem:[#allocation31_spill] sm:$0xff] }
 0x23f   : > { %v1869_v14 = vsel %vm724_vm3, %v1868_v1, %v3776_v56  ;;  %v1644_v58 = vrot.slane %v564_v10, 4  ;;  %v1647_v52 = vsel %vm724_vm3, %v564_v10, %v1646_v30  ;;  %v1523_v32 = vsel %vm724_vm3, %v3918_v54, %v1522_v6 }
 0x240   : > { %v939_v15 = vsel %vm724_vm3, %v919_v48, %v4987_v57  ;;  %v4990_v48 = vld [vmem:[#allocation35_spill] sm:$0xff]  ;;  %v1311_v11 = vsel %vm724_vm3, %v4991_v29, %v1310_v21  ;;  %v1570_v47 = vrot.slane %v3913_v49, 4  ;;  %v1531_v30 = vperm.slane %v1523_v32, %v3125_v26 }
 0x241   : > { %v941_v57 = vsel %vm724_vm3, %v940_v44, %v4990_v48  ;;  %v1645_v56 = vsel %vm724_vm3, %v1644_v58, %v3781_v2  ;;  %v1879_v1 = vperm.slane %v1871_v8, %v3125_v26  ;;  %v2089_v10 = vsel %vm389_vm2, %v939_v15, -inf }
 0x242   : > { %v2083_v6 = vsel %vm389_vm2, %v937_v50, -inf  ;;  %v3947_v44 = vsel %vm389_vm2, %v945_v42, -inf  ;;  %v1322_v53 = vrot.slane %v4992_v40, 4  ;;  %v1321_v21 = vsel %vm724_vm3, %v1320_v23, %v4992_v40  ;;  %v4994_v42 = vld [vmem:[#allocation22_spill] sm:$0xff] }
 0x243   : > { %v1882_v27 = vrot.slane %v3816_v51, 4  ;;  %v3954_v2 = vsel %vm724_vm3, %v1531_v30, %v1570_v47  ;;  %v1308_v58 = vrot.slane %v4991_v29, 4  ;;  %v3958_v8 = vperm.slane %v1311_v11, %v3125_v26  ;;  %v584_v50 = vpop.permute.xlu1 %583  ;;  %2087 = vmax.xlane.f32.xlu1 %v4994_v42 }
 0x244   : > { %4993 = vst [vmem:[#allocation12_spill] sm:$0xff] %v3954_v2  ;;  %v1655_v15 = vperm.slane %v1647_v52, %v3125_v26  ;;  %v2095_v32 = vsel %vm389_vm2, %v941_v57, -inf  ;;  %v1323_v40 = vsel %vm724_vm3, %v4989_v5, %v1322_v53  ;;  %v1658_v23 = vrot.slane %v3834_v25, 4  ;;  %2090 = vmax.xlane.f32.xlu2 %v2089_v10 }
 0x245   : > { %v1880_v55 = vrot.slane %v584_v50, 4  ;;  %v1883_v47 = vsel %vm724_vm3, %v584_v50, %v1882_v27  ;;  %v3968_v29 = vperm.slane %v1321_v21, %v3125_v26  ;;  %v1875_v11 = vperm.slane %v1869_v14, %v3125_v26  ;;  %v582_v42 = vpop.permute.xlu0 %581  ;;  %2084 = vmax.xlane.f32.xlu0 %v2083_v6 }
 0x246   : > { %v1930_v52 = vrot.slane %v1879_v1, 4  ;;  %v1891_v41 = vperm.slane %v1883_v47, %v3125_v26  ;;  %v1568_v57 = vrot.slane %v1531_v30, 4  ;;  %v1656_v53 = vrot.slane %v582_v42, 4 }
 0x247   : > { %v1881_v5 = vsel %vm724_vm3, %v1880_v55, %v3816_v51  ;;  %v1659_v60 = vsel %vm724_vm3, %v582_v42, %v1658_v23  ;;  %v1706_v35 = vrot.slane %v1655_v15, 4  ;;  %v1309_v21 = vsel %vm724_vm3, %v1308_v58, %v4985_v12 }
 0x248   : > { %v1887_v27 = vperm.slane %v1881_v5, %v3125_v26  ;;  %v3977_v10 = vsel %vm724_vm3, %v1891_v41, %v1930_v52  ;;  %v1667_v14 = vperm.slane %v1659_v60, %v3125_v26  ;;  %v3983_v6 = vperm.slane %v1323_v40, %v3125_v26  ;;  %v4995_v5 = vld [vmem:[#allocation23_spill] sm:$0xff] }
 0x249   : > { %v1651_v30 = vperm.slane %v1645_v56, %v3125_v26  ;;  %v1657_v51 = vsel %vm724_vm3, %v1656_v53, %v3834_v25  ;;  %v1928_v55 = vrot.slane %v1891_v41, 4  ;;  %v1370_v52 = vrot.slane %v3958_v8, 4 }
 0x24a   : > { %v1663_v50 = vperm.slane %v1657_v51, %v3125_v26  ;;  %v1704_v23 = vrot.slane %v1667_v14, 4  ;;  %v1707_v47 = vsel %vm724_vm3, %v1667_v14, %v1706_v35  ;;  %v1356_v60 = vrot.slane %v3968_v29, 4  ;;  %v4996_v14 = vld [vmem:[#allocation26_spill] sm:$0xff] }
 0x24b   : > { %v1691_v12 = vperm.slane %v3766_v24, %v3230_v61  ;;  %v3996_v58 = vsel %vm724_vm3, %v1568_v57, %v3913_v49  ;;  %v1918_v56 = vrot.slane %v1875_v11, 4  ;;  %v1916_v40 = vrot.slane %v1887_v27, 4  ;;  %v3999_v25 = vpop.permute.xlu1 %607  ;;  %2096 = vmax.xlane.f32.xlu1 %v2095_v32 }
 0x24c   : > { %v1705_v41 = vsel %vm724_vm3, %v1704_v23, %v1655_v15  ;;  %v1679_v35 = vperm.slane %v3798_v46, %v3230_v61  ;;  %v4004_v42 = vperm.slane %v1309_v21, %v3125_v26  ;;  %2099 = vmax.xlane.f32.xlu2 %v4995_v5  ;;  %v1371_v24 = vsel %vm724_vm3, %v3983_v6, %v1370_v52 }
 0x24d   : > { %v1675_v49 = vperm.slane %v3849_v36, %v3230_v61  ;;  %v1687_v15 = vperm.slane %v3802_v39, %v3230_v61  ;;  %v1694_v57 = vrot.slane %v1651_v30, 4  ;;  %v1692_v53 = vrot.slane %v1663_v50, 4  ;;  %v4013_v32 = vpop.permute.xlu0 %605  ;;  %2093 = vmax.xlane.f32.xlu0 %v4996_v14 }
 0x24e   : > { %v1919_v46 = vsel %vm724_vm3, %v1887_v27, %v1918_v56  ;;  %v4018_v21 = vsel %vm724_vm3, %v1928_v55, %v1879_v1  ;;  %v4997_v51 = vrot.slane %v4990_v48, 4  ;;  %v1357_v36 = vsel %vm724_vm3, %v1356_v60, %v4004_v42 }
 0x24f   : > { %v1715_v39 = vperm.slane %v1707_v47, %v3230_v61  ;;  %v1730_v52 = vrot.slane %v1691_v12, 4  ;;  %v4028_v5 = vperm.slane %v1371_v24, %v3230_v61  ;;  %v1695_v14 = vsel %vm724_vm3, %v1663_v50, %v1694_v57 }
 0x250   : > { %v943_v23 = vsel %vm724_vm3, %v3877_v63, %v4997_v51  ;;  %v1722_v27 = vrot.slane %v1679_v35, 4  ;;  %v1917_v1 = vsel %vm724_vm3, %v1916_v40, %v1875_v11  ;;  %v1703_v55 = vperm.slane %v1695_v14, %v3230_v61 }
 0x251   : > { %v1711_v48 = vperm.slane %v1705_v41, %v3230_v61  ;;  %v4035_v63 = vsel %vm724_vm3, %v1715_v39, %v1730_v52  ;;  %v1728_v56 = vrot.slane %v1715_v39, 4  ;;  %v4038_v60 = vperm.slane %v1357_v36, %v3230_v61  ;;  %v5000_v41 = vld [vmem:[#allocation27_spill] sm:$0xff] }
 0x252   : > { %4998 = vst [vmem:[#allocation19_spill] sm:$0xff] %v4035_v63  ;;  %v1693_v47 = vsel %vm724_vm3, %v1692_v53, %v1651_v30  ;;  %v1718_v24 = vrot.slane %v1675_v49, 4  ;;  %v1726_v51 = vrot.slane %v1687_v15, 4  ;;  %v1720_v57 = vrot.slane %v1703_v55, 4 }
 0x253   : > { %v1699_v50 = vperm.slane %v1693_v47, %v3230_v61  ;;  %v1724_v2 = vrot.slane %v1711_v48, 4  ;;  %v4043_v11 = vsel %vm724_vm3, %v1703_v55, %v1722_v27  ;;  %v626_v40 = vpop.permute.xlu1 %625  ;;  %2105 = vmax.xlane.f32.xlu1 %v5000_v41  ;;  %v2101_v52 = vsel %vm389_vm2, %v943_v23, -inf }
 0x254   : > { %4999 = vst [vmem:[#allocation34_spill] sm:$0xff] %v4043_v11  ;;  %v5001_v36 = vrot.slane %v3897_v19, 4  ;;  %v4052_v30 = vsel %vm724_vm3, %v1711_v48, %v1726_v51  ;;  %v4055_v53 = vsel %vm724_vm3, %v1728_v56, %v1691_v12  ;;  %2108 = vmax.xlane.f32.xlu2 %v3947_v44  ;;  %v1923_v55 = vperm.slane %v1917_v1, %v3230_v61  ;;  %v5004_v51 = vld [vmem:[#allocation24_spill] sm:$0xff]  ;;  %v5008_v1 = vld [vmem:[#allocation6_spill] sm:$0xff] }
 0x255   : > { %5002 = vst [vmem:[#allocation33_spill] sm:$0xff] %v4052_v30  ;;  %v4059_v14 = vsel %vm724_vm3, %v1699_v50, %v1718_v24  ;;  %v1716_v27 = vrot.slane %v1699_v50, 4  ;;  %v4063_v23 = vperm.slane %v1919_v46, %v3230_v61  ;;  %v624_v47 = vpop.permute.xlu0 %623  ;;  %2102 = vmax.xlane.f32.xlu0 %v2101_v52  ;;  %v2158_v48 = vsel %vm389_vm2, %v3856_v20, -inf  ;;  %v5013_v11 = vld [vmem:[#allocation2_spill] sm:$0xff] }
 0x256   : > { %v1333_v39 = vsel %vm724_vm3, %v5001_v36, %v3894_v4  ;;  %5003 = vst [vmem:[#allocation37_spill] sm:$0xff] %v4055_v53  ;;  %v5005_v12 = vrot.slane %v3641_v16, 4  ;;  %v4074_v44 = vsel %vm724_vm3, %v1720_v57, %v1679_v35  ;;  %v4077_v24 = vsel %vm724_vm3, %v1724_v2, %v1687_v15  ;;  %v5011_v57 = vld [vmem:[#allocation7_spill] sm:$0xff] }
 0x257   : > { %5006 = vst [vmem:[#allocation35_spill] sm:$0xff] %v4074_v44  ;;  %v5009_v50 = vrot.slane %v5008_v1, 4  ;;  %v5010_v20 = vrot.slane %v3909_v22, 4  ;;  %v1380_v36 = vrot.slane %v4038_v60, 4  ;;  %v4089_v35 = vperm.slane %v1333_v39, %v3230_v61 }
 0x258   : > { %v4071_v56 = vsel %vm724_vm3, %v5005_v12, %v5004_v51  ;;  %5007 = vst [vmem:[#allocation31_spill] sm:$0xff] %v4077_v24  ;;  %v1956_v12 = vrot.slane %v626_v40, 4  ;;  %v1170_v2 = vrot.slane %v3709_v0, 4  ;;  %v1899_v15 = vperm.slane %v3885_v62, %v3230_v61 }
 0x259   : > { %v1959_v41 = vsel %vm724_vm3, %v626_v40, %v5009_v50  ;;  %v1395_v52 = vsel %vm724_vm3, %v4028_v5, %v5010_v20  ;;  %v5012_v46 = vrot.slane %v5011_v57, 4  ;;  %v4098_v53 = vsel %vm724_vm3, %v1716_v27, %v1675_v49 }
 0x25a   : > { %v1940_v63 = vrot.slane %v1923_v55, 4  ;;  %v1944_v20 = vrot.slane %v4063_v23, 4  ;;  %v1967_v40 = vperm.slane %v1959_v41, %v3125_v26  ;;  %v1732_v30 = vrot.slane %v624_v47, 4 }
 0x25b   : > { %v1735_v50 = vsel %vm724_vm3, %v624_v47, %v5012_v46  ;;  %v2209_v39 = vsel %vm389_vm2, %v1395_v52, -inf  ;;  %v1171_v0 = vsel %vm724_vm3, %v5013_v11, %v1170_v2  ;;  %v1970_v62 = vrot.slane %v3999_v25, 4  ;;  %v644_v11 = vpop.permute.xlu1 %643  ;;  %2159 = vmax.xlane.f32.xlu1 %v2158_v48 }
 0x25c   : > { %v1381_v24 = vsel %vm724_vm3, %v1380_v36, %v4089_v35  ;;  %v1903_v49 = vperm.slane %v3902_v18, %v3230_v61  ;;  %v4112_v27 = vperm.slane %v3758_v33, %v3230_v61  ;;  %v1746_v46 = vrot.slane %v4013_v32, 4  ;;  %2207 = vmax.xlane.f32.xlu2 %v3860_v9 }
 0x25d   : > { %v1957_v47 = vsel %vm724_vm3, %v1956_v12, %v5008_v1  ;;  %v1743_v41 = vperm.slane %v1735_v50, %v3125_v26  ;;  %v1942_v52 = vrot.slane %v1899_v15, 4  ;;  %v1968_v2 = vrot.slane %v644_v11, 4  ;;  %v642_v50 = vpop.permute.xlu0 %641  ;;  %2210 = vmax.xlane.f32.xlu0 %v2209_v39 }
 0x25e   : > { %v1971_v36 = vsel %vm724_vm3, %v644_v11, %v1970_v62  ;;  %v4121_v18 = vsel %vm724_vm3, %v1940_v63, %v1899_v15  ;;  %v4124_v33 = vsel %vm724_vm3, %v1944_v20, %v1903_v49  ;;  %v2018_v44 = vrot.slane %v1967_v40, 4 }
 0x25f   : > { %5014 = vst [vmem:[#allocation25_spill] sm:$0xff] %v4124_v33  ;;  %v1733_v1 = vsel %vm724_vm3, %v1732_v30, %v5011_v57  ;;  %v1979_v12 = vperm.slane %v1971_v36, %v3125_v26  ;;  %v4130_v48 = vsel %vm724_vm3, %v1923_v55, %v1942_v52  ;;  %v1969_v9 = vsel %vm724_vm3, %v1968_v2, %v3999_v25 }
 0x260   : > { %5015 = vst [vmem:[#allocation22_spill] sm:$0xff] %v4130_v48  ;;  %v1744_v62 = vrot.slane %v642_v50, 4  ;;  %v1747_v63 = vsel %vm724_vm3, %v642_v50, %v1746_v46  ;;  %v4137_v15 = vperm.slane %v4018_v21, %v3230_v61  ;;  %v4140_v20 = vperm.slane %v1957_v47, %v3125_v26  ;;  %v5029_v48 = vld [vmem:[#allocation9_spill] sm:$0xff] }
 0x261   : > { %v1794_v30 = vrot.slane %v1743_v41, 4  ;;  %v4143_v57 = vsel %vm724_vm3, %v1979_v12, %v2018_v44  ;;  %v1755_v55 = vperm.slane %v1747_v63, %v3125_v26  ;;  %v4147_v39 = vperm.slane %v1733_v1, %v3125_v26  ;;  %v5019_v63 = vld [vmem:[#allocation28_spill] sm:$0xff] }
 0x262   : > { %v1745_v25 = vsel %vm724_vm3, %v1744_v62, %v4013_v32  ;;  %v1946_v46 = vrot.slane %v1903_v49, 4  ;;  %v1950_v11 = vrot.slane %v4112_v27, 4  ;;  %v4153_v21 = vperm.slane %v1969_v9, %v3125_v26 }
 0x263   : > { %v2016_v47 = vrot.slane %v1979_v12, 4  ;;  %v1792_v52 = vrot.slane %v1755_v55, 4  ;;  %v4156_v2 = vsel %vm724_vm3, %v1755_v55, %v1794_v30  ;;  %v1358_v44 = vrot.slane %v4004_v42, 4  ;;  %v4173_v9 = vpop.permute.xlu1 %661 }
 0x264   : > { %v2167_v36 = vsel %vm389_vm2, %v1381_v24, -inf  ;;  %v4162_v1 = vsel %vm724_vm3, %v4063_v23, %v1946_v46  ;;  %v4166_v32 = vsel %vm724_vm3, %v4137_v15, %v1950_v11  ;;  %v2006_v49 = vrot.slane %v4140_v20, 4  ;;  %v5018_v24 = vld [vmem:[#allocation21_spill] sm:$0xff] }
 0x265   : > { %5016 = vst [vmem:[#allocation23_spill] sm:$0xff] %v4162_v1  ;;  %v1751_v12 = vperm.slane %v1745_v25, %v3125_v26  ;;  %v4171_v50 = vsel %vm724_vm3, %v1792_v52, %v1743_v41  ;;  %2168 = vmax.xlane.f32.xlu1 %v2167_v36  ;;  %v2161_v42 = vsel %vm389_vm2, %v1171_v0, -inf  ;;  %v1020_v62 = vrot.slane %v5018_v24, 4  ;;  %v4188_v11 = vpop.permute.xlu0 %659  ;;  %v5022_v36 = vld [vmem:[#allocation36_spill] sm:$0xff] }
 0x266   : > { %5017 = vst [vmem:[#allocation26_spill] sm:$0xff] %v4166_v32  ;;  %2162 = vmax.xlane.f32.xlu2 %v2161_v42  ;;  %v2164_v23 = vsel %vm389_vm2, %v4071_v56, -inf  ;;  %v5020_v30 = vrot.slane %v3628_v28, 4  ;;  %v5021_v25 = vrot.slane %v3894_v4, 4  ;;  %v1782_v46 = vrot.slane %v4147_v39, 4 }
 0x267   : > { %2165 = vmax.xlane.f32.xlu0 %v2164_v23  ;;  %v1359_v0 = vsel %vm724_vm3, %v3968_v29, %v1358_v44  ;;  %v4194_v56 = vsel %vm724_vm3, %v4153_v21, %v2006_v49  ;;  %v4197_v52 = vsel %vm724_vm3, %v2016_v47, %v1967_v40  ;;  %v1022_v4 = vrot.slane %v5022_v36, 4  ;;  %v5025_v29 = vld [vmem:[#allocation14_spill] sm:$0xff] }
 0x268   : > { %v1273_v55 = vsel %vm724_vm3, %v5020_v30, %v5019_v63  ;;  %v1335_v41 = vsel %vm724_vm3, %v3897_v19, %v5021_v25  ;;  %v5023_v42 = vrot.slane %v5019_v63, 4  ;;  %v1263_v23 = vperm.slane %v3866_v31, %v3230_v61  ;;  %v5024_v30 = vld [vmem:[#allocation32_spill] sm:$0xff] }
 0x269   : > { %v1072_v44 = vrot.slane %v5025_v29, 4  ;;  %v5026_v49 = vrot.slane %v5004_v51, 4  ;;  %v1382_v47 = vrot.slane %v4089_v35, 4  ;;  %v4214_v32 = vsel %vm724_vm3, %v1751_v12, %v1782_v46  ;;  %v5027_v46 = vld [vmem:[#allocation11_spill] sm:$0xff] }
 0x26a   : > { %v1275_v19 = vsel %vm724_vm3, %v3628_v28, %v5023_v42  ;;  %v2176_v63 = vsel %vm389_vm2, %v1273_v55, -inf  ;;  %v1343_v28 = vperm.slane %v1335_v41, %v3230_v61  ;;  %v1367_v31 = vperm.slane %v1359_v0, %v3230_v61  ;;  %v5028_v41 = vld [vmem:[#allocation38_spill] sm:$0xff] }
 0x26b   : > { %v1271_v40 = vsel %vm724_vm3, %v3641_v16, %v5026_v49  ;;  %v1021_v42 = vsel %vm724_vm3, %v1020_v62, %v5022_v36  ;;  %v1368_v29 = vrot.slane %v3983_v6, 4  ;;  %v1939_v51 = vperm.slane %v3977_v10, %v3230_v61  ;;  %v4233_v36 = vpop.permute.xlu1 %679 }
 0x26c   : > { %v1780_v16 = vrot.slane %v1751_v12, 4  ;;  %v1383_v35 = vsel %vm724_vm3, %v4038_v60, %v1382_v47  ;;  %v1060_v49 = vrot.slane %v5027_v46, 4  ;;  %v2170_v55 = vsel %vm389_vm2, %v1271_v40, -inf  ;;  %v5030_v47 = vld [vmem:[#allocation5_spill] sm:$0xff] }
 0x26d   : > { %v1276_v25 = vrot.slane %v1263_v23, 4  ;;  %v1280_v1 = vrot.slane %v5028_v41, 4  ;;  %v1344_v0 = vrot.slane %v3670_v3, 4  ;;  %v1073_v62 = vsel %vm724_vm3, %v1072_v44, %v5029_v48  ;;  %2177 = vmax.xlane.f32.xlu1 %v2176_v63  ;;  %v4240_v3 = vpop.permute.xlu0 %677 }
 0x26e   : > { %v2004_v6 = vrot.slane %v4153_v21, 4  ;;  %v1027_v10 = vperm.slane %v1021_v42, %v3230_v61  ;;  %2171 = vmax.xlane.f32.xlu2 %v2170_v55  ;;  %v2173_v60 = vsel %vm389_vm2, %v1383_v35, -inf  ;;  %v1384_v12 = vrot.slane %v1367_v31, 4  ;;  %v5031_v42 = vld [vmem:[#allocation3_spill] sm:$0xff]  ;;  %v5032_v55 = vld [vmem:[#allocation29_spill] sm:$0xff] }
 0x26f   : > { %v1948_v40 = vrot.slane %v4137_v15, 4  ;;  %v1915_v46 = vperm.slane %v5030_v47, %v3230_v61  ;;  %2174 = vmax.xlane.f32.xlu0 %v2173_v60  ;;  %v1386_v48 = vrot.slane %v1343_v28, 4  ;;  %v1369_v21 = vsel %vm724_vm3, %v1368_v29, %v3958_v8 }
 0x270   : > { %v4246_v44 = vsel %vm724_vm3, %v1780_v16, %v4147_v39  ;;  %v1952_v63 = vrot.slane %v1939_v51, 4  ;;  %v1061_v35 = vsel %vm724_vm3, %v1060_v49, %v5031_v42  ;;  %v2182_v15 = vsel %vm389_vm2, %v1275_v19, -inf  ;;  %v4288_v42 = vpop.permute.xlu2 %657 }
 0x271   : > { %v5033_v41 = vrot.slane %v5032_v55, 4  ;;  %v1023_v60 = vsel %vm724_vm3, %v5018_v24, %v1022_v4  ;;  %v1079_v33 = vperm.slane %v1073_v62, %v3125_v26  ;;  %v1387_v8 = vsel %vm724_vm3, %v1367_v31, %v1386_v48  ;;  %v5034_v31 = vld [vmem:[#allocation20_spill] sm:$0xff] }
 0x272   : > { %v1345_v39 = vsel %vm724_vm3, %v1344_v0, %v3661_v7  ;;  %v4262_v29 = vsel %vm724_vm3, %v2004_v6, %v4140_v20  ;;  %v1385_v19 = vsel %vm724_vm3, %v1384_v12, %v1343_v28  ;;  %v1375_v16 = vperm.slane %v1369_v21, %v3230_v61 }
 0x273   : > { %v1279_v47 = vsel %vm724_vm3, %v1263_v23, %v5033_v41  ;;  %v4268_v23 = vsel %vm724_vm3, %v1948_v40, %v4112_v27  ;;  %v1954_v24 = vrot.slane %v1915_v46, 4  ;;  %v1277_v4 = vsel %vm724_vm3, %v1276_v25, %v5032_v55  ;;  %v698_v25 = vpop.permute.xlu1 %697 }
 0x274   : > { %v1281_v49 = vsel %vm724_vm3, %v1280_v1, %v5034_v31  ;;  %v1044_v7 = vrot.slane %v1027_v10, 4  ;;  %v4275_v0 = vsel %vm724_vm3, %v1952_v63, %v1915_v46  ;;  %v1982_v20 = vrot.slane %v4173_v9, 4 }
 0x275   : > { %v2185_v28 = vsel %vm389_vm2, %v1387_v8, -inf  ;;  %v1351_v62 = vperm.slane %v1345_v39, %v3230_v61  ;;  %v4281_v27 = vsel %vm724_vm3, %v1939_v51, %v1954_v24  ;;  %v1067_v6 = vperm.slane %v1061_v35, %v3125_v26  ;;  %v696_v51 = vpop.permute.xlu0 %695  ;;  %v5037_v8 = vld [vmem:[#allocation8_spill] sm:$0xff]  ;;  %v5038_v39 = vld [vmem:[#allocation17_spill] sm:$0xff]  ;;  %v5040_v24 = vld [vmem:[#allocation18_spill] sm:$0xff] }
 0x276   : > { %5035 = vst [vmem:[#allocation27_spill] sm:$0xff] %v4281_v27  ;;  %v1108_v12 = vrot.slane %v1079_v33, 4  ;;  %2186 = vmax.xlane.f32.xlu1 %v2185_v28  ;;  %v2179_v1 = vsel %vm389_vm2, %v1385_v19, -inf  ;;  %v1392_v40 = vrot.slane %v4028_v5, 4  ;;  %v1758_v46 = vrot.slane %v4188_v11, 4 }
 0x277   : > { %v1980_v48 = vrot.slane %v698_v25, 4  ;;  %v1983_v21 = vsel %vm724_vm3, %v698_v25, %v1982_v20  ;;  %2180 = vmax.xlane.f32.xlu2 %v2179_v1  ;;  %v1388_v63 = vrot.slane %v1375_v16, 4  ;;  %2183 = vmax.xlane.f32.xlu0 %v2182_v15  ;;  %v2194_v35 = vsel %vm389_vm2, %v1279_v47, -inf }
 0x278   : > { %v5036_v55 = vrot.slane %v5024_v30, 4  ;;  %v4296_v5 = vperm.slane %v5037_v8, %v3230_v61  ;;  %v5039_v19 = vrot.slane %v5038_v39, 4  ;;  %v1759_v15 = vsel %vm724_vm3, %v696_v51, %v1758_v46 }
 0x279   : > { %v1981_v20 = vsel %vm724_vm3, %v1980_v48, %v4173_v9  ;;  %v1390_v47 = vrot.slane %v1351_v62, 4  ;;  %v1045_v28 = vsel %vm724_vm3, %v1044_v7, %v5024_v30  ;;  %v4311_v25 = vsel %vm389_vm2, %v1281_v49, -inf }
 0x27a   : > { %v1047_v41 = vsel %vm724_vm3, %v1027_v10, %v5036_v55  ;;  %v4302_v31 = vsel %vm724_vm3, %v5040_v24, %v5039_v19  ;;  %v2188_v10 = vsel %vm389_vm2, %v1277_v4, -inf  ;;  %v1109_v1 = vsel %vm724_vm3, %v1108_v12, %v1067_v6 }
 0x27b   : > { %v4315_v55 = vperm.slane %v1023_v60, %v3230_v61  ;;  %v1110_v8 = vrot.slane %v1067_v6, 4  ;;  %v1389_v39 = vsel %vm724_vm3, %v1388_v63, %v1351_v62  ;;  %v1393_v9 = vsel %vm724_vm3, %v1392_v40, %v3909_v22 }
 0x27c   : > { %v1391_v46 = vsel %vm724_vm3, %v1375_v16, %v1390_v47  ;;  %v1991_v30 = vperm.slane %v1983_v21, %v3125_v26  ;;  %v4323_v4 = vsel %vm389_vm2, %v1047_v41, -inf  ;;  %v4326_v49 = vsel %vm389_vm2, %v1045_v28, -inf  ;;  %v716_v16 = vpop.permute.xlu1 %715  ;;  %v5041_v21 = vld [vmem:[#allocation10_spill] sm:$0xff] }
 0x27d   : > { %v1156_v7 = vrot.slane %v4296_v5, 4  ;;  %v1994_v60 = vrot.slane %v4233_v36, 4  ;;  %v1756_v6 = vrot.slane %v696_v51, 4  ;;  %v4331_v62 = vperm.slane %v1109_v1, %v3230_v61  ;;  %v714_v28 = vpop.permute.xlu0 %713 }
 0x27e   : > { %v4334_v22 = vsel %vm724_vm3, %v1079_v33, %v1110_v8  ;;  %2195 = vmax.xlane.f32.xlu1 %v2194_v35  ;;  %v2191_v12 = vsel %vm389_vm2, %v1389_v39, -inf  ;;  %v2203_v40 = vsel %vm389_vm2, %v1393_v9, -inf  ;;  %v2197_v48 = vsel %vm389_vm2, %v1391_v46, -inf }
 0x27f   : > { %v4341_v63 = vperm.slane %v5041_v21, %v3230_v61  ;;  %v1770_v51 = vrot.slane %v4240_v3, 4  ;;  %v1767_v41 = vperm.slane %v1759_v15, %v3125_v26  ;;  %v1992_v19 = vrot.slane %v716_v16, 4  ;;  %2189 = vmax.xlane.f32.xlu2 %v2188_v10  ;;  %2192 = vmax.xlane.f32.xlu0 %v2191_v12  ;;  %v4355_v10 = vpop.permute.xlu2 %675 }
 0x280   : > { %v1995_v33 = vsel %vm724_vm3, %v716_v16, %v1994_v60  ;;  %v1987_v35 = vperm.slane %v1981_v20, %v3125_v26  ;;  %v2042_v24 = vrot.slane %v1991_v30, 4  ;;  %v1157_v1 = vsel %vm724_vm3, %v1156_v7, %v4331_v62 }
 0x281   : > { %v2003_v47 = vperm.slane %v1995_v33, %v3125_v26  ;;  %v1757_v8 = vsel %vm724_vm3, %v1756_v6, %v4188_v11  ;;  %v1993_v15 = vsel %vm724_vm3, %v1992_v19, %v4233_v36  ;;  %v1768_v39 = vrot.slane %v714_v28, 4 }
 0x282   : > { %v1771_v9 = vsel %vm724_vm3, %v714_v28, %v1770_v51  ;;  %v1999_v20 = vperm.slane %v1993_v15, %v3125_v26  ;;  %v1818_v12 = vrot.slane %v1767_v41, 4  ;;  %v1791_v11 = vperm.slane %v4214_v32, %v3230_v61 }
 0x283   : > { %v2040_v46 = vrot.slane %v2003_v47, 4  ;;  %v2043_v60 = vsel %vm724_vm3, %v2003_v47, %v2042_v24  ;;  %v1779_v16 = vperm.slane %v1771_v9, %v3125_v26  ;;  %v1769_v7 = vsel %vm724_vm3, %v1768_v39, %v4240_v3 }
 0x284   : > { %v1803_v36 = vperm.slane %v4156_v2, %v3230_v61  ;;  %v1763_v6 = vperm.slane %v1757_v8, %v3125_v26  ;;  %v1775_v51 = vperm.slane %v1769_v7, %v3125_v26  ;;  %v1787_v19 = vperm.slane %v4246_v44, %v3230_v61 }
 0x285   : > { %v2041_v21 = vsel %vm724_vm3, %v2040_v46, %v1991_v30  ;;  %v1819_v33 = vsel %vm724_vm3, %v1779_v16, %v1818_v12  ;;  %v2119_v24 = vsel %vm389_vm2, %v1157_v1, -inf  ;;  %v1160_v3 = vrot.slane %v4341_v63, 4 }
 0x286   : > { %v1799_v32 = vperm.slane %v4171_v50, %v3230_v61  ;;  %v2030_v47 = vrot.slane %v1987_v35, 4  ;;  %v2028_v2 = vrot.slane %v1999_v20, 4  ;;  %v1816_v28 = vrot.slane %v1779_v16, 4  ;;  %2204 = vmax.xlane.f32.xlu1 %v2203_v40 }
 0x287   : > { %v4378_v30 = vperm.slane %v4194_v56, %v3230_v61  ;;  %v1827_v8 = vperm.slane %v1819_v33, %v3230_v61  ;;  %2198 = vmax.xlane.f32.xlu2 %v2197_v48  ;;  %v1834_v44 = vrot.slane %v1791_v11, 4  ;;  %v1842_v15 = vrot.slane %v1803_v36, 4  ;;  %2201 = vmax.xlane.f32.xlu0 %v4311_v25  ;;  %v4397_v27 = vpop.permute.xlu2 %693 }
 0x288   : > { %v2027_v1 = vperm.slane %v4143_v57, %v3230_v61  ;;  %v1806_v39 = vrot.slane %v1763_v6, 4  ;;  %v1804_v9 = vrot.slane %v1775_v51, 4  ;;  %v1830_v50 = vrot.slane %v1787_v19, 4 }
 0x289   : > { %v2031_v46 = vsel %vm724_vm3, %v1999_v20, %v2030_v47  ;;  %v1838_v40 = vrot.slane %v1799_v32, 4  ;;  %v2011_v56 = vperm.slane %v4262_v29, %v3230_v61  ;;  %v2023_v48 = vperm.slane %v4197_v52, %v3230_v61 }
 0x28a   : > { %v2039_v16 = vperm.slane %v2031_v46, %v3230_v61  ;;  %v1807_v12 = vsel %vm724_vm3, %v1775_v51, %v1806_v39  ;;  %v1817_v57 = vsel %vm724_vm3, %v1816_v28, %v1767_v41  ;;  %v2029_v7 = vsel %vm724_vm3, %v2028_v2, %v1987_v35 }
 0x28b   : > { %v2058_v25 = vrot.slane %v4378_v30, 4  ;;  %v2051_v33 = vperm.slane %v2043_v60, %v3230_v61  ;;  %v1815_v20 = vperm.slane %v1807_v12, %v3230_v61  ;;  %v1823_v47 = vperm.slane %v1817_v57, %v3230_v61 }
 0x28c   : > { %v1840_v29 = vrot.slane %v1827_v8, 4  ;;  %v1805_v46 = vsel %vm724_vm3, %v1804_v9, %v1763_v6  ;;  %v2035_v52 = vperm.slane %v2029_v7, %v3230_v61  ;;  %v4402_v51 = vsel %vm724_vm3, %v1827_v8, %v1842_v15 }
 0x28d   : > { %v4405_v41 = vsel %vm724_vm3, %v2039_v16, %v2058_v25  ;;  %v1811_v35 = vperm.slane %v1805_v46, %v3230_v61  ;;  %v1832_v60 = vrot.slane %v1815_v20, 4  ;;  %v4409_v2 = vsel %vm724_vm3, %v1815_v20, %v1834_v44 }
 0x28e   : > { %v4412_v28 = vsel %vm724_vm3, %v1823_v47, %v1838_v40  ;;  %2123 = vmax.xlane.f32.xlu1 %v4323_v4  ;;  %v1836_v6 = vrot.slane %v1823_v47, 4  ;;  %v4416_v39 = vsel %vm724_vm3, %v1840_v29, %v1803_v36  ;;  %v2054_v8 = vrot.slane %v2011_v56, 4 }
 0x28f   : > { %v2047_v15 = vperm.slane %v2041_v21, %v3230_v61  ;;  %2117 = vmax.xlane.f32.xlu2 %v4326_v49  ;;  %v1828_v9 = vrot.slane %v1811_v35, 4  ;;  %v4421_v12 = vsel %vm724_vm3, %v1832_v60, %v1791_v11  ;;  %v4424_v44 = vsel %vm724_vm3, %v1811_v35, %v1830_v50  ;;  %2120 = vmax.xlane.f32.xlu0 %v2119_v24 }
 0x290   : > { %v2064_v40 = vrot.slane %v2051_v33, 4  ;;  %v1119_v4 = vperm.slane %v4334_v22, %v3230_v61  ;;  %v1048_v36 = vrot.slane %v4315_v55, 4  ;;  %v4430_v57 = vsel %vm724_vm3, %v1836_v6, %v1799_v32 }
 0x291   : > { %v2052_v21 = vrot.slane %v2035_v52, 4  ;;  %v1158_v49 = vrot.slane %v4331_v62, 4  ;;  %v1007_v11 = vperm.slane %v4302_v31, %v3230_v61  ;;  %v4436_v7 = vsel %vm724_vm3, %v1828_v9, %v1787_v19 }
 0x292   : > { %v4439_v50 = vsel %vm724_vm3, %v2035_v52, %v2054_v8  ;;  %v1161_v24 = vsel %vm724_vm3, %v1160_v3, %v1119_v4  ;;  %v2062_v25 = vrot.slane %v2023_v48, 4  ;;  %v2066_v32 = vrot.slane %v2027_v1, 4 }
 0x293   : > { %v4443_v22 = vsel %vm724_vm3, %v2052_v21, %v2011_v56  ;;  %v1159_v20 = vsel %vm724_vm3, %v4296_v5, %v1158_v49  ;;  %v2056_v62 = vrot.slane %v2039_v16, 4  ;;  %v2060_v47 = vrot.slane %v2047_v15, 4  ;;  %v712_v16 = vpop.permute.xlu2 %711 }
 0x294   : > { %v4448_v31 = vsel %vm724_vm3, %v2064_v40, %v2027_v1  ;;  %v1049_v19 = vsel %vm724_vm3, %v1048_v36, %v1007_v11  ;;  %v4452_v29 = vsel %vm724_vm3, %v2047_v15, %v2062_v25  ;;  %v4455_v3 = vsel %vm724_vm3, %v2051_v33, %v2066_v32  ;;  %v5042_v15 = vld [vmem:[#allocation30_spill] sm:$0xff]  ;;  %v5043_v32 = vld [vmem:[#allocation13_spill] sm:$0xff] }
 0x295   : > { %v2131_v56 = vsel %vm389_vm2, %v1161_v24, -inf  ;;  %v4460_v46 = vsel %vm724_vm3, %v2056_v62, %v4378_v30  ;;  %v4463_v5 = vsel %vm724_vm3, %v2060_v47, %v2023_v48  ;;  %v2125_v1 = vsel %vm389_vm2, %v1159_v20, -inf  ;;  %v5044_v62 = vld [vmem:[#allocation39_spill] sm:$0xff] }
 0x296   : > { %2132 = vmax.xlane.f32.xlu1 %v2131_v56  ;;  %v2128_v52 = vsel %vm389_vm2, %v1049_v19, -inf  ;;  %v1544_v35 = vrot.slane %v712_v16, 4  ;;  %v1050_v33 = vrot.slane %v1007_v11, 4  ;;  %v1520_v60 = vrot.slane %v3918_v54, 4  ;;  %v5045_v56 = vld [vmem:[#allocation15_spill] sm:$0xff] }
 0x297   : > { %2126 = vmax.xlane.f32.xlu2 %v2125_v1  ;;  %2129 = vmax.xlane.f32.xlu0 %v2128_v52  ;;  %v1162_v6 = vrot.slane %v1119_v4, 4  ;;  %v2140_v9 = vsel %vm389_vm2, %v5042_v15, -inf  ;;  %v1532_v54 = vrot.slane %v4397_v27, 4  ;;  %v1508_v4 = vrot.slane %v3836_v45, 4 }
 0x298   : > { %v1051_v30 = vsel %vm724_vm3, %v4315_v55, %v1050_v33  ;;  %v1545_v8 = vsel %vm724_vm3, %v1544_v35, %v4355_v10  ;;  %v1521_v40 = vsel %vm724_vm3, %v1520_v60, %v3783_v59  ;;  %v2149_v20 = vsel %vm389_vm2, %v5043_v32, -inf }
 0x299   : > { %v1163_v48 = vsel %vm724_vm3, %v4341_v63, %v1162_v6  ;;  %v2134_v36 = vsel %vm389_vm2, %v1051_v30, -inf  ;;  %v1551_v63 = vperm.slane %v1545_v8, %v3125_v26  ;;  %v1527_v21 = vperm.slane %v1521_v40, %v3125_v26 }
 0x29a   : > { %v2137_v55 = vsel %vm389_vm2, %v1163_v48, -inf  ;;  %v1533_v59 = vsel %vm724_vm3, %v1532_v54, %v4288_v42  ;;  %v1509_v11 = vsel %vm724_vm3, %v1508_v4, %v3166_v43  ;;  %v2143_v47 = vsel %vm389_vm2, %v5044_v62, -inf  ;;  %v5047_v54 = vld [vmem:[#allocation4_spill] sm:$0xff] }
 0x29b   : > { %v1580_v24 = vrot.slane %v1551_v63, 4  ;;  %v1556_v25 = vrot.slane %v1527_v21, 4  ;;  %v1539_v45 = vperm.slane %v1533_v59, %v3125_v26  ;;  %v1515_v19 = vperm.slane %v1509_v11, %v3125_v26 }
 0x29c   : > { %v2146_v1 = vsel %vm389_vm2, %v5045_v56, -inf  ;;  %v1546_v33 = vrot.slane %v4355_v10, 4  ;;  %v2212_v15 = vsel %vm389_vm2, %v3842_v17, -inf  ;;  %v1534_v59 = vrot.slane %v4288_v42, 4 }
 0x29d   : > { %v1581_v43 = vsel %vm724_vm3, %v1580_v24, %v1539_v45  ;;  %v1557_v35 = vsel %vm724_vm3, %v1556_v25, %v1515_v19  ;;  %v1558_v56 = vrot.slane %v1515_v19, 4  ;;  %v2452_v19 = vlaneseq }
 0x29e   : > { %2141 = vmax.xlane.f32.xlu1 %v2140_v9  ;;  %v1587_v30 = vperm.slane %v1581_v43, %v3230_v61  ;;  %v1547_v48 = vsel %vm724_vm3, %v712_v16, %v1546_v33  ;;  %v1563_v8 = vperm.slane %v1557_v35, %v3230_v61  ;;  %v5046_v9 = vld [vmem:[#allocation16_spill] sm:$0xff]  ;;  %v1535_v24 = vsel %vm724_vm3, %v4397_v27, %v1534_v59 }
 0x29f   : > { %2135 = vmax.xlane.f32.xlu2 %v2134_v36  ;;  %2138 = vmax.xlane.f32.xlu0 %v2137_v55  ;;  %v4484_v49 = vpop.xlane.xlu2 %2069  ;;  %v2152_v40 = vsel %vm389_vm2, %v5046_v9, -inf  ;;  %v1582_v36 = vrot.slane %v1539_v45, 4  ;;  %v1555_v10 = vperm.slane %v1547_v48, %v3125_v26  ;;  %v2155_v55 = vsel %vm389_vm2, %v5047_v54, -inf }
 0x2a0   : > { %v1604_v4 = vrot.slane %v1587_v30, 4  ;;  %v1606_v16 = vrot.slane %v1563_v8, 4  ;;  %v1543_v42 = vperm.slane %v1535_v24, %v3125_v26  ;;  %v2218_v27 = vsel %vm389_vm2, %v3819_v38, -inf }
 0x2a1   : > { %v1583_v17 = vsel %vm724_vm3, %v1551_v63, %v1582_v36  ;;  %v1559_v35 = vsel %vm724_vm3, %v1527_v21, %v1558_v56  ;;  %v4542_v38 = vand.u32 127, %v2452_v19  ;;  %v2224_v21 = vsel %vm389_vm2, %v3822_v37, -inf }
 0x2a2   : > { %v1607_v32 = vsel %vm724_vm3, %v1587_v30, %v1606_v16  ;;  %v1605_v62 = vsel %vm724_vm3, %v1604_v4, %v1563_v8  ;;  %v1567_v26 = vperm.slane %v1559_v35, %v3230_v61  ;;  %v1575_v4 = vperm.slane %v3996_v58, %v3230_v61 }
 0x2a3   : > { %v2215_v63 = vsel %vm389_vm2, %v1605_v62, -inf  ;;  %v2454_v56 = vperm.slane %v4484_v49, %v4542_v38 }
 0x2a4   : > { %v1610_v16 = vrot.slane %v1567_v26, 4  ;;  %v1614_v35 = vrot.slane %v1575_v4, 4 }
 0x2a6   : > { %2150 = vmax.xlane.f32.xlu1 %v2149_v20  ;;  %v4499_v52 = vpop.xlane.xlu1 %2114  ;;  %v1592_v20 = vrot.slane %v1555_v10, 4 }
 0x2a7   : > { %2144 = vmax.xlane.f32.xlu2 %v2143_v47  ;;  %2147 = vmax.xlane.f32.xlu0 %v2146_v1  ;;  %v4503_v60 = vpop.xlane.xlu2 %2078  ;;  %v1591_v47 = vperm.slane %v1583_v17, %v3230_v61  ;;  %v2221_v1 = vsel %vm389_vm2, %v1607_v32, -inf  ;;  %v1594_v32 = vrot.slane %v1543_v42, 4 }
 0x2a8   : > { %v4505_v6 = vpop.xlane.xlu0 %2111  ;;  %v1593_v43 = vsel %vm724_vm3, %v1592_v20, %v1543_v42 }
 0x2a9   : > { %v1608_v33 = vrot.slane %v1591_v47, 4  ;;  %v1599_v8 = vperm.slane %v1593_v43, %v3230_v61  ;;  %v1611_v62 = vsel %vm724_vm3, %v1591_v47, %v1610_v16  ;;  %v1595_v58 = vsel %vm724_vm3, %v1555_v10, %v1594_v32  ;;  %v5050_v32 = vld [vmem:[#allocation42_spill] sm:$0xff] }
 0x2aa   : > { %v2233_v47 = vsel %vm389_vm2, %v1611_v62, -inf  ;;  %v2236_v10 = vsel %vm389_vm2, %v3825_v34, -inf  ;;  %v1603_v34 = vperm.slane %v1595_v58, %v3230_v61 }
 0x2ab   : > { %v1609_v9 = vsel %vm724_vm3, %v1608_v33, %v1567_v26  ;;  %v1612_v36 = vrot.slane %v1599_v8, 4  ;;  %v5048_v33 = vld [vmem:[#allocation12_spill] sm:$0xff] }
 0x2ac   : > { %v2227_v54 = vsel %vm389_vm2, %v1609_v9, -inf  ;;  %v1579_v19 = vperm.slane %v5048_v33, %v3230_v61 }
 0x2ad   : > { %v1613_v24 = vsel %vm724_vm3, %v1612_v36, %v1575_v4 }
 0x2ae   : > { %2213 = vmax.xlane.f32.xlu1 %v2212_v15  ;;  %v4518_v11 = vpop.xlane.xlu1 %2075 }
 0x2af   : > { %2153 = vmax.xlane.f32.xlu2 %v2152_v40  ;;  %2156 = vmax.xlane.f32.xlu0 %v2155_v55  ;;  %v2082_v25 = vpop.xlane.xlu2 %2081  ;;  %v2230_v40 = vsel %vm389_vm2, %v3806_v13, -inf  ;;  %v4548_v55 = vadd.s32 4294967288, %v4542_v38 }
 0x2b0   : > { %v2073_v45 = vpop.xlane.xlu0 %2072 }
 0x2b1   : > { %v2456_v13 = vperm.slane %v2073_v45, %v4548_v55  ;;  %v2462_v45 = vperm.slane %v2082_v25, %v4542_v38  ;;  %v2460_v42 = vperm.slane %v4503_v60, %v4548_v55 }
 0x2b3   : > { %v2458_v43 = vsel %vm2457_vm4, %v2456_v13, %v2454_v56 }
 0x2b6   : > { %2222 = vmax.xlane.f32.xlu1 %v2221_v1  ;;  %v4533_v30 = vpop.xlane.xlu1 %2087  ;;  %v2459_v1 = vperm.slane %v4518_v11, %v4542_v38 }
 0x2b7   : > { %2216 = vmax.xlane.f32.xlu2 %v2215_v63  ;;  %2219 = vmax.xlane.f32.xlu0 %v2218_v27  ;;  %v4535_v48 = vpop.xlane.xlu2 %2090  ;;  %v2239_v63 = vsel %vm389_vm2, %v1613_v24, -inf  ;;  %v2465_v60 = vperm.slane %v4533_v30, %v4542_v38  ;;  %v5049_v24 = vld [vmem:[#allocation41_spill] sm:$0xff] }
 0x2b8   : > { %v2085_v15 = vpop.xlane.xlu0 %2084  ;;  %v2461_v25 = vsel %vm2457_vm4, %v2460_v42, %v2459_v1  ;;  %v2466_v27 = vperm.slane %v4535_v48, %v4548_v55  ;;  %v2477_v48 = vperm.slane %v4505_v6, %v4542_v38  ;;  %v2248_v6 = vsel %vm389_vm2, %v5049_v24, -inf }
 0x2b9   : > { %v2463_v37 = vperm.slane %v2085_v15, %v4548_v55  ;;  %v2601_v26 = vsel %vm2600_vm5, %v2461_v25, %v2458_v43  ;;  %v1618_v42 = vrot.slane %v1579_v19, 4 }
 0x2ba   : > { %v2467_v61 = vsel %vm2457_vm4, %v2466_v27, %v2465_v60 }
 0x2bb   : > { %v2464_v49 = vsel %vm2457_vm4, %v2463_v37, %v2462_v45  ;;  %v2242_v37 = vsel %vm389_vm2, %v5050_v32, -inf }
 0x2be   : > { %2231 = vmax.xlane.f32.xlu1 %v2230_v40  ;;  %v2097_v59 = vpop.xlane.xlu1 %2096  ;;  %v2603_v40 = vsel %vm2602_vm6, %v2464_v49, %v2601_v26 }
 0x2bf   : > { %2225 = vmax.xlane.f32.xlu2 %v2224_v21  ;;  %2228 = vmax.xlane.f32.xlu0 %v2227_v54  ;;  %v2100_v17 = vpop.xlane.xlu2 %2099  ;;  %v2469_v15 = vperm.slane %v2097_v59, %v4548_v55  ;;  %v1615_v21 = vsel %vm724_vm3, %v1599_v8, %v1614_v35  ;;  %v2605_v8 = vsel %vm2604_vm7, %v2467_v61, %v2603_v40  ;;  %v5051_v35 = vld [vmem:[#allocation40_spill] sm:$0xff]  ;;  %v2269_v61 = vsel %vm389_vm2, %v4424_v44, -inf }
 0x2c0   : > { %v2094_v20 = vpop.xlane.xlu0 %2093  ;;  %v2471_v16 = vperm.slane %v2100_v17, %v4542_v38  ;;  %v2245_v58 = vsel %vm389_vm2, %v1615_v21, -inf  ;;  %v2254_v33 = vsel %vm389_vm2, %v5051_v35, -inf  ;;  %v2260_v21 = vsel %vm389_vm2, %v4098_v53, -inf }
 0x2c1   : > { %v2468_v11 = vperm.slane %v2094_v20, %v4542_v38  ;;  %v2478_v20 = vperm.slane %v4499_v52, %v4548_v55  ;;  %v1616_v52 = vrot.slane %v1603_v34, 4 }
 0x2c3   : > { %v2470_v36 = vsel %vm2457_vm4, %v2469_v15, %v2468_v11  ;;  %v2479_v45 = vsel %vm2457_vm4, %v2478_v20, %v2477_v48  ;;  %v1619_v11 = vsel %vm724_vm3, %v1603_v34, %v1618_v42  ;;  %v1617_v25 = vsel %vm724_vm3, %v1616_v52, %v1579_v19 }
 0x2c4   : > { %v2607_v62 = vsel %vm2606_vm8, %v2470_v36, %v2605_v8  ;;  %v2257_v60 = vsel %vm389_vm2, %v1619_v11, -inf  ;;  %v2251_v27 = vsel %vm389_vm2, %v1617_v25, -inf  ;;  %v2266_v19 = vsel %vm389_vm2, %v4059_v14, -inf  ;;  %v5052_v14 = vld [vmem:[#allocation35_spill] sm:$0xff] }
 0x2c5   : > { %v2263_v48 = vsel %vm389_vm2, %v4436_v7, -inf  ;;  %v5053_v7 = vld [vmem:[#allocation31_spill] sm:$0xff]  ;;  %v2287_v11 = vsel %vm389_vm2, %v4430_v57, -inf }
 0x2c6   : > { %2240 = vmax.xlane.f32.xlu1 %v2239_v63  ;;  %v2106_v9 = vpop.xlane.xlu1 %2105  ;;  %v2284_v24 = vsel %vm389_vm2, %v5053_v7, -inf }
 0x2c7   : > { %2234 = vmax.xlane.f32.xlu2 %v2233_v47  ;;  %2237 = vmax.xlane.f32.xlu0 %v2236_v10  ;;  %v2109_v30 = vpop.xlane.xlu2 %2108  ;;  %v2474_v54 = vperm.slane %v2106_v9, %v4542_v38 }
 0x2c8   : > { %v2475_v4 = vperm.slane %v2109_v30, %v4548_v55  ;;  %v2103_v59 = vpop.xlane.xlu0 %2102 }
 0x2c9   : > { %v2472_v13 = vperm.slane %v2103_v59, %v4548_v55  ;;  %v2275_v59 = vsel %vm389_vm2, %v4421_v12, -inf  ;;  %v2281_v12 = vsel %vm389_vm2, %v4409_v2, -inf }
 0x2ca   : > { %v2476_v56 = vsel %vm2457_vm4, %v2475_v4, %v2474_v54 }
 0x2cb   : > { %v2473_v17 = vsel %vm2457_vm4, %v2472_v13, %v2471_v16  ;;  %v2272_v16 = vsel %vm389_vm2, %v5052_v14, -inf }
 0x2cc   : > { %v2609_v1 = vsel %vm2608_vm9, %v2473_v17, %v2607_v62 }
 0x2cd   : > { %v2611_v63 = vsel %vm2610_vm10, %v2476_v56, %v2609_v1 }
 0x2ce   : > { %2249 = vmax.xlane.f32.xlu1 %v2248_v6  ;;  %v2613_v43 = vsel %vm2612_vm11, %v2479_v45, %v2611_v63  ;;  %v2160_v47 = vpop.xlane.xlu1 %2159  ;;  %v5054_v6 = vld [vmem:[#allocation34_spill] sm:$0xff]  ;;  %v2293_v63 = vsel %vm389_vm2, %v4412_v28, -inf }
 0x2cf   : > { %2243 = vmax.xlane.f32.xlu2 %v2242_v37  ;;  %2246 = vmax.xlane.f32.xlu0 %v2245_v58  ;;  %2655 = vst.msk [vmem:[%s4604_s13] sm:$0xff] %vm389_vm2, %v2613_v43  ;;  %v4614_v49 = vpop.xlane.xlu2 %2207  ;;  %v2501_v9 = vperm.slane %v2160_v47, %v4542_v38  ;;  %v2278_v32 = vsel %vm389_vm2, %v5054_v6, -inf }
 0x2d0   : > { %v4617_v10 = vpop.xlane.xlu0 %2210  ;;  %v2525_v57 = vperm.slane %v4614_v49, %v4542_v38  ;;  %v5056_v49 = vld [vmem:[#allocation19_spill] sm:$0xff] }
 0x2d1   : > { %v2302_v14 = vsel %vm389_vm2, %v5056_v49, -inf }
 0x2d6   : > { %2258 = vmax.xlane.f32.xlu1 %v2257_v60 }
 0x2d7   : > { %2252 = vmax.xlane.f32.xlu2 %v2251_v27  ;;  %2255 = vmax.xlane.f32.xlu0 %v2254_v33  ;;  %v5055_v27 = vld [vmem:[#allocation33_spill] sm:$0xff] }
 0x2d8   : > { %v2169_v26 = vpop.xlane.xlu1 %2168  ;;  %v2290_v35 = vsel %vm389_vm2, %v5055_v27, -inf }
 0x2d9   : > { %v2163_v15 = vpop.xlane.xlu2 %2162  ;;  %v2505_v52 = vperm.slane %v2169_v26, %v4548_v55 }
 0x2da   : > { %v2502_v34 = vperm.slane %v2163_v15, %v4548_v55  ;;  %v2166_v40 = vpop.xlane.xlu0 %2165 }
 0x2db   : > { %v2504_v56 = vperm.slane %v2166_v40, %v4542_v38  ;;  %v2526_v40 = vperm.slane %v4617_v10, %v4548_v55 }
 0x2dc   : > { %v4627_v30 = vsel %vm2457_vm4, %v2502_v34, %v2501_v9 }
 0x2dd   : > { %v2506_v25 = vsel %vm2457_vm4, %v2505_v52, %v2504_v56  ;;  %v5059_v52 = vld [vmem:[#allocation22_spill] sm:$0xff] }
 0x2de   : > { %2267 = vmax.xlane.f32.xlu1 %v2266_v19 }
 0x2df   : > { %2261 = vmax.xlane.f32.xlu2 %v2260_v21  ;;  %2264 = vmax.xlane.f32.xlu0 %v2263_v48 }
 0x2e0   : > { %v2178_v36 = vpop.xlane.xlu1 %2177 }
 0x2e1   : > { %v2172_v54 = vpop.xlane.xlu2 %2171  ;;  %v2510_v58 = vperm.slane %v2178_v36, %v4542_v38 }
 0x2e2   : > { %v2175_v4 = vpop.xlane.xlu0 %2174  ;;  %v2507_v44 = vperm.slane %v2172_v54, %v4542_v38 }
 0x2e3   : > { %v2508_v37 = vperm.slane %v2175_v4, %v4548_v55 }
 0x2e5   : > { %v2509_v45 = vsel %vm2457_vm4, %v2508_v37, %v2507_v44  ;;  %v2311_v37 = vsel %vm389_vm2, %v4443_v22, -inf  ;;  %v2317_v22 = vsel %vm389_vm2, %v4439_v50, -inf }
 0x2e6   : > { %2276 = vmax.xlane.f32.xlu1 %v2275_v59  ;;  %v2621_v28 = vsel %vm2600_vm5, %v2509_v45, %v2506_v25  ;;  %v2314_v45 = vsel %vm389_vm2, %v5059_v52, -inf }
 0x2e7   : > { %2270 = vmax.xlane.f32.xlu2 %v2269_v61  ;;  %2273 = vmax.xlane.f32.xlu0 %v2272_v16 }
 0x2e9   : > { %v2187_v53 = vpop.xlane.xlu1 %2186 }
 0x2ea   : > { %v2181_v13 = vpop.xlane.xlu2 %2180  ;;  %v2184_v8 = vpop.xlane.xlu0 %2183  ;;  %v2514_v60 = vperm.slane %v2187_v53, %v4548_v55  ;;  %v5057_v53 = vld [vmem:[#allocation37_spill] sm:$0xff] }
 0x2eb   : > { %v2511_v62 = vperm.slane %v2181_v13, %v4548_v55  ;;  %v2513_v2 = vperm.slane %v2184_v8, %v4542_v38  ;;  %v2296_v13 = vsel %vm389_vm2, %v5057_v53, -inf  ;;  %v2527_v8 = vsel %vm2457_vm4, %v2526_v40, %v2525_v57  ;;  %v5061_v57 = vld [vmem:[#allocation26_spill] sm:$0xff] }
 0x2ec   : > { %v2338_v40 = vsel %vm389_vm2, %v5061_v57, -inf }
 0x2ed   : > { %v2512_v42 = vsel %vm2457_vm4, %v2511_v62, %v2510_v58  ;;  %v2515_v26 = vsel %vm2457_vm4, %v2514_v60, %v2513_v2  ;;  %v2308_v62 = vsel %vm389_vm2, %v4121_v18, -inf  ;;  %v2329_v18 = vsel %vm389_vm2, %v4405_v41, -inf }
 0x2ee   : > { %2285 = vmax.xlane.f32.xlu1 %v2284_v24  ;;  %v2622_v33 = vsel %vm2602_vm6, %v2512_v42, %v2621_v28  ;;  %v2299_v24 = vsel %vm389_vm2, %v4416_v39, -inf  ;;  %v2323_v42 = vsel %vm389_vm2, %v4460_v46, -inf }
 0x2ef   : > { %2279 = vmax.xlane.f32.xlu2 %v2278_v32  ;;  %2282 = vmax.xlane.f32.xlu0 %v2281_v12  ;;  %v2623_v36 = vsel %vm2604_vm7, %v2515_v26, %v2622_v33 }
 0x2f1   : > { %v2196_v20 = vpop.xlane.xlu1 %2195 }
 0x2f2   : > { %v2190_v17 = vpop.xlane.xlu2 %2189  ;;  %v2193_v1 = vpop.xlane.xlu0 %2192  ;;  %v2519_v19 = vperm.slane %v2196_v20, %v4542_v38  ;;  %v2305_v20 = vsel %vm389_vm2, %v4402_v51, -inf }
 0x2f3   : > { %v2516_v43 = vperm.slane %v2190_v17, %v4542_v38  ;;  %v2517_v47 = vperm.slane %v2193_v1, %v4548_v55  ;;  %v5058_v1 = vld [vmem:[#allocation25_spill] sm:$0xff] }
 0x2f4   : > { %v2320_v58 = vsel %vm389_vm2, %v5058_v1, -inf }
 0x2f5   : > { %v2518_v9 = vsel %vm2457_vm4, %v2517_v47, %v2516_v43  ;;  %v5060_v47 = vld [vmem:[#allocation23_spill] sm:$0xff] }
 0x2f6   : > { %2294 = vmax.xlane.f32.xlu1 %v2293_v63  ;;  %v2624_v59 = vsel %vm2606_vm8, %v2518_v9, %v2623_v36  ;;  %v2332_v36 = vsel %vm389_vm2, %v4268_v23, -inf }
 0x2f7   : > { %2288 = vmax.xlane.f32.xlu2 %v2287_v11  ;;  %2291 = vmax.xlane.f32.xlu0 %v2290_v35  ;;  %v2326_v11 = vsel %vm389_vm2, %v5060_v47, -inf }
 0x2f9   : > { %v2205_v15 = vpop.xlane.xlu1 %2204 }
 0x2fa   : > { %v2199_v34 = vpop.xlane.xlu2 %2198  ;;  %v2202_v48 = vpop.xlane.xlu0 %2201  ;;  %v2523_v54 = vperm.slane %v2205_v15, %v4548_v55 }
 0x2fb   : > { %v2520_v21 = vperm.slane %v2199_v34, %v4548_v55  ;;  %v2522_v4 = vperm.slane %v2202_v48, %v4542_v38 }
 0x2fd   : > { %v2521_v61 = vsel %vm2457_vm4, %v2520_v21, %v2519_v19  ;;  %v2524_v16 = vsel %vm2457_vm4, %v2523_v54, %v2522_v4 }
 0x2fe   : > { %v2625_v10 = vsel %vm2608_vm9, %v2521_v61, %v2624_v59  ;;  %2303 = vmax.xlane.f32.xlu1 %v2302_v14  ;;  %v2335_v59 = vsel %vm389_vm2, %v4463_v5, -inf }
 0x2ff   : > { %v2626_v7 = vsel %vm2610_vm10, %v2524_v16, %v2625_v10  ;;  %2297 = vmax.xlane.f32.xlu2 %v2296_v13  ;;  %2300 = vmax.xlane.f32.xlu0 %v2299_v24  ;;  %v2347_v24 = vsel %vm389_vm2, %v4448_v31, -inf }
 0x300   : > { %v2627_v6 = vsel %vm2612_vm11, %v2527_v8, %v2626_v7 }
 0x301   : > { %2657 = vst.msk [vmem:[%s4604_s13 + $0x10] sm:$0xff] %vm389_vm2, %v2627_v6  ;;  %v2124_v32 = vpop.xlane.xlu1 %2123 }
 0x302   : > { %v2118_v12 = vpop.xlane.xlu2 %2117  ;;  %v2121_v44 = vpop.xlane.xlu0 %2120  ;;  %v2483_v50 = vperm.slane %v2124_v32, %v4542_v38 }
 0x303   : > { %v2480_v25 = vperm.slane %v2118_v12, %v4542_v38  ;;  %v2481_v60 = vperm.slane %v2121_v44, %v4548_v55  ;;  %v2341_v12 = vsel %vm389_vm2, %v4452_v29, -inf  ;;  %v2353_v29 = vsel %vm389_vm2, %v4455_v3, -inf }
 0x305   : > { %v2482_v34 = vsel %vm2457_vm4, %v2481_v60, %v2480_v25 }
 0x306   : > { %2312 = vmax.xlane.f32.xlu1 %v2311_v37  ;;  %v2344_v37 = vsel %vm389_vm2, %v4275_v0, -inf }
 0x307   : > { %2306 = vmax.xlane.f32.xlu2 %v2305_v20  ;;  %2309 = vmax.xlane.f32.xlu0 %v2308_v62 }
 0x309   : > { %v2133_v39 = vpop.xlane.xlu1 %2132 }
 0x30a   : > { %v2127_v17 = vpop.xlane.xlu2 %2126  ;;  %v2130_v56 = vpop.xlane.xlu0 %2129  ;;  %v2487_v15 = vperm.slane %v2133_v39, %v4548_v55 }
 0x30b   : > { %v2484_v43 = vperm.slane %v2127_v17, %v4548_v55  ;;  %v2486_v41 = vperm.slane %v2130_v56, %v4542_v38  ;;  %v5062_v17 = vld [vmem:[#allocation27_spill] sm:$0xff] }
 0x30c   : > { %v2350_v56 = vsel %vm389_vm2, %v5062_v17, -inf }
 0x30d   : > { %v2485_v28 = vsel %vm2457_vm4, %v2484_v43, %v2483_v50  ;;  %v2488_v21 = vsel %vm2457_vm4, %v2487_v15, %v2486_v41 }
 0x30e   : > { %2321 = vmax.xlane.f32.xlu1 %v2320_v58  ;;  %v2614_v19 = vsel %vm2600_vm5, %v2485_v28, %v2482_v34 }
 0x30f   : > { %2315 = vmax.xlane.f32.xlu2 %v2314_v45  ;;  %2318 = vmax.xlane.f32.xlu0 %v2317_v22  ;;  %v2615_v49 = vsel %vm2602_vm6, %v2488_v21, %v2614_v19 }
 0x311   : > { %v2142_v51 = vpop.xlane.xlu1 %2141 }
 0x312   : > { %v2136_v2 = vpop.xlane.xlu2 %2135  ;;  %v2139_v63 = vpop.xlane.xlu0 %2138  ;;  %v2492_v48 = vperm.slane %v2142_v51, %v4542_v38 }
 0x313   : > { %v2489_v46 = vperm.slane %v2136_v2, %v4542_v38  ;;  %v2490_v33 = vperm.slane %v2139_v63, %v4548_v55 }
 0x315   : > { %v2491_v54 = vsel %vm2457_vm4, %v2490_v33, %v2489_v46 }
 0x316   : > { %2330 = vmax.xlane.f32.xlu1 %v2329_v18  ;;  %v2616_v16 = vsel %vm2604_vm7, %v2491_v54, %v2615_v49 }
 0x317   : > { %2324 = vmax.xlane.f32.xlu2 %v2323_v42  ;;  %2327 = vmax.xlane.f32.xlu0 %v2326_v11 }
 0x319   : > { %v2151_v27 = vpop.xlane.xlu1 %2150 }
 0x31a   : > { %v2145_v35 = vpop.xlane.xlu2 %2144  ;;  %v2148_v26 = vpop.xlane.xlu0 %2147  ;;  %v2496_v14 = vperm.slane %v2151_v27, %v4548_v55 }
 0x31b   : > { %v2493_v9 = vperm.slane %v2145_v35, %v4548_v55  ;;  %v2495_v4 = vperm.slane %v2148_v26, %v4542_v38 }
 0x31d   : > { %v2494_v61 = vsel %vm2457_vm4, %v2493_v9, %v2492_v48  ;;  %v2497_v13 = vsel %vm2457_vm4, %v2496_v14, %v2495_v4 }
 0x31e   : > { %2339 = vmax.xlane.f32.xlu1 %v2338_v40  ;;  %v2617_v23 = vsel %vm2606_vm8, %v2494_v61, %v2616_v16 }
 0x31f   : > { %2333 = vmax.xlane.f32.xlu2 %v2332_v36  ;;  %2336 = vmax.xlane.f32.xlu0 %v2335_v59  ;;  %v2618_v6 = vsel %vm2608_vm9, %v2497_v13, %v2617_v23 }
 0x321   : > { %v2214_v10 = vpop.xlane.xlu1 %2213 }
 0x322   : > { %v2154_v53 = vpop.xlane.xlu2 %2153  ;;  %v2157_v7 = vpop.xlane.xlu0 %2156  ;;  %v2528_v42 = vperm.slane %v2214_v10, %v4542_v38 }
 0x323   : > { %v2498_v8 = vperm.slane %v2154_v53, %v4542_v38  ;;  %v2499_v5 = vperm.slane %v2157_v7, %v4548_v55 }
 0x325   : > { %v2500_v32 = vsel %vm2457_vm4, %v2499_v5, %v2498_v8 }
 0x326   : > { %2348 = vmax.xlane.f32.xlu1 %v2347_v24  ;;  %v2619_v44 = vsel %vm2610_vm10, %v2500_v32, %v2618_v6 }
 0x327   : > { %2342 = vmax.xlane.f32.xlu2 %v2341_v12  ;;  %v2620_v20 = vsel %vm2612_vm11, %v4627_v30, %v2619_v44  ;;  %2345 = vmax.xlane.f32.xlu0 %v2344_v37 }
 0x328   : > { %2656 = vst.msk [vmem:[%s4604_s13 + $0x8] sm:$0xff] %vm389_vm2, %v2620_v20 }
 0x329   : > { %v2223_v31 = vpop.xlane.xlu1 %2222 }
 0x32a   : > { %v2217_v62 = vpop.xlane.xlu2 %2216  ;;  %v2220_v39 = vpop.xlane.xlu0 %2219  ;;  %v2532_v3 = vperm.slane %v2223_v31, %v4548_v55 }
 0x32b   : > { %v2529_v22 = vperm.slane %v2217_v62, %v4548_v55  ;;  %v2531_v51 = vperm.slane %v2220_v39, %v4542_v38 }
 0x32d   : > { %v2530_v50 = vsel %vm2457_vm4, %v2529_v22, %v2528_v42  ;;  %v2533_v25 = vsel %vm2457_vm4, %v2532_v3, %v2531_v51 }
 0x32e   : > { %v2628_v33 = vsel %vm2600_vm5, %v2533_v25, %v2530_v50 }
 0x32f   : > { %2351 = vmax.xlane.f32.xlu2 %v2350_v56  ;;  %2354 = vmax.xlane.f32.xlu0 %v2353_v29 }
 0x331   : > { %v2232_v1 = vpop.xlane.xlu1 %2231 }
 0x332   : > { %v2226_v58 = vpop.xlane.xlu2 %2225  ;;  %v2229_v0 = vpop.xlane.xlu0 %2228  ;;  %v2537_v60 = vperm.slane %v2232_v1, %v4542_v38 }
 0x333   : > { %v2534_v2 = vperm.slane %v2226_v58, %v4542_v38  ;;  %v2535_v63 = vperm.slane %v2229_v0, %v4548_v55 }
 0x335   : > { %v2536_v27 = vsel %vm2457_vm4, %v2535_v63, %v2534_v2 }
 0x336   : > { %v2629_v15 = vsel %vm2602_vm6, %v2536_v27, %v2628_v33 }
 0x339   : > { %v2241_v52 = vpop.xlane.xlu1 %2240 }
 0x33a   : > { %v2235_v45 = vpop.xlane.xlu2 %2234  ;;  %v2238_v30 = vpop.xlane.xlu0 %2237  ;;  %v2541_v26 = vperm.slane %v2241_v52, %v4548_v55 }
 0x33b   : > { %v2538_v43 = vperm.slane %v2235_v45, %v4548_v55  ;;  %v2540_v41 = vperm.slane %v2238_v30, %v4542_v38 }
 0x33d   : > { %v2539_v35 = vsel %vm2457_vm4, %v2538_v43, %v2537_v60  ;;  %v2542_v34 = vsel %vm2457_vm4, %v2541_v26, %v2540_v41 }
 0x33e   : > { %v2630_v9 = vsel %vm2604_vm7, %v2539_v35, %v2629_v15 }
 0x33f   : > { %v2631_v54 = vsel %vm2606_vm8, %v2542_v34, %v2630_v9 }
 0x341   : > { %v2250_v18 = vpop.xlane.xlu1 %2249 }
 0x342   : > { %v2244_v47 = vpop.xlane.xlu2 %2243  ;;  %v2247_v11 = vpop.xlane.xlu0 %2246  ;;  %v2546_v21 = vperm.slane %v2250_v18, %v4542_v38 }
 0x343   : > { %v2543_v28 = vperm.slane %v2244_v47, %v4542_v38  ;;  %v2544_v46 = vperm.slane %v2247_v11, %v4548_v55 }
 0x345   : > { %v2545_v40 = vsel %vm2457_vm4, %v2544_v46, %v2543_v28 }
 0x346   : > { %v2632_v61 = vsel %vm2608_vm9, %v2545_v40, %v2631_v54 }
 0x349   : > { %v2259_v57 = vpop.xlane.xlu1 %2258 }
 0x34a   : > { %v2253_v19 = vpop.xlane.xlu2 %2252  ;;  %v2256_v36 = vpop.xlane.xlu0 %2255  ;;  %v2550_v4 = vperm.slane %v2259_v57, %v4548_v55 }
 0x34b   : > { %v2547_v48 = vperm.slane %v2253_v19, %v4548_v55  ;;  %v2549_v59 = vperm.slane %v2256_v36, %v4542_v38 }
 0x34d   : > { %v2548_v49 = vsel %vm2457_vm4, %v2547_v48, %v2546_v21  ;;  %v2551_v10 = vsel %vm2457_vm4, %v2550_v4, %v2549_v59 }
 0x34e   : > { %v2633_v14 = vsel %vm2610_vm10, %v2548_v49, %v2632_v61 }
 0x34f   : > { %v2634_v16 = vsel %vm2612_vm11, %v2551_v10, %v2633_v14 }
 0x350   : > { %2658 = vst.msk [vmem:[%s4604_s13 + $0x18] sm:$0xff] %vm389_vm2, %v2634_v16 }
 0x351   : > { %v2268_v53 = vpop.xlane.xlu1 %2267 }
 0x352   : > { %v2262_v23 = vpop.xlane.xlu2 %2261  ;;  %v2265_v13 = vpop.xlane.xlu0 %2264  ;;  %v2555_v31 = vperm.slane %v2268_v53, %v4542_v38 }
 0x353   : > { %v2552_v62 = vperm.slane %v2262_v23, %v4542_v38  ;;  %v2553_v39 = vperm.slane %v2265_v13, %v4548_v55 }
 0x355   : > { %v2554_v30 = vsel %vm2457_vm4, %v2553_v39, %v2552_v62 }
 0x359   : > { %v2277_v8 = vpop.xlane.xlu1 %2276 }
 0x35a   : > { %v2271_v7 = vpop.xlane.xlu2 %2270  ;;  %v2274_v5 = vpop.xlane.xlu0 %2273  ;;  %v2559_v0 = vperm.slane %v2277_v8, %v4548_v55 }
 0x35b   : > { %v2556_v20 = vperm.slane %v2271_v7, %v4548_v55  ;;  %v2558_v17 = vperm.slane %v2274_v5, %v4542_v38 }
 0x35d   : > { %v2557_v56 = vsel %vm2457_vm4, %v2556_v20, %v2555_v31  ;;  %v2560_v2 = vsel %vm2457_vm4, %v2559_v0, %v2558_v17 }
 0x35e   : > { %v2635_v51 = vsel %vm2600_vm5, %v2557_v56, %v2554_v30 }
 0x35f   : > { %v2636_v11 = vsel %vm2602_vm6, %v2560_v2, %v2635_v51 }
 0x361   : > { %v2286_v24 = vpop.xlane.xlu1 %2285 }
 0x362   : > { %v2280_v6 = vpop.xlane.xlu2 %2279  ;;  %v2283_v32 = vpop.xlane.xlu0 %2282  ;;  %v2564_v63 = vperm.slane %v2286_v24, %v4542_v38 }
 0x363   : > { %v2561_v29 = vperm.slane %v2280_v6, %v4542_v38  ;;  %v2562_v1 = vperm.slane %v2283_v32, %v4548_v55 }
 0x365   : > { %v2563_v18 = vsel %vm2457_vm4, %v2562_v1, %v2561_v29 }
 0x366   : > { %v2637_v25 = vsel %vm2604_vm7, %v2563_v18, %v2636_v11 }
 0x369   : > { %v2295_v12 = vpop.xlane.xlu1 %2294 }
 0x36a   : > { %v2289_v44 = vpop.xlane.xlu2 %2288  ;;  %v2292_v37 = vpop.xlane.xlu0 %2291  ;;  %v2568_v50 = vperm.slane %v2295_v12, %v4548_v55 }
 0x36b   : > { %v2565_v52 = vperm.slane %v2289_v44, %v4548_v55  ;;  %v2567_v42 = vperm.slane %v2292_v37, %v4542_v38 }
 0x36d   : > { %v2566_v3 = vsel %vm2457_vm4, %v2565_v52, %v2564_v63  ;;  %v2569_v27 = vsel %vm2457_vm4, %v2568_v50, %v2567_v42 }
 0x36e   : > { %v2638_v60 = vsel %vm2606_vm8, %v2566_v3, %v2637_v25 }
 0x36f   : > { %v2639_v15 = vsel %vm2608_vm9, %v2569_v27, %v2638_v60 }
 0x371   : > { %v2304_v58 = vpop.xlane.xlu1 %2303 }
 0x372   : > { %v2298_v45 = vpop.xlane.xlu2 %2297  ;;  %v2301_v22 = vpop.xlane.xlu0 %2300  ;;  %v2573_v46 = vperm.slane %v2304_v58, %v4542_v38 }
 0x373   : > { %v2570_v43 = vperm.slane %v2298_v45, %v4542_v38  ;;  %v2571_v47 = vperm.slane %v2301_v22, %v4548_v55 }
 0x375   : > { %v2572_v35 = vsel %vm2457_vm4, %v2571_v47, %v2570_v43 }
 0x376   : > { %v2640_v9 = vsel %vm2610_vm10, %v2572_v35, %v2639_v15 }
 0x379   : > { %v2313_v41 = vpop.xlane.xlu1 %2312 }
 0x37a   : > { %v2307_v28 = vpop.xlane.xlu2 %2306  ;;  %v2310_v26 = vpop.xlane.xlu0 %2309  ;;  %v2577_v23 = vperm.slane %v2313_v41, %v4548_v55 }
 0x37b   : > { %v2574_v33 = vperm.slane %v2307_v28, %v4548_v55  ;;  %v2576_v16 = vperm.slane %v2310_v26, %v4542_v38 }
 0x37d   : > { %v2575_v34 = vsel %vm2457_vm4, %v2574_v33, %v2573_v46  ;;  %v2578_v12 = vsel %vm2457_vm4, %v2577_v23, %v2576_v16 }
 0x37e   : > { %v2641_v57 = vsel %vm2612_vm11, %v2575_v34, %v2640_v9 }
 0x37f   : > { %2659 = vst.msk [vmem:[%s4604_s13 + $0x20] sm:$0xff] %vm389_vm2, %v2641_v57 }
 0x381   : > { %v2322_v40 = vpop.xlane.xlu1 %2321 }
 0x382   : > { %v2316_v19 = vpop.xlane.xlu2 %2315  ;;  %v2319_v21 = vpop.xlane.xlu0 %2318  ;;  %v2582_v53 = vperm.slane %v2322_v40, %v4542_v38 }
 0x383   : > { %v2579_v49 = vperm.slane %v2316_v19, %v4542_v38  ;;  %v2580_v14 = vperm.slane %v2319_v21, %v4548_v55 }
 0x385   : > { %v2581_v13 = vsel %vm2457_vm4, %v2580_v14, %v2579_v49 }
 0x386   : > { %v2642_v20 = vsel %vm2600_vm5, %v2581_v13, %v2578_v12 }
 0x389   : > { %v2331_v48 = vpop.xlane.xlu1 %2330 }
 0x38a   : > { %v2325_v36 = vpop.xlane.xlu2 %2324  ;;  %v2328_v54 = vpop.xlane.xlu0 %2327  ;;  %v2586_v44 = vperm.slane %v2331_v48, %v4548_v55 }
 0x38b   : > { %v2583_v10 = vperm.slane %v2325_v36, %v4548_v55  ;;  %v2585_v8 = vperm.slane %v2328_v54, %v4542_v38 }
 0x38d   : > { %v2584_v5 = vsel %vm2457_vm4, %v2583_v10, %v2582_v53  ;;  %v2587_v62 = vsel %vm2457_vm4, %v2586_v44, %v2585_v8 }
 0x38e   : > { %v2643_v31 = vsel %vm2602_vm6, %v2584_v5, %v2642_v20 }
 0x38f   : > { %v2644_v58 = vsel %vm2604_vm7, %v2587_v62, %v2643_v31 }
 0x391   : > { %v2340_v61 = vpop.xlane.xlu1 %2339 }
 0x392   : > { %v2334_v4 = vpop.xlane.xlu2 %2333  ;;  %v2337_v59 = vpop.xlane.xlu0 %2336  ;;  %v2591_v39 = vperm.slane %v2340_v61, %v4542_v38 }
 0x393   : > { %v2588_v24 = vperm.slane %v2334_v4, %v4542_v38  ;;  %v2589_v6 = vperm.slane %v2337_v59, %v4548_v55 }
 0x395   : > { %v2590_v56 = vsel %vm2457_vm4, %v2589_v6, %v2588_v24 }
 0x396   : > { %v2645_v52 = vsel %vm2606_vm8, %v2590_v56, %v2644_v58 }
 0x399   : > { %v2349_v17 = vpop.xlane.xlu1 %2348 }
 0x39a   : > { %v2343_v7 = vpop.xlane.xlu2 %2342  ;;  %v2346_v32 = vpop.xlane.xlu0 %2345  ;;  %v2595_v0 = vperm.slane %v2349_v17, %v4548_v55 }
 0x39b   : > { %v2592_v37 = vperm.slane %v2343_v7, %v4548_v55  ;;  %v2594_v29 = vperm.slane %v2346_v32, %v4542_v38 }
 0x39d   : > { %v2593_v1 = vsel %vm2457_vm4, %v2592_v37, %v2591_v39  ;;  %v2596_v22 = vsel %vm2457_vm4, %v2595_v0, %v2594_v29 }
 0x39e   : > { %v2646_v30 = vsel %vm2608_vm9, %v2593_v1, %v2645_v52 }
 0x39f   : > { %v2647_v18 = vsel %vm2610_vm10, %v2596_v22, %v2646_v30 }
 0x3a2   : > { %v2352_v45 = vpop.xlane.xlu2 %2351  ;;  %v2355_v2 = vpop.xlane.xlu0 %2354 }
 0x3a3   : > { %v2597_v51 = vperm.slane %v2352_v45, %v4542_v38  ;;  %v2598_v63 = vperm.slane %v2355_v2, %v4548_v55 }
 0x3a5   : > { %v2599_v42 = vsel %vm2457_vm4, %v2598_v63, %v2597_v51 }
 0x3a6   : > { %v2648_v3 = vsel %vm2612_vm11, %v2599_v42, %v2647_v18 }
 0x3a7   : > { %2660 = vst.msk [vmem:[%s4604_s13 + $0x28] sm:$0xff] %vm389_vm2, %v2648_v3 }
 0x3a8 PF: > { %s15_s20 = sadd.s32 1, %s2845_s20   ;;  %s5063_s18 = smov %s2841_s19 }
 0x3a9   : > { %p12_p5 = scmp.ge.s32.totalorder %s15_s20, 4   ;;  %s5064_s19 = smov %s5066_s21 }
 0x3ab   :  { %14 = sbr.rel (!%p12_p5) target bundleno = 2 (0x2), region = 70 }

</bundles_post_ra>
